<compile_context>
chip_gen: v7x
topology: tpu7x:2x2x1
jax: 0.10.0
libtpu: 0.0.40
codegen_flags: <defaults>
</compile_context>

<pallas_src>
import functools

import jax
import jax.numpy as jnp
from jax.experimental import pallas as pl
from jax.experimental.pallas import tpu as pltpu

LANE = 128

_COMPILER_PARAMS = pltpu.CompilerParams(
    dimension_semantics=("arbitrary",),
    vmem_limit_bytes=32 * 1024 * 1024,
)


def _rup(n, m=LANE):
    return ((n + m - 1) // m) * m


def _full(shape):
    """Whole-array block, single grid step."""
    return pl.BlockSpec(shape, lambda i: (0,) * len(shape))


def _conv_nchw(x, w):
    """PyTorch-style valid cross-correlation, NCHW/OIHW, full f32 precision."""
    return jax.lax.conv_general_dilated(
        x, w, window_strides=(1, 1), padding="VALID",
        dimension_numbers=("NCHW", "OIHW", "NCHW"),
        precision=jax.lax.Precision.HIGHEST)


# ----------------------------- Pallas kernel --------------------------------


def _autoencoder_kernel(
        x_ref,
        wc1_ref, bc1_ref, wc2_ref, bc2_ref,
        wfc1_ref, bfc1_ref, wfc2_ref, bfc2_ref, wfc3_ref, bfc3_ref,
        wt1_ref, bt1_ref, wt2_ref, bt2_ref, wt3_ref, bt3_ref,
        wtc1_ref, btc1_ref, wtc2_ref, btc2_ref,
        wcls_ref, bcls_ref,
        recon_ref, logits_ref,
        *, pw1, pw2):
    """Whole AutoEncoder forward.  Every layer is a (batch, K)x(K, N) matmul on
    the MXU with f32 accumulate; bias/ReLU/max-pool epilogues in f32 on the
    VPU.  Padded lanes of every weight/bias are zero, so padding never leaks
    into real outputs."""
    bf16 = jnp.bfloat16

    def mm(a, w_ref, b_ref):
        return jnp.dot(a.astype(bf16), w_ref[...],
                       preferred_element_type=jnp.float32) + b_ref[...]

    def relu(v):
        return jnp.maximum(v, 0.0)

    def pool4(v, w):
        # Fused 2x2 max-pool: lanes are 4 pooling-phase blocks of width w
        # (w is a multiple of 128 -> clean lane slices, no relayout).
        return jnp.maximum(jnp.maximum(v[:, 0:w], v[:, w:2 * w]),
                           jnp.maximum(v[:, 2 * w:3 * w], v[:, 3 * w:4 * w]))

    x = x_ref[...]                                     # (B, rup(H*W)) bf16
    a1 = pool4(relu(mm(x, wc1_ref, bc1_ref)), pw1)     # conv1 + ReLU + pool
    a2 = pool4(relu(mm(a1, wc2_ref, bc2_ref)), pw2)    # conv2 + ReLU + pool
    h = relu(mm(a2, wfc1_ref, bfc1_ref))               # fc1
    h = relu(mm(h, wfc2_ref, bfc2_ref))                # fc2
    enc = mm(h, wfc3_ref, bfc3_ref)                    # fc3 (bottleneck, no ReLU)
    d = relu(mm(enc, wt1_ref, bt1_ref))                # t_fc1
    d = relu(mm(d, wt2_ref, bt2_ref))                  # t_fc2
    d = mm(d, wt3_ref, bt3_ref)                        # t_fc3 (no ReLU)
    a3 = relu(mm(d, wtc1_ref, btc1_ref))               # upsample + t_conv1 + ReLU
    recon = mm(a3, wtc2_ref, btc2_ref)                 # upsample + t_conv2 (lane-dense)
    recon_ref[...] = recon
    # Classifier: one f32 MXU matmul on the exact (un-rounded) reconstruction.
    logits_ref[...] = jnp.dot(recon, wcls_ref[...],
                              preferred_element_type=jnp.float32) + bcls_ref[...]


# ------------------------------ parameters ----------------------------------


def _sizes(input_size):
    s0 = input_size
    c1s = s0 - 4
    p1s = c1s // 2
    c2s = p1s - 4
    p2s = c2s // 2
    fc3s = p2s
    t1s = 2 * fc3s + 4
    return s0, p1s, p2s, fc3s, t1s


def init_params(key, input_size, num_labels):
    """PyTorch-layout parameters (Conv2d/ConvTranspose2d: torch shapes;
    Linear: (out, in))."""
    _, _, p2s, fc3s, _ = _sizes(input_size)
    specs = {
        "conv1_w": (6, 1, 5, 5), "conv1_b": (6,),
        "conv2_w": (16, 6, 5, 5), "conv2_b": (16,),
        "fc1_w": (300, 16 * p2s * p2s), "fc1_b": (300,),
        "fc2_w": (250, 300), "fc2_b": (250,),
        "fc3_w": (150, 250), "fc3_b": (150,),
        "t_fc1_w": (250, 150), "t_fc1_b": (250,),
        "t_fc2_w": (300, 250), "t_fc2_b": (300,),
        "t_fc3_w": (16 * fc3s * fc3s, 300), "t_fc3_b": (16 * fc3s * fc3s,),
        "t_conv1_w": (16, 6, 5, 5), "t_conv1_b": (6,),
        "t_conv2_w": (6, 1, 5, 5), "t_conv2_b": (1,),
        "cls_w": (num_labels, input_size ** 2), "cls_b": (num_labels,),
    }
    params = {}
    names = sorted(specs)
    keys = jax.random.split(key, len(names))
    for k, name in zip(keys, names):
        params[name] = 0.1 * jax.random.normal(k, specs[name], jnp.float32)
    return params


def prepare_params(p, input_size, num_labels):
    """One-time conversion of PyTorch-layout params to lane-dense dense-matmul
    weights.  Conv / ConvTranspose / 2x nearest upsample are folded into
    Toeplitz matrices by probing the linear maps with identity bases (plain
    XLA, runs once).  Matmul weights bf16, biases f32 rows."""
    assert input_size % 4 == 0 and input_size >= 16, input_size
    s0, p1s, p2s, fc3s, t1s = _sizes(input_size)
    assert 2 * t1s == s0 - 4                      # nn.Upsample targets are exact 2x
    bf16 = jnp.bfloat16
    kp = {}

    n_in = s0 * s0
    n1 = p1s * p1s * 6                            # pooled conv1 features / sample
    n2f = 16 * p2s * p2s                          # pooled conv2 features / sample
    nb = 16 * fc3s * fc3s                         # t_fc3 output features / sample
    n3 = t1s * t1s * 6                            # t_conv1 output features / sample
    pw1, pw2, pw3 = _rup(n1), _rup(n2f), _rup(n3)

    # ---- conv1 as Toeplitz matmul, columns grouped by 2x2 pooling phase ----
    eye = jnp.eye(n_in, dtype=jnp.float32).reshape(n_in, 1, s0, s0)
    y = _conv_nchw(eye, p["conv1_w"])                       # (n_in, 6, 2*p1s, 2*p1s)
    y = y.reshape(n_in, 6, p1s, 2, p1s, 2)                  # (B, c, py, dy, px, dx)
    y = y.transpose(0, 3, 5, 2, 4, 1)                       # (B, dy, dx, py, px, c)
    y = y.reshape(n_in, 4, n1)
    y = jnp.pad(y, ((0, _rup(n_in) - n_in), (0, 0), (0, pw1 - n1)))
    kp["wc1"] = y.reshape(_rup(n_in), 4 * pw1).astype(bf16)
    b = jnp.pad(jnp.tile(p["conv1_b"], p1s * p1s), (0, pw1 - n1))
    kp["bc1"] = jnp.tile(b, 4)[None, :]

    # ---- conv2 as Toeplitz matmul over the pooled-conv1 lane layout --------
    eye = jnp.eye(n1, dtype=jnp.float32).reshape(n1, p1s, p1s, 6).transpose(0, 3, 1, 2)
    y = _conv_nchw(eye, p["conv2_w"])                       # (n1, 16, 2*p2s, 2*p2s)
    y = y.reshape(n1, 16, p2s, 2, p2s, 2)                   # (B, c, py, dy, px, dx)
    y = y.transpose(0, 3, 5, 1, 2, 4)                       # (B, dy, dx, c, py, px)
    y = y.reshape(n1, 4, n2f)                               # within-phase = torch flatten order
    y = jnp.pad(y, ((0, pw1 - n1), (0, 0), (0, pw2 - n2f)))
    kp["wc2"] = y.reshape(pw1, 4 * pw2).astype(bf16)
    b = jnp.pad(jnp.repeat(p["conv2_b"], p2s * p2s), (0, pw2 - n2f))
    kp["bc2"] = jnp.tile(b, 4)[None, :]

    # ---- FC stack (plain transpose + zero-pad to 128-multiples) -----------
    def lin(wname, bname, kin, kout):
        wt = p[wname].T
        w = jnp.pad(wt, ((0, kin - wt.shape[0]), (0, kout - wt.shape[1]))).astype(bf16)
        b = jnp.pad(p[bname], (0, kout - p[bname].shape[0]))[None, :]
        return w, b

    kp["wfc1"], kp["bfc1"] = lin("fc1_w", "fc1_b", pw2, _rup(300))
    kp["wfc2"], kp["bfc2"] = lin("fc2_w", "fc2_b", _rup(300), _rup(250))
    kp["wfc3"], kp["bfc3"] = lin("fc3_w", "fc3_b", _rup(250), _rup(150))
    kp["wt1"], kp["bt1"] = lin("t_fc1_w", "t_fc1_b", _rup(150), _rup(250))
    kp["wt2"], kp["bt2"] = lin("t_fc2_w", "t_fc2_b", _rup(250), _rup(300))
    kp["wt3"], kp["bt3"] = lin("t_fc3_w", "t_fc3_b", _rup(300), _rup(nb))

    # ---- t_conv1: nearest-2x upsample + ConvTranspose folded into one dense map
    eye = jnp.eye(nb, dtype=jnp.float32).reshape(nb, 16, fc3s, fc3s)
    u = jnp.repeat(jnp.repeat(eye, 2, axis=2), 2, axis=3)
    u = jnp.pad(u, ((0, 0), (0, 0), (4, 4), (4, 4)))
    w_eq = jnp.flip(p["t_conv1_w"], (2, 3)).transpose(1, 0, 2, 3)   # (6,16,5,5)
    y = _conv_nchw(u, w_eq)                                 # (nb, 6, t1s, t1s)
    y = y.transpose(0, 2, 3, 1).reshape(nb, n3)             # lanes (oy, ox, oc)
    kp["wtc1"] = jnp.pad(y, ((0, _rup(nb) - nb), (0, pw3 - n3))).astype(bf16)
    kp["btc1"] = jnp.pad(jnp.tile(p["t_conv1_b"], t1s * t1s), (0, pw3 - n3))[None, :]

    # ---- t_conv2: upsample + ConvTranspose folded; output = lane-dense recon
    eye = jnp.eye(n3, dtype=jnp.float32).reshape(n3, t1s, t1s, 6).transpose(0, 3, 1, 2)
    u = jnp.repeat(jnp.repeat(eye, 2, axis=2), 2, axis=3)
    u = jnp.pad(u, ((0, 0), (0, 0), (4, 4), (4, 4)))
    w_eq = jnp.flip(p["t_conv2_w"], (2, 3)).transpose(1, 0, 2, 3)   # (1,6,5,5)
    y = _conv_nchw(u, w_eq).reshape(n3, n_in)               # lanes (y*s0 + x)
    kp["wtc2"] = jnp.pad(y, ((0, pw3 - n3), (0, _rup(n_in) - n_in))).astype(bf16)
    kp["btc2"] = jnp.pad(jnp.full((n_in,), p["t_conv2_b"][0]),
                         (0, _rup(n_in) - n_in))[None, :]

    # ---- classifier (kept f32 so logits see the exact recon) ---------------
    kp["wcls"] = jnp.pad(p["cls_w"].T,
                         ((0, _rup(n_in) - n_in), (0, _rup(num_labels) - num_labels)))
    kp["bcls"] = jnp.pad(p["cls_b"], (0, _rup(num_labels) - num_labels))[None, :]
    return kp


# ------------------------------ forward pass ---------------------------------


def autoencoder_forward(kp, x, *, input_size, num_labels):
    batch = x.shape[0]
    s0, p1s, p2s, _, _ = _sizes(input_size)
    n_in = s0 * s0
    pw1 = _rup(p1s * p1s * 6)
    pw2 = _rup(16 * p2s * p2s)

    # Only XLA-side glue: flatten + lane-pad + bf16 pre-cast of the input.
    x_pad = jnp.pad(x.reshape(batch, n_in),
                    ((0, 0), (0, _rup(n_in) - n_in))).astype(jnp.bfloat16)

    args = (x_pad,
            kp["wc1"], kp["bc1"], kp["wc2"], kp["bc2"],
            kp["wfc1"], kp["bfc1"], kp["wfc2"], kp["bfc2"], kp["wfc3"], kp["bfc3"],
            kp["wt1"], kp["bt1"], kp["wt2"], kp["bt2"], kp["wt3"], kp["bt3"],
            kp["wtc1"], kp["btc1"], kp["wtc2"], kp["btc2"],
            kp["wcls"], kp["bcls"])

    recon_shape = (batch, _rup(n_in))
    logit_shape = (batch, _rup(num_labels))
    recon_pad, logits_pad = pl.pallas_call(
        functools.partial(_autoencoder_kernel, pw1=pw1, pw2=pw2),
        out_shape=(jax.ShapeDtypeStruct(recon_shape, jnp.float32),
                   jax.ShapeDtypeStruct(logit_shape, jnp.float32)),
        grid=(1,),
        in_specs=[_full(a.shape) for a in args],
        out_specs=(_full(recon_shape), _full(logit_shape)),
        compiler_params=_COMPILER_PARAMS,
    )(*args)

    recon = recon_pad[:, :n_in].reshape(batch, 1, s0, s0)
    logits = logits_pad[:, :num_labels]
    return recon, logits


# ------------------------------ f32 reference --------------------------------


def reference_forward(p, x, *, input_size):
    """Pure-JAX f32 mirror of the PyTorch AutoEncoder forward."""
    hi = jax.lax.Precision.HIGHEST
    dot = lambda a, b: jnp.dot(a, b, precision=hi)
    relu = lambda v: jnp.maximum(v, 0.0)

    def conv(v, w, b):
        return _conv_nchw(v, w) + b[None, :, None, None]

    def pool(v):
        n, c, h, w = v.shape
        return jnp.max(v.reshape(n, c, h // 2, 2, w // 2, 2), axis=(3, 5))

    def up2(v):  # nn.Upsample nearest at exact 2x targets
        return jnp.repeat(jnp.repeat(v, 2, axis=2), 2, axis=3)

    # Encoder
    h = pool(relu(conv(x, p["conv1_w"], p["conv1_b"])))
    h = pool(relu(conv(h, p["conv2_w"], p["conv2_b"])))
    h = h.reshape(h.shape[0], -1)
    h = relu(dot(h, p["fc1_w"].T) + p["fc1_b"])
    h = relu(dot(h, p["fc2_w"].T) + p["fc2_b"])
    enc = dot(h, p["fc3_w"].T) + p["fc3_b"]
    # Decoder
    d = relu(dot(enc, p["t_fc1_w"].T) + p["t_fc1_b"])
    d = relu(dot(d, p["t_fc2_w"].T) + p["t_fc2_b"])
    d = dot(d, p["t_fc3_w"].T) + p["t_fc3_b"]
    fc3s = ((input_size - 4) // 2 - 4) // 2
    d = up2(d.reshape(-1, 16, fc3s, fc3s))
    w1 = jnp.flip(p["t_conv1_w"], (2, 3)).transpose(1, 0, 2, 3)
    d = relu(conv(jnp.pad(d, ((0, 0), (0, 0), (4, 4), (4, 4))), w1, p["t_conv1_b"]))
    d = up2(d)
    w2 = jnp.flip(p["t_conv2_w"], (2, 3)).transpose(1, 0, 2, 3)
    recon = conv(jnp.pad(d, ((0, 0), (0, 0), (4, 4), (4, 4))), w2, p["t_conv2_b"])
    logits = dot(recon.reshape(recon.shape[0], -1), p["cls_w"].T) + p["cls_b"]
    return recon, logits


# ------------------------------ main -----------------------------------------

if __name__ == "__main__":
    input_size = 20     # encoder: 20 -> conv 16 -> pool 8 -> conv 4 -> pool 2
    num_labels = 10
    batch = 2

    key = jax.random.PRNGKey(0)
    kx, kparams = jax.random.split(key)
    x = jax.random.normal(kx, (batch, 1, input_size, input_size), jnp.float32)

    params = init_params(kparams, input_size, num_labels)
    kp = prepare_params(params, input_size, num_labels)

    fwd = jax.jit(functools.partial(autoencoder_forward,
                                    input_size=input_size,
                                    num_labels=num_labels))
    recon, logits = fwd(kp, x)
    recon, logits = jax.block_until_ready((recon, logits))

    assert recon.shape == (batch, 1, input_size, input_size), recon.shape
    assert logits.shape == (batch, num_labels), logits.shape
    assert bool(jnp.isfinite(recon).all()) and bool(jnp.isfinite(logits).all())

    # Tolerance check vs. an f32 pure-JAX reference (kernel matmuls are bf16,
    # so expect ~1e-2-level relative differences).
    ref_recon, ref_logits = reference_forward(params, x, input_size=input_size)

    def rel_err(a, b):
        return float(jnp.linalg.norm(a - b) / (jnp.linalg.norm(b) + 1e-6))

    err_r, err_l = rel_err(recon, ref_recon), rel_err(logits, ref_logits)
    assert err_r < 0.1, ("recon rel err", err_r)
    assert err_l < 0.1, ("logits rel err", err_l)
    print("KERNEL_OK")
</pallas_src>

<mosaic_0001>
module attributes {stable_mosaic.version = 11 : i64} {
  func.func @_autoencoder_kernel(%arg0: i32, %arg1: memref<2x512xbf16, #tpu.memory_space<vmem>>, %arg2: memref<512x1536xbf16, #tpu.memory_space<vmem>>, %arg3: memref<1x1536xf32, #tpu.memory_space<vmem>>, %arg4: memref<384x512xbf16, #tpu.memory_space<vmem>>, %arg5: memref<1x512xf32, #tpu.memory_space<vmem>>, %arg6: memref<128x384xbf16, #tpu.memory_space<vmem>>, %arg7: memref<1x384xf32, #tpu.memory_space<vmem>>, %arg8: memref<384x256xbf16, #tpu.memory_space<vmem>>, %arg9: memref<1x256xf32, #tpu.memory_space<vmem>>, %arg10: memref<256x256xbf16, #tpu.memory_space<vmem>>, %arg11: memref<1x256xf32, #tpu.memory_space<vmem>>, %arg12: memref<256x256xbf16, #tpu.memory_space<vmem>>, %arg13: memref<1x256xf32, #tpu.memory_space<vmem>>, %arg14: memref<256x384xbf16, #tpu.memory_space<vmem>>, %arg15: memref<1x384xf32, #tpu.memory_space<vmem>>, %arg16: memref<384x128xbf16, #tpu.memory_space<vmem>>, %arg17: memref<1x128xf32, #tpu.memory_space<vmem>>, %arg18: memref<128x384xbf16, #tpu.memory_space<vmem>>, %arg19: memref<1x384xf32, #tpu.memory_space<vmem>>, %arg20: memref<384x512xbf16, #tpu.memory_space<vmem>>, %arg21: memref<1x512xf32, #tpu.memory_space<vmem>>, %arg22: memref<512x128xf32, #tpu.memory_space<vmem>>, %arg23: memref<1x128xf32, #tpu.memory_space<vmem>>, %arg24: memref<2x512xf32, #tpu.memory_space<vmem>>, %arg25: memref<2x128xf32, #tpu.memory_space<vmem>>) attributes {dimension_semantics = [#tpu.dimension_semantics<arbitrary>], iteration_bounds = array<i64: 1>, scalar_prefetch = 0 : i64, scratch_operands = 0 : i64, tpu.core_type = #tpu.core_type<tc>, window_params = [{pipeline_mode = #tpu.pipeline_mode<synchronous>, transform_indices = @transform_0, window_bounds = array<i64: 2, 512>}, {pipeline_mode = #tpu.pipeline_mode<synchronous>, transform_indices = @transform_1, window_bounds = array<i64: 512, 1536>}, {pipeline_mode = #tpu.pipeline_mode<synchronous>, transform_indices = @transform_2, window_bounds = array<i64: 1, 1536>}, {pipeline_mode = #tpu.pipeline_mode<synchronous>, transform_indices = @transform_3, window_bounds = array<i64: 384, 512>}, {pipeline_mode = #tpu.pipeline_mode<synchronous>, transform_indices = @transform_4, window_bounds = array<i64: 1, 512>}, {pipeline_mode = #tpu.pipeline_mode<synchronous>, transform_indices = @transform_5, window_bounds = array<i64: 128, 384>}, {pipeline_mode = #tpu.pipeline_mode<synchronous>, transform_indices = @transform_6, window_bounds = array<i64: 1, 384>}, {pipeline_mode = #tpu.pipeline_mode<synchronous>, transform_indices = @transform_7, window_bounds = array<i64: 384, 256>}, {pipeline_mode = #tpu.pipeline_mode<synchronous>, transform_indices = @transform_8, window_bounds = array<i64: 1, 256>}, {pipeline_mode = #tpu.pipeline_mode<synchronous>, transform_indices = @transform_9, window_bounds = array<i64: 256, 256>}, {pipeline_mode = #tpu.pipeline_mode<synchronous>, transform_indices = @transform_10, window_bounds = array<i64: 1, 256>}, {pipeline_mode = #tpu.pipeline_mode<synchronous>, transform_indices = @transform_11, window_bounds = array<i64: 256, 256>}, {pipeline_mode = #tpu.pipeline_mode<synchronous>, transform_indices = @transform_12, window_bounds = array<i64: 1, 256>}, {pipeline_mode = #tpu.pipeline_mode<synchronous>, transform_indices = @transform_13, window_bounds = array<i64: 256, 384>}, {pipeline_mode = #tpu.pipeline_mode<synchronous>, transform_indices = @transform_14, window_bounds = array<i64: 1, 384>}, {pipeline_mode = #tpu.pipeline_mode<synchronous>, transform_indices = @transform_15, window_bounds = array<i64: 384, 128>}, {pipeline_mode = #tpu.pipeline_mode<synchronous>, transform_indices = @transform_16, window_bounds = array<i64: 1, 128>}, {pipeline_mode = #tpu.pipeline_mode<synchronous>, transform_indices = @transform_17, window_bounds = array<i64: 128, 384>}, {pipeline_mode = #tpu.pipeline_mode<synchronous>, transform_indices = @transform_18, window_bounds = array<i64: 1, 384>}, {pipeline_mode = #tpu.pipeline_mode<synchronous>, transform_indices = @transform_19, window_bounds = array<i64: 384, 512>}, {pipeline_mode = #tpu.pipeline_mode<synchronous>, transform_indices = @transform_20, window_bounds = array<i64: 1, 512>}, {pipeline_mode = #tpu.pipeline_mode<synchronous>, transform_indices = @transform_21, window_bounds = array<i64: 512, 128>}, {pipeline_mode = #tpu.pipeline_mode<synchronous>, transform_indices = @transform_22, window_bounds = array<i64: 1, 128>}, {pipeline_mode = #tpu.pipeline_mode<synchronous>, transform_indices = @transform_23, window_bounds = array<i64: 2, 512>}, {pipeline_mode = #tpu.pipeline_mode<synchronous>, transform_indices = @transform_24, window_bounds = array<i64: 2, 128>}]} {
    %c0 = arith.constant 0 : index
    %c0_0 = arith.constant 0 : index
    %0 = vector.load %arg1[%c0, %c0_0] : memref<2x512xbf16, #tpu.memory_space<vmem>>, vector<2x512xbf16>
    %c0_1 = arith.constant 0 : index
    %c0_2 = arith.constant 0 : index
    %1 = vector.load %arg2[%c0_1, %c0_2] : memref<512x1536xbf16, #tpu.memory_space<vmem>>, vector<512x1536xbf16>
    %cst = arith.constant dense<0.000000e+00> : vector<2x1536xf32>
    %2 = tpu.matmul %0, %1, %cst {dimension_numbers = #tpu.dot_dimension_numbers<[1], [0], [0], [1], [0, 0, 1, 1], [], []>} : vector<2x512xbf16>, vector<512x1536xbf16>, vector<2x1536xf32> -> vector<2x1536xf32>
    %c0_3 = arith.constant 0 : index
    %c0_4 = arith.constant 0 : index
    %3 = vector.load %arg3[%c0_3, %c0_4] : memref<1x1536xf32, #tpu.memory_space<vmem>>, vector<1x1536xf32>
    %4 = vector.broadcast %3 : vector<1x1536xf32> to vector<2x1536xf32>
    %5 = arith.addf %2, %4 : vector<2x1536xf32>
    %cst_5 = arith.constant 0.000000e+00 : f32
    %6 = vector.broadcast %cst_5 : f32 to vector<2x1536xf32>
    %7 = arith.maximumf %5, %6 : vector<2x1536xf32>
    %8 = vector.extract_strided_slice %7 {offsets = [0, 0], sizes = [2, 384], strides = [1, 1]} : vector<2x1536xf32> to vector<2x384xf32>
    %9 = vector.extract_strided_slice %7 {offsets = [0, 384], sizes = [2, 384], strides = [1, 1]} : vector<2x1536xf32> to vector<2x384xf32>
    %10 = arith.maximumf %8, %9 : vector<2x384xf32>
    %11 = vector.extract_strided_slice %7 {offsets = [0, 768], sizes = [2, 384], strides = [1, 1]} : vector<2x1536xf32> to vector<2x384xf32>
    %12 = vector.extract_strided_slice %7 {offsets = [0, 1152], sizes = [2, 384], strides = [1, 1]} : vector<2x1536xf32> to vector<2x384xf32>
    %13 = arith.maximumf %11, %12 : vector<2x384xf32>
    %14 = arith.maximumf %10, %13 : vector<2x384xf32>
    %15 = arith.truncf %14 : vector<2x384xf32> to vector<2x384xbf16>
    %c0_6 = arith.constant 0 : index
    %c0_7 = arith.constant 0 : index
    %16 = vector.load %arg4[%c0_6, %c0_7] : memref<384x512xbf16, #tpu.memory_space<vmem>>, vector<384x512xbf16>
    %cst_8 = arith.constant dense<0.000000e+00> : vector<2x512xf32>
    %17 = tpu.matmul %15, %16, %cst_8 {dimension_numbers = #tpu.dot_dimension_numbers<[1], [0], [0], [1], [0, 0, 1, 1], [], []>} : vector<2x384xbf16>, vector<384x512xbf16>, vector<2x512xf32> -> vector<2x512xf32>
    %c0_9 = arith.constant 0 : index
    %c0_10 = arith.constant 0 : index
    %18 = vector.load %arg5[%c0_9, %c0_10] : memref<1x512xf32, #tpu.memory_space<vmem>>, vector<1x512xf32>
    %19 = vector.broadcast %18 : vector<1x512xf32> to vector<2x512xf32>
    %20 = arith.addf %17, %19 : vector<2x512xf32>
    %cst_11 = arith.constant 0.000000e+00 : f32
    %21 = vector.broadcast %cst_11 : f32 to vector<2x512xf32>
    %22 = arith.maximumf %20, %21 : vector<2x512xf32>
    %23 = vector.extract_strided_slice %22 {offsets = [0, 0], sizes = [2, 128], strides = [1, 1]} : vector<2x512xf32> to vector<2x128xf32>
    %24 = vector.extract_strided_slice %22 {offsets = [0, 128], sizes = [2, 128], strides = [1, 1]} : vector<2x512xf32> to vector<2x128xf32>
    %25 = arith.maximumf %23, %24 : vector<2x128xf32>
    %26 = vector.extract_strided_slice %22 {offsets = [0, 256], sizes = [2, 128], strides = [1, 1]} : vector<2x512xf32> to vector<2x128xf32>
    %27 = vector.extract_strided_slice %22 {offsets = [0, 384], sizes = [2, 128], strides = [1, 1]} : vector<2x512xf32> to vector<2x128xf32>
    %28 = arith.maximumf %26, %27 : vector<2x128xf32>
    %29 = arith.maximumf %25, %28 : vector<2x128xf32>
    %30 = arith.truncf %29 : vector<2x128xf32> to vector<2x128xbf16>
    %c0_12 = arith.constant 0 : index
    %c0_13 = arith.constant 0 : index
    %31 = vector.load %arg6[%c0_12, %c0_13] : memref<128x384xbf16, #tpu.memory_space<vmem>>, vector<128x384xbf16>
    %cst_14 = arith.constant dense<0.000000e+00> : vector<2x384xf32>
    %32 = tpu.matmul %30, %31, %cst_14 {dimension_numbers = #tpu.dot_dimension_numbers<[1], [0], [0], [1], [0, 0, 1, 1], [], []>} : vector<2x128xbf16>, vector<128x384xbf16>, vector<2x384xf32> -> vector<2x384xf32>
    %c0_15 = arith.constant 0 : index
    %c0_16 = arith.constant 0 : index
    %33 = vector.load %arg7[%c0_15, %c0_16] : memref<1x384xf32, #tpu.memory_space<vmem>>, vector<1x384xf32>
    %34 = vector.broadcast %33 : vector<1x384xf32> to vector<2x384xf32>
    %35 = arith.addf %32, %34 : vector<2x384xf32>
    %cst_17 = arith.constant 0.000000e+00 : f32
    %36 = vector.broadcast %cst_17 : f32 to vector<2x384xf32>
    %37 = arith.maximumf %35, %36 : vector<2x384xf32>
    %38 = arith.truncf %37 : vector<2x384xf32> to vector<2x384xbf16>
    %c0_18 = arith.constant 0 : index
    %c0_19 = arith.constant 0 : index
    %39 = vector.load %arg8[%c0_18, %c0_19] : memref<384x256xbf16, #tpu.memory_space<vmem>>, vector<384x256xbf16>
    %cst_20 = arith.constant dense<0.000000e+00> : vector<2x256xf32>
    %40 = tpu.matmul %38, %39, %cst_20 {dimension_numbers = #tpu.dot_dimension_numbers<[1], [0], [0], [1], [0, 0, 1, 1], [], []>} : vector<2x384xbf16>, vector<384x256xbf16>, vector<2x256xf32> -> vector<2x256xf32>
    %c0_21 = arith.constant 0 : index
    %c0_22 = arith.constant 0 : index
    %41 = vector.load %arg9[%c0_21, %c0_22] : memref<1x256xf32, #tpu.memory_space<vmem>>, vector<1x256xf32>
    %42 = vector.broadcast %41 : vector<1x256xf32> to vector<2x256xf32>
    %43 = arith.addf %40, %42 : vector<2x256xf32>
    %cst_23 = arith.constant 0.000000e+00 : f32
    %44 = vector.broadcast %cst_23 : f32 to vector<2x256xf32>
    %45 = arith.maximumf %43, %44 : vector<2x256xf32>
    %46 = arith.truncf %45 : vector<2x256xf32> to vector<2x256xbf16>
    %c0_24 = arith.constant 0 : index
    %c0_25 = arith.constant 0 : index
    %47 = vector.load %arg10[%c0_24, %c0_25] : memref<256x256xbf16, #tpu.memory_space<vmem>>, vector<256x256xbf16>
    %cst_26 = arith.constant dense<0.000000e+00> : vector<2x256xf32>
    %48 = tpu.matmul %46, %47, %cst_26 {dimension_numbers = #tpu.dot_dimension_numbers<[1], [0], [0], [1], [0, 0, 1, 1], [], []>} : vector<2x256xbf16>, vector<256x256xbf16>, vector<2x256xf32> -> vector<2x256xf32>
    %c0_27 = arith.constant 0 : index
    %c0_28 = arith.constant 0 : index
    %49 = vector.load %arg11[%c0_27, %c0_28] : memref<1x256xf32, #tpu.memory_space<vmem>>, vector<1x256xf32>
    %50 = vector.broadcast %49 : vector<1x256xf32> to vector<2x256xf32>
    %51 = arith.addf %48, %50 : vector<2x256xf32>
    %52 = arith.truncf %51 : vector<2x256xf32> to vector<2x256xbf16>
    %c0_29 = arith.constant 0 : index
    %c0_30 = arith.constant 0 : index
    %53 = vector.load %arg12[%c0_29, %c0_30] : memref<256x256xbf16, #tpu.memory_space<vmem>>, vector<256x256xbf16>
    %cst_31 = arith.constant dense<0.000000e+00> : vector<2x256xf32>
    %54 = tpu.matmul %52, %53, %cst_31 {dimension_numbers = #tpu.dot_dimension_numbers<[1], [0], [0], [1], [0, 0, 1, 1], [], []>} : vector<2x256xbf16>, vector<256x256xbf16>, vector<2x256xf32> -> vector<2x256xf32>
    %c0_32 = arith.constant 0 : index
    %c0_33 = arith.constant 0 : index
    %55 = vector.load %arg13[%c0_32, %c0_33] : memref<1x256xf32, #tpu.memory_space<vmem>>, vector<1x256xf32>
    %56 = vector.broadcast %55 : vector<1x256xf32> to vector<2x256xf32>
    %57 = arith.addf %54, %56 : vector<2x256xf32>
    %cst_34 = arith.constant 0.000000e+00 : f32
    %58 = vector.broadcast %cst_34 : f32 to vector<2x256xf32>
    %59 = arith.maximumf %57, %58 : vector<2x256xf32>
    %60 = arith.truncf %59 : vector<2x256xf32> to vector<2x256xbf16>
    %c0_35 = arith.constant 0 : index
    %c0_36 = arith.constant 0 : index
    %61 = vector.load %arg14[%c0_35, %c0_36] : memref<256x384xbf16, #tpu.memory_space<vmem>>, vector<256x384xbf16>
    %cst_37 = arith.constant dense<0.000000e+00> : vector<2x384xf32>
    %62 = tpu.matmul %60, %61, %cst_37 {dimension_numbers = #tpu.dot_dimension_numbers<[1], [0], [0], [1], [0, 0, 1, 1], [], []>} : vector<2x256xbf16>, vector<256x384xbf16>, vector<2x384xf32> -> vector<2x384xf32>
    %c0_38 = arith.constant 0 : index
    %c0_39 = arith.constant 0 : index
    %63 = vector.load %arg15[%c0_38, %c0_39] : memref<1x384xf32, #tpu.memory_space<vmem>>, vector<1x384xf32>
    %64 = vector.broadcast %63 : vector<1x384xf32> to vector<2x384xf32>
    %65 = arith.addf %62, %64 : vector<2x384xf32>
    %cst_40 = arith.constant 0.000000e+00 : f32
    %66 = vector.broadcast %cst_40 : f32 to vector<2x384xf32>
    %67 = arith.maximumf %65, %66 : vector<2x384xf32>
    %68 = arith.truncf %67 : vector<2x384xf32> to vector<2x384xbf16>
    %c0_41 = arith.constant 0 : index
    %c0_42 = arith.constant 0 : index
    %69 = vector.load %arg16[%c0_41, %c0_42] : memref<384x128xbf16, #tpu.memory_space<vmem>>, vector<384x128xbf16>
    %cst_43 = arith.constant dense<0.000000e+00> : vector<2x128xf32>
    %70 = tpu.matmul %68, %69, %cst_43 {dimension_numbers = #tpu.dot_dimension_numbers<[1], [0], [0], [1], [0, 0, 1, 1], [], []>} : vector<2x384xbf16>, vector<384x128xbf16>, vector<2x128xf32> -> vector<2x128xf32>
    %c0_44 = arith.constant 0 : index
    %c0_45 = arith.constant 0 : index
    %71 = vector.load %arg17[%c0_44, %c0_45] : memref<1x128xf32, #tpu.memory_space<vmem>>, vector<1x128xf32>
    %72 = vector.broadcast %71 : vector<1x128xf32> to vector<2x128xf32>
    %73 = arith.addf %70, %72 : vector<2x128xf32>
    %74 = arith.truncf %73 : vector<2x128xf32> to vector<2x128xbf16>
    %c0_46 = arith.constant 0 : index
    %c0_47 = arith.constant 0 : index
    %75 = vector.load %arg18[%c0_46, %c0_47] : memref<128x384xbf16, #tpu.memory_space<vmem>>, vector<128x384xbf16>
    %cst_48 = arith.constant dense<0.000000e+00> : vector<2x384xf32>
    %76 = tpu.matmul %74, %75, %cst_48 {dimension_numbers = #tpu.dot_dimension_numbers<[1], [0], [0], [1], [0, 0, 1, 1], [], []>} : vector<2x128xbf16>, vector<128x384xbf16>, vector<2x384xf32> -> vector<2x384xf32>
    %c0_49 = arith.constant 0 : index
    %c0_50 = arith.constant 0 : index
    %77 = vector.load %arg19[%c0_49, %c0_50] : memref<1x384xf32, #tpu.memory_space<vmem>>, vector<1x384xf32>
    %78 = vector.broadcast %77 : vector<1x384xf32> to vector<2x384xf32>
    %79 = arith.addf %76, %78 : vector<2x384xf32>
    %cst_51 = arith.constant 0.000000e+00 : f32
    %80 = vector.broadcast %cst_51 : f32 to vector<2x384xf32>
    %81 = arith.maximumf %79, %80 : vector<2x384xf32>
    %82 = arith.truncf %81 : vector<2x384xf32> to vector<2x384xbf16>
    %c0_52 = arith.constant 0 : index
    %c0_53 = arith.constant 0 : index
    %83 = vector.load %arg20[%c0_52, %c0_53] : memref<384x512xbf16, #tpu.memory_space<vmem>>, vector<384x512xbf16>
    %cst_54 = arith.constant dense<0.000000e+00> : vector<2x512xf32>
    %84 = tpu.matmul %82, %83, %cst_54 {dimension_numbers = #tpu.dot_dimension_numbers<[1], [0], [0], [1], [0, 0, 1, 1], [], []>} : vector<2x384xbf16>, vector<384x512xbf16>, vector<2x512xf32> -> vector<2x512xf32>
    %c0_55 = arith.constant 0 : index
    %c0_56 = arith.constant 0 : index
    %85 = vector.load %arg21[%c0_55, %c0_56] : memref<1x512xf32, #tpu.memory_space<vmem>>, vector<1x512xf32>
    %86 = vector.broadcast %85 : vector<1x512xf32> to vector<2x512xf32>
    %87 = arith.addf %84, %86 : vector<2x512xf32>
    %c0_57 = arith.constant 0 : index
    %c0_58 = arith.constant 0 : index
    %88 = vector.load %arg24[%c0_57, %c0_58] : memref<2x512xf32, #tpu.memory_space<vmem>>, vector<2x512xf32>
    tpu.vector_store %arg24[%c0_57, %c0_58], %87 {strides = array<i32>} : memref<2x512xf32, #tpu.memory_space<vmem>>, vector<2x512xf32>,
    %c0_59 = arith.constant 0 : index
    %c0_60 = arith.constant 0 : index
    %89 = vector.load %arg22[%c0_59, %c0_60] : memref<512x128xf32, #tpu.memory_space<vmem>>, vector<512x128xf32>
    %cst_61 = arith.constant dense<0.000000e+00> : vector<2x128xf32>
    %90 = tpu.matmul %87, %89, %cst_61 {dimension_numbers = #tpu.dot_dimension_numbers<[1], [0], [0], [1], [0, 0, 1, 1], [], []>} : vector<2x512xf32>, vector<512x128xf32>, vector<2x128xf32> -> vector<2x128xf32>
    %c0_62 = arith.constant 0 : index
    %c0_63 = arith.constant 0 : index
    %91 = vector.load %arg23[%c0_62, %c0_63] : memref<1x128xf32, #tpu.memory_space<vmem>>, vector<1x128xf32>
    %92 = vector.broadcast %91 : vector<1x128xf32> to vector<2x128xf32>
    %93 = arith.addf %90, %92 : vector<2x128xf32>
    %c0_64 = arith.constant 0 : index
    %c0_65 = arith.constant 0 : index
    %94 = vector.load %arg25[%c0_64, %c0_65] : memref<2x128xf32, #tpu.memory_space<vmem>>, vector<2x128xf32>
    tpu.vector_store %arg25[%c0_64, %c0_65], %93 {strides = array<i32>} : memref<2x128xf32, #tpu.memory_space<vmem>>, vector<2x128xf32>,
    return
  }
  func.func @transform_0(%arg0: i32) -> (i32, i32) {
    %c0_i32 = arith.constant 0 : i32
    %c0_i32_0 = arith.constant 0 : i32
    %c0_i32_1 = arith.constant 0 : i32
    return %c0_i32, %c0_i32_0 : i32, i32
  }
  func.func @transform_1(%arg0: i32) -> (i32, i32) {
    %c0_i32 = arith.constant 0 : i32
    %c0_i32_0 = arith.constant 0 : i32
    %c0_i32_1 = arith.constant 0 : i32
    return %c0_i32, %c0_i32_0 : i32, i32
  }
  func.func @transform_2(%arg0: i32) -> (i32, i32) {
    %c0_i32 = arith.constant 0 : i32
    %c0_i32_0 = arith.constant 0 : i32
    %c0_i32_1 = arith.constant 0 : i32
    return %c0_i32, %c0_i32_0 : i32, i32
  }
  func.func @transform_3(%arg0: i32) -> (i32, i32) {
    %c0_i32 = arith.constant 0 : i32
    %c0_i32_0 = arith.constant 0 : i32
    %c0_i32_1 = arith.constant 0 : i32
    return %c0_i32, %c0_i32_0 : i32, i32
  }
  func.func @transform_4(%arg0: i32) -> (i32, i32) {
    %c0_i32 = arith.constant 0 : i32
    %c0_i32_0 = arith.constant 0 : i32
    %c0_i32_1 = arith.constant 0 : i32
    return %c0_i32, %c0_i32_0 : i32, i32
  }
  func.func @transform_5(%arg0: i32) -> (i32, i32) {
    %c0_i32 = arith.constant 0 : i32
    %c0_i32_0 = arith.constant 0 : i32
    %c0_i32_1 = arith.constant 0 : i32
    return %c0_i32, %c0_i32_0 : i32, i32
  }
  func.func @transform_6(%arg0: i32) -> (i32, i32) {
    %c0_i32 = arith.constant 0 : i32
    %c0_i32_0 = arith.constant 0 : i32
    %c0_i32_1 = arith.constant 0 : i32
    return %c0_i32, %c0_i32_0 : i32, i32
  }
  func.func @transform_7(%arg0: i32) -> (i32, i32) {
    %c0_i32 = arith.constant 0 : i32
    %c0_i32_0 = arith.constant 0 : i32
    %c0_i32_1 = arith.constant 0 : i32
    return %c0_i32, %c0_i32_0 : i32, i32
  }
  func.func @transform_8(%arg0: i32) -> (i32, i32) {
    %c0_i32 = arith.constant 0 : i32
    %c0_i32_0 = arith.constant 0 : i32
    %c0_i32_1 = arith.constant 0 : i32
    return %c0_i32, %c0_i32_0 : i32, i32
  }
  func.func @transform_9(%arg0: i32) -> (i32, i32) {
    %c0_i32 = arith.constant 0 : i32
    %c0_i32_0 = arith.constant 0 : i32
    %c0_i32_1 = arith.constant 0 : i32
    return %c0_i32, %c0_i32_0 : i32, i32
  }
  func.func @transform_10(%arg0: i32) -> (i32, i32) {
    %c0_i32 = arith.constant 0 : i32
    %c0_i32_0 = arith.constant 0 : i32
    %c0_i32_1 = arith.constant 0 : i32
    return %c0_i32, %c0_i32_0 : i32, i32
  }
  func.func @transform_11(%arg0: i32) -> (i32, i32) {
    %c0_i32 = arith.constant 0 : i32
    %c0_i32_0 = arith.constant 0 : i32
    %c0_i32_1 = arith.constant 0 : i32
    return %c0_i32, %c0_i32_0 : i32, i32
  }
  func.func @transform_12(%arg0: i32) -> (i32, i32) {
    %c0_i32 = arith.constant 0 : i32
    %c0_i32_0 = arith.constant 0 : i32
    %c0_i32_1 = arith.constant 0 : i32
    return %c0_i32, %c0_i32_0 : i32, i32
  }
  func.func @transform_13(%arg0: i32) -> (i32, i32) {
    %c0_i32 = arith.constant 0 : i32
    %c0_i32_0 = arith.constant 0 : i32
    %c0_i32_1 = arith.constant 0 : i32
    return %c0_i32, %c0_i32_0 : i32, i32
  }
  func.func @transform_14(%arg0: i32) -> (i32, i32) {
    %c0_i32 = arith.constant 0 : i32
    %c0_i32_0 = arith.constant 0 : i32
    %c0_i32_1 = arith.constant 0 : i32
    return %c0_i32, %c0_i32_0 : i32, i32
  }
  func.func @transform_15(%arg0: i32) -> (i32, i32) {
    %c0_i32 = arith.constant 0 : i32
    %c0_i32_0 = arith.constant 0 : i32
    %c0_i32_1 = arith.constant 0 : i32
    return %c0_i32, %c0_i32_0 : i32, i32
  }
  func.func @transform_16(%arg0: i32) -> (i32, i32) {
    %c0_i32 = arith.constant 0 : i32
    %c0_i32_0 = arith.constant 0 : i32
    %c0_i32_1 = arith.constant 0 : i32
    return %c0_i32, %c0_i32_0 : i32, i32
  }
  func.func @transform_17(%arg0: i32) -> (i32, i32) {
    %c0_i32 = arith.constant 0 : i32
    %c0_i32_0 = arith.constant 0 : i32
    %c0_i32_1 = arith.constant 0 : i32
    return %c0_i32, %c0_i32_0 : i32, i32
  }
  func.func @transform_18(%arg0: i32) -> (i32, i32) {
    %c0_i32 = arith.constant 0 : i32
    %c0_i32_0 = arith.constant 0 : i32
    %c0_i32_1 = arith.constant 0 : i32
    return %c0_i32, %c0_i32_0 : i32, i32
  }
  func.func @transform_19(%arg0: i32) -> (i32, i32) {
    %c0_i32 = arith.constant 0 : i32
    %c0_i32_0 = arith.constant 0 : i32
    %c0_i32_1 = arith.constant 0 : i32
    return %c0_i32, %c0_i32_0 : i32, i32
  }
  func.func @transform_20(%arg0: i32) -> (i32, i32) {
    %c0_i32 = arith.constant 0 : i32
    %c0_i32_0 = arith.constant 0 : i32
    %c0_i32_1 = arith.constant 0 : i32
    return %c0_i32, %c0_i32_0 : i32, i32
  }
  func.func @transform_21(%arg0: i32) -> (i32, i32) {
    %c0_i32 = arith.constant 0 : i32
    %c0_i32_0 = arith.constant 0 : i32
    %c0_i32_1 = arith.constant 0 : i32
    return %c0_i32, %c0_i32_0 : i32, i32
  }
  func.func @transform_22(%arg0: i32) -> (i32, i32) {
    %c0_i32 = arith.constant 0 : i32
    %c0_i32_0 = arith.constant 0 : i32
    %c0_i32_1 = arith.constant 0 : i32
    return %c0_i32, %c0_i32_0 : i32, i32
  }
  func.func @transform_23(%arg0: i32) -> (i32, i32) {
    %c0_i32 = arith.constant 0 : i32
    %c0_i32_0 = arith.constant 0 : i32
    %c0_i32_1 = arith.constant 0 : i32
    return %c0_i32, %c0_i32_0 : i32, i32
  }
  func.func @transform_24(%arg0: i32) -> (i32, i32) {
    %c0_i32 = arith.constant 0 : i32
    %c0_i32_0 = arith.constant 0 : i32
    %c0_i32_1 = arith.constant 0 : i32
    return %c0_i32, %c0_i32_0 : i32, i32
  }
}

</mosaic_0001>

<bundles_post_ra>
// kernel: autoencoder_forward.1
= control target key start
LH: loop header
LB: loop body
LE: loop exit
PB: predicated region body
PF: predicated region fallthrough
CT: control target
= control target key end

     0   :  { %s10722_s0 = inlined_call_operand.vmem [shape: bf16[2,512], index: 0, kind: input, shape index: {}]   ;;  %s10723_s1 = inlined_call_operand.hbm [shape: bf16[512,1536], index: 1, kind: input, shape index: {}]   ;;  %s10724_s2 = inlined_call_operand.hbm [shape: f32[1,1536], index: 2, kind: input, shape index: {}]   ;;  %s10725_s3 = inlined_call_operand.hbm [shape: bf16[384,512], index: 3, kind: input, shape index: {}]   ;;  %s10726_s4 = inlined_call_operand.hbm [shape: f32[1,512], index: 4, kind: input, shape index: {}]   ;;  %s10727_s5 = inlined_call_operand.hbm [shape: bf16[128,384], index: 5, kind: input, shape index: {}]   ;;  %s10728_s6 = inlined_call_operand.hbm [shape: f32[1,384], index: 6, kind: input, shape index: {}]   ;;  %s10729_s7 = inlined_call_operand.hbm [shape: bf16[384,256], index: 7, kind: input, shape index: {}]   ;;  %s10730_s8 = inlined_call_operand.hbm [shape: f32[1,256], index: 8, kind: input, shape index: {}]   ;;  %s10731_s9 = inlined_call_operand.hbm [shape: bf16[256,256], index: 9, kind: input, shape index: {}]   ;;  %s10732_s10 = inlined_call_operand.hbm [shape: f32[1,256], index: 10, kind: input, shape index: {}]   ;;  %s10733_s11 = inlined_call_operand.hbm [shape: bf16[256,256], index: 11, kind: input, shape index: {}]   ;;  %s10734_s12 = inlined_call_operand.hbm [shape: f32[1,256], index: 12, kind: input, shape index: {}]   ;;  %s10735_s13 = inlined_call_operand.hbm [shape: bf16[256,384], index: 13, kind: input, shape index: {}]   ;;  %s10736_s14 = inlined_call_operand.hbm [shape: f32[1,384], index: 14, kind: input, shape index: {}]   ;;  %s10737_s15 = inlined_call_operand.hbm [shape: bf16[384,128], index: 15, kind: input, shape index: {}]   ;;  %s10738_s16 = inlined_call_operand.hbm [shape: f32[1,128], index: 16, kind: input, shape index: {}]   ;;  %s10739_s17 = inlined_call_operand.hbm [shape: bf16[128,384], index: 17, kind: input, shape index: {}]   ;;  %s10740_s18 = inlined_call_operand.hbm [shape: f32[1,384], index: 18, kind: input, shape index: {}]   ;;  %s10741_s19 = inlined_call_operand.hbm [shape: bf16[384,512], index: 19, kind: input, shape index: {}]   ;;  %s10742_s20 = inlined_call_operand.hbm [shape: f32[1,512], index: 20, kind: input, shape index: {}]   ;;  %s10743_s21 = inlined_call_operand.hbm [shape: f32[512,128], index: 21, kind: input, shape index: {}]   ;;  %s10744_s22 = inlined_call_operand.hbm [shape: f32[1,128], index: 22, kind: input, shape index: {}]   ;;  %s10745_s23 = inlined_call_operand.vmem [shape: f32[2,512], index: 23, kind: output, shape index: {0}]   ;;  %s10746_s24 = inlined_call_operand.hbm [shape: f32[2,128], index: 24, kind: output, shape index: {1}]  }
   0x1   :  { %10756 = sst [smem:[#allocation51_spill]] %s10722_s0 }
   0x2   :  { %10757 = sst [smem:[#allocation52_spill]] %s10723_s1 }
   0x3   :  { %10758 = sst [smem:[#allocation53_spill]] %s10724_s2 }
   0x4   :  { %10759 = sst [smem:[#allocation54_spill]] %s10725_s3 }
   0x5   :  { %10760 = sst [smem:[#allocation55_spill]] %s10726_s4 }
   0x6   :  { %10761 = sst [smem:[#allocation56_spill]] %s10727_s5 }
   0x7   :  { %10762 = sst [smem:[#allocation57_spill]] %s10728_s6 }
   0x8   :  { %10763 = sst [smem:[#allocation58_spill]] %s10729_s7 }
   0x9   :  { %10764 = sst [smem:[#allocation59_spill]] %s10730_s8 }
   0xa   :  { %10765 = sst [smem:[#allocation60_spill]] %s10746_s24 }
   0xb   :  { %30 = vsyncpa [#allocation3], 0 }
   0xc   :  { %31 = vsyncpa [#allocation6], 0 }
   0xd   :  { %32 = vsyncpa [#allocation9], 0 }
   0xe   :  { %33 = vsyncpa [#allocation12], 0 }
   0xf   :  { %34 = vsyncpa [#allocation15], 0 }
  0x10   :  { %35 = vsyncpa [#allocation18], 0 }
  0x11   :  { %36 = vsyncpa [#allocation21], 0 }
  0x12   :  { %37 = vsyncpa [#allocation24], 0 }
  0x13   :  { %38 = vsyncpa [#allocation27], 0 }
  0x14   :  { %39 = vsyncpa [#allocation30], 0 }
  0x15   :  { %40 = vsyncpa [#allocation33], 0 }
  0x16   :  { %41 = vsyncpa [#allocation36], 0 }
  0x17   :  { %42 = vsyncpa [#allocation4], 0  ;;  %s10076_s5 = smov [#allocation5]   ;;  %s10077_s27 = smov [#allocation8]  }
  0x18   :  { %s63_s26 = sshll.u32 %s10076_s5, 4  ;;  %s85_s28 = sshll.u32 %s10077_s27, 4  ;;  %s64_s26 = int_to_ptr.vmem [resolvable:$true] %s63_s26  ;;  %s86_s28 = int_to_ptr.vmem [resolvable:$true] %s85_s28 }
  0x19   :  { %s10766_s29 = sld [smem:[#allocation53_spill]] }
  0x1f   :  { %s9544_s0 = scalar_lea.hbm %s10766_s29, 192 }
  0x20   :  { %p9545_p0 = scmp.ne.s32.totalorder %s10766_s29, %s9544_s0  ;;  %p9548_p1 = scmp.lt.u32.totalorder %s9544_s0, %s10766_s29 }
  0x22   :  { %p9550_p2 = pnand %p9548_p1, %p9545_p0 }
  0x24   :  { %9553 = shalt.err (!%p9550_p2)
}
  0x25   :  { %s9554_s8 = scalar_lea.vmem %s64_s26, 192  ;;  %p9559_p4 = scmp.lt.s32.totalorder %s64_s26, %s64_s26 }
  0x26   :  { %p9555_p3 = scmp.ne.s32.totalorder %s64_s26, %s9554_s8  ;;  %p9560_p5 = scmp.lt.s32.totalorder %s9554_s8, %s9554_s8 }
  0x28   :  { %p9561_p6 = por %p9560_p5, %p9559_p4 }
  0x2a   :  { %p9562_p7 = pnand %p9561_p6, %p9555_p3 }
  0x2c   :  { %9565 = shalt.err (!%p9562_p7)
}
  0x2d   :  { %66 = dma.hbm_to_vmem [thread:$0]  %s10766_s29, 192, %s64_s26, [#allocation6]  }
  0x2e   :  { %s10767_s6 = sld [smem:[#allocation55_spill]] }
  0x34   :  { %s9566_s2 = scalar_lea.hbm %s10767_s6, 64 }
  0x35   :  { %p9567_p8 = scmp.ne.s32.totalorder %s10767_s6, %s9566_s2  ;;  %p9570_p9 = scmp.lt.u32.totalorder %s9566_s2, %s10767_s6 }
  0x37   :  { %p9572_p10 = pnand %p9570_p9, %p9567_p8 }
  0x39   :  { %9575 = shalt.err (!%p9572_p10)
}
  0x3a   :  { %s9576_s25 = scalar_lea.vmem %s86_s28, 64  ;;  %p9581_p12 = scmp.lt.s32.totalorder %s86_s28, %s86_s28 }
  0x3b   :  { %p9577_p11 = scmp.ne.s32.totalorder %s86_s28, %s9576_s25  ;;  %p9582_p13 = scmp.lt.s32.totalorder %s9576_s25, %s9576_s25 }
  0x3d   :  { %p9583_p0 = por %p9582_p13, %p9581_p12 }
  0x3f   :  { %p9584_p1 = pnand %p9583_p0, %p9577_p11 }
  0x41   :  { %9587 = shalt.err (!%p9584_p1)
}
  0x42   :  { %88 = dma.hbm_to_vmem [thread:$0]  %s10767_s6, 64, %s86_s28, [#allocation9]  }
  0x43   :  { %s10078_s8 = smov [#allocation11]   ;;  %s10079_s1 = smov [#allocation14]  }
  0x44   :  { %s107_s4 = sshll.u32 %s10078_s8, 4  ;;  %s129_s5 = sshll.u32 %s10079_s1, 4  ;;  %s108_s4 = int_to_ptr.vmem [resolvable:$true] %s107_s4  ;;  %s130_s5 = int_to_ptr.vmem [resolvable:$true] %s129_s5 }
  0x45   :  { %s10768_s7 = sld [smem:[#allocation57_spill]] }
  0x4b   :  { %s9588_s30 = scalar_lea.hbm %s10768_s7, 48 }
  0x4c   :  { %p9589_p2 = scmp.ne.s32.totalorder %s10768_s7, %s9588_s30  ;;  %p9592_p3 = scmp.lt.u32.totalorder %s9588_s30, %s10768_s7 }
  0x4e   :  { %p9594_p4 = pnand %p9592_p3, %p9589_p2 }
  0x50   :  { %9597 = shalt.err (!%p9594_p4)
}
  0x51   :  { %s9598_s28 = scalar_lea.vmem %s108_s4, 48  ;;  %s9602_s6 = scalar_lea.vmem %s108_s4, 64 }
  0x52   :  { %p9599_p5 = scmp.ne.s32.totalorder %s108_s4, %s9598_s28  ;;  %p9603_p6 = scmp.lt.s32.totalorder %s108_s4, %s108_s4 }
  0x53   :  { %p9604_p7 = scmp.lt.s32.totalorder %s9602_s6, %s9598_s28 }
  0x55   :  { %p9605_p8 = por %p9604_p7, %p9603_p6 }
  0x57   :  { %p9606_p9 = pnand %p9605_p8, %p9599_p5 }
  0x59   :  { %9609 = shalt.err (!%p9606_p9)
}
  0x5a   :  { %110 = dma.hbm_to_vmem [thread:$0]  %s10768_s7, 48, %s108_s4, [#allocation12]  }
  0x5b   :  { %s10769_s27 = sld [smem:[#allocation59_spill]] }
  0x61   :  { %s9610_s2 = scalar_lea.hbm %s10769_s27, 32 }
  0x62   :  { %p9611_p10 = scmp.ne.s32.totalorder %s10769_s27, %s9610_s2  ;;  %p9614_p11 = scmp.lt.u32.totalorder %s9610_s2, %s10769_s27 }
  0x64   :  { %p9616_p12 = pnand %p9614_p11, %p9611_p10 }
  0x66   :  { %9619 = shalt.err (!%p9616_p12)
}
  0x67   :  { %s9620_s25 = scalar_lea.vmem %s130_s5, 32  ;;  %p9625_p0 = scmp.lt.s32.totalorder %s130_s5, %s130_s5 }
  0x68   :  { %p9621_p13 = scmp.ne.s32.totalorder %s130_s5, %s9620_s25  ;;  %p9626_p1 = scmp.lt.s32.totalorder %s9620_s25, %s9620_s25 }
  0x6a   :  { %p9627_p2 = por %p9626_p1, %p9625_p0 }
  0x6c   :  { %p9628_p3 = pnand %p9627_p2, %p9621_p13 }
  0x6e   :  { %9631 = shalt.err (!%p9628_p3)
}
  0x6f   :  { %132 = dma.hbm_to_vmem [thread:$0]  %s10769_s27, 32, %s130_s5, [#allocation15]  }
  0x70   :  { %s10080_s28 = smov [#allocation17]   ;;  %s10081_s26 = smov [#allocation20]  }
  0x71   :  { %s151_s6 = sshll.u32 %s10080_s28, 4  ;;  %s173_s29 = sshll.u32 %s10081_s26, 4  ;;  %s152_s6 = int_to_ptr.vmem [resolvable:$true] %s151_s6  ;;  %s174_s29 = int_to_ptr.vmem [resolvable:$true] %s173_s29 }
  0x72   :  { %s9632_s2 = scalar_lea.hbm %s10732_s10, 32 }
  0x73   :  { %p9633_p4 = scmp.ne.s32.totalorder %s10732_s10, %s9632_s2  ;;  %p9636_p5 = scmp.lt.u32.totalorder %s9632_s2, %s10732_s10 }
  0x75   :  { %p9638_p6 = pnand %p9636_p5, %p9633_p4 }
  0x77   :  { %9641 = shalt.err (!%p9638_p6)
}
  0x78   :  { %s9642_s5 = scalar_lea.vmem %s152_s6, 32  ;;  %p9647_p8 = scmp.lt.s32.totalorder %s152_s6, %s152_s6 }
  0x79   :  { %p9643_p7 = scmp.ne.s32.totalorder %s152_s6, %s9642_s5  ;;  %p9648_p9 = scmp.lt.s32.totalorder %s9642_s5, %s9642_s5 }
  0x7b   :  { %p9649_p10 = por %p9648_p9, %p9647_p8 }
  0x7d   :  { %p9650_p11 = pnand %p9649_p10, %p9643_p7 }
  0x7f   :  { %9653 = shalt.err (!%p9650_p11)
}
  0x80   :  { %154 = dma.hbm_to_vmem [thread:$0]  %s10732_s10, 32, %s152_s6, [#allocation18]  }
  0x81   :  { %s9654_s28 = scalar_lea.hbm %s10734_s12, 32 }
  0x82   :  { %p9655_p12 = scmp.ne.s32.totalorder %s10734_s12, %s9654_s28  ;;  %p9658_p13 = scmp.lt.u32.totalorder %s9654_s28, %s10734_s12 }
  0x84   :  { %p9660_p0 = pnand %p9658_p13, %p9655_p12 }
  0x86   :  { %9663 = shalt.err (!%p9660_p0)
}
  0x87   :  { %s9664_s24 = scalar_lea.vmem %s174_s29, 32  ;;  %p9669_p2 = scmp.lt.s32.totalorder %s174_s29, %s174_s29 }
  0x88   :  { %p9665_p1 = scmp.ne.s32.totalorder %s174_s29, %s9664_s24  ;;  %p9670_p3 = scmp.lt.s32.totalorder %s9664_s24, %s9664_s24 }
  0x8a   :  { %p9671_p4 = por %p9670_p3, %p9669_p2 }
  0x8c   :  { %p9672_p5 = pnand %p9671_p4, %p9665_p1 }
  0x8e   :  { %9675 = shalt.err (!%p9672_p5)
}
  0x8f   :  { %176 = dma.hbm_to_vmem [thread:$0]  %s10734_s12, 32, %s174_s29, [#allocation21]  }
  0x90   :  { %s10082_s30 = smov [#allocation23]   ;;  %s10083_s3 = smov [#allocation26]  }
  0x91   :  { %s195_s0 = sshll.u32 %s10082_s30, 4  ;;  %s217_s5 = sshll.u32 %s10083_s3, 4  ;;  %s196_s0 = int_to_ptr.vmem [resolvable:$true] %s195_s0  ;;  %s218_s5 = int_to_ptr.vmem [resolvable:$true] %s217_s5 }
  0x92   :  { %s9676_s4 = scalar_lea.hbm %s10736_s14, 48 }
  0x93   :  { %p9677_p6 = scmp.ne.s32.totalorder %s10736_s14, %s9676_s4  ;;  %p9680_p7 = scmp.lt.u32.totalorder %s9676_s4, %s10736_s14 }
  0x95   :  { %p9682_p8 = pnand %p9680_p7, %p9677_p6 }
  0x97   :  { %9685 = shalt.err (!%p9682_p8)
}
  0x98   :  { %s9686_s12 = scalar_lea.vmem %s196_s0, 48  ;;  %s9690_s29 = scalar_lea.vmem %s196_s0, 64 }
  0x99   :  { %p9687_p9 = scmp.ne.s32.totalorder %s196_s0, %s9686_s12  ;;  %p9691_p10 = scmp.lt.s32.totalorder %s196_s0, %s196_s0 }
  0x9a   :  { %p9692_p11 = scmp.lt.s32.totalorder %s9690_s29, %s9686_s12 }
  0x9c   :  { %p9693_p12 = por %p9692_p11, %p9691_p10 }
  0x9e   :  { %p9694_p13 = pnand %p9693_p12, %p9687_p9 }
  0xa0   :  { %9697 = shalt.err (!%p9694_p13)
}
  0xa1   :  { %198 = dma.hbm_to_vmem [thread:$0]  %s10736_s14, 48, %s196_s0, [#allocation24]  }
  0xa2   :  { %s9698_s6 = scalar_lea.hbm %s10738_s16, 16 }
  0xa3   :  { %p9699_p0 = scmp.ne.s32.totalorder %s10738_s16, %s9698_s6  ;;  %p9702_p1 = scmp.lt.u32.totalorder %s9698_s6, %s10738_s16 }
  0xa5   :  { %p9704_p2 = pnand %p9702_p1, %p9699_p0 }
  0xa7   :  { %9707 = shalt.err (!%p9704_p2)
}
  0xa8   :  { %s9708_s4 = scalar_lea.vmem %s218_s5, 16  ;;  %s9712_s7 = scalar_lea.vmem %s218_s5, 32 }
  0xa9   :  { %p9709_p3 = scmp.ne.s32.totalorder %s218_s5, %s9708_s4  ;;  %p9713_p4 = scmp.lt.s32.totalorder %s218_s5, %s218_s5 }
  0xaa   :  { %p9714_p5 = scmp.lt.s32.totalorder %s9712_s7, %s9708_s4 }
  0xac   :  { %p9715_p6 = por %p9714_p5, %p9713_p4 }
  0xae   :  { %p9716_p7 = pnand %p9715_p6, %p9709_p3 }
  0xb0   :  { %9719 = shalt.err (!%p9716_p7)
}
  0xb1   :  { %220 = dma.hbm_to_vmem [thread:$0]  %s10738_s16, 16, %s218_s5, [#allocation27]  }
  0xb2   :  { %s10084_s28 = smov [#allocation29]   ;;  %s10085_s8 = smov [#allocation32]  }
  0xb3   :  { %s239_s26 = sshll.u32 %s10084_s28, 4  ;;  %s261_s12 = sshll.u32 %s10085_s8, 4  ;;  %s240_s26 = int_to_ptr.vmem [resolvable:$true] %s239_s26  ;;  %s262_s12 = int_to_ptr.vmem [resolvable:$true] %s261_s12 }
  0xb4   :  { %s9720_s2 = scalar_lea.hbm %s10740_s18, 48 }
  0xb5   :  { %p9721_p8 = scmp.ne.s32.totalorder %s10740_s18, %s9720_s2  ;;  %p9724_p9 = scmp.lt.u32.totalorder %s9720_s2, %s10740_s18 }
  0xb7   :  { %p9726_p10 = pnand %p9724_p9, %p9721_p8 }
  0xb9   :  { %9729 = shalt.err (!%p9726_p10)
}
  0xba   :  { %s9730_s16 = scalar_lea.vmem %s240_s26, 48  ;;  %s9734_s5 = scalar_lea.vmem %s240_s26, 64 }
  0xbb   :  { %p9731_p11 = scmp.ne.s32.totalorder %s240_s26, %s9730_s16  ;;  %p9735_p12 = scmp.lt.s32.totalorder %s240_s26, %s240_s26 }
  0xbc   :  { %p9736_p13 = scmp.lt.s32.totalorder %s9734_s5, %s9730_s16 }
  0xbe   :  { %p9737_p0 = por %p9736_p13, %p9735_p12 }
  0xc0   :  { %p9738_p1 = pnand %p9737_p0, %p9731_p11 }
  0xc2   :  { %9741 = shalt.err (!%p9738_p1)
}
  0xc3   :  { %242 = dma.hbm_to_vmem [thread:$0]  %s10740_s18, 48, %s240_s26, [#allocation30]  }
  0xc4   :  { %s9742_s7 = scalar_lea.hbm %s10742_s20, 64 }
  0xc5   :  { %p9743_p2 = scmp.ne.s32.totalorder %s10742_s20, %s9742_s7  ;;  %p9746_p3 = scmp.lt.u32.totalorder %s9742_s7, %s10742_s20 }
  0xc7   :  { %p9748_p4 = pnand %p9746_p3, %p9743_p2 }
  0xc9   :  { %9751 = shalt.err (!%p9748_p4)
}
  0xca   :  { %s9752_s29 = scalar_lea.vmem %s262_s12, 64  ;;  %p9757_p6 = scmp.lt.s32.totalorder %s262_s12, %s262_s12 }
  0xcb   :  { %p9753_p5 = scmp.ne.s32.totalorder %s262_s12, %s9752_s29  ;;  %p9758_p7 = scmp.lt.s32.totalorder %s9752_s29, %s9752_s29 }
  0xcd   :  { %p9759_p8 = por %p9758_p7, %p9757_p6 }
  0xcf   :  { %p9760_p9 = pnand %p9759_p8, %p9753_p5 }
  0xd1   :  { %9763 = shalt.err (!%p9760_p9)
}
  0xd2   :  { %264 = dma.hbm_to_vmem [thread:$0]  %s10742_s20, 64, %s262_s12, [#allocation33]  }
  0xd3   :  { %s10086_s1 = smov [#allocation2]   ;;  %s10770_s6 = sld [smem:[#allocation52_spill]] }
  0xd4   :  { %s50_s2 = sshll.u32 %s10086_s1, 4  ;;  %s51_s2 = int_to_ptr.vmem [resolvable:$true] %s50_s2 }
  0xd9   :  { %s9764_s30 = scalar_lea.hbm %s10770_s6, 49152 }
  0xda   :  { %p9765_p10 = scmp.ne.s32.totalorder %s10770_s6, %s9764_s30  ;;  %p9768_p11 = scmp.lt.u32.totalorder %s9764_s30, %s10770_s6 }
  0xdc   :  { %p9770_p12 = pnand %p9768_p11, %p9765_p10 }
  0xde   :  { %9773 = shalt.err (!%p9770_p12)
}
  0xdf   :  { %s9774_s25 = scalar_lea.vmem %s51_s2, 49152  ;;  %p9779_p0 = scmp.lt.s32.totalorder %s51_s2, %s51_s2 }
  0xe0   :  { %p9775_p13 = scmp.ne.s32.totalorder %s51_s2, %s9774_s25  ;;  %p9780_p1 = scmp.lt.s32.totalorder %s9774_s25, %s9774_s25 }
  0xe2   :  { %p9781_p2 = por %p9780_p1, %p9779_p0 }
  0xe4   :  { %p9782_p3 = pnand %p9781_p2, %p9775_p13 }
  0xe6   :  { %9785 = shalt.err (!%p9782_p3)
}
  0xe7   :  { %s10087_s20 = smov 768   ;;  %s10088_s12 = smov 48  }
  0xe8   :  { %56 = dma.hbm_to_vmem [thread:$0]  %s10770_s6, 49152, %s51_s2, [#allocation3], %s10087_s20, %s10087_s20, %s10088_s12  }
  0xe9   :  { %s10089_s14 = smov [#allocation7]   ;;  %s10771_s29 = sld [smem:[#allocation54_spill]] }
  0xea   :  { %s72_s0 = sshll.u32 %s10089_s14, 4  ;;  %s73_s0 = int_to_ptr.vmem [resolvable:$true] %s72_s0 }
  0xef   :  { %s9786_s18 = scalar_lea.hbm %s10771_s29, 12288 }
  0xf0   :  { %p9787_p4 = scmp.ne.s32.totalorder %s10771_s29, %s9786_s18  ;;  %p9790_p5 = scmp.lt.u32.totalorder %s9786_s18, %s10771_s29 }
  0xf2   :  { %p9792_p6 = pnand %p9790_p5, %p9787_p4 }
  0xf4   :  { %9795 = shalt.err (!%p9792_p6)
}
  0xf5   :  { %s9796_s30 = scalar_lea.vmem %s73_s0, 12288  ;;  %p9801_p8 = scmp.lt.s32.totalorder %s73_s0, %s73_s0 }
  0xf6   :  { %p9797_p7 = scmp.ne.s32.totalorder %s73_s0, %s9796_s30  ;;  %p9802_p9 = scmp.lt.s32.totalorder %s9796_s30, %s9796_s30 }
  0xf8   :  { %p9803_p10 = por %p9802_p9, %p9801_p8 }
  0xfa   :  { %p9804_p11 = pnand %p9803_p10, %p9797_p7 }
  0xfc   :  { %9807 = shalt.err (!%p9804_p11)
}
  0xfd   :  { %s10090_s2 = smov 256   ;;  %s10091_s6 = smov 16  }
  0xfe   :  { %78 = dma.hbm_to_vmem [thread:$0]  %s10771_s29, 12288, %s73_s0, [#allocation6], %s10090_s2, %s10090_s2, %s10091_s6  }
  0xff   :  { %s10092_s3 = smov [#allocation10]   ;;  %s10772_s12 = sld [smem:[#allocation56_spill]] }
 0x100   :  { %s94_s27 = sshll.u32 %s10092_s3, 4  ;;  %s95_s27 = int_to_ptr.vmem [resolvable:$true] %s94_s27 }
 0x105   :  { %s9808_s4 = scalar_lea.hbm %s10772_s12, 3072 }
 0x106   :  { %p9809_p12 = scmp.ne.s32.totalorder %s10772_s12, %s9808_s4  ;;  %p9812_p13 = scmp.lt.u32.totalorder %s9808_s4, %s10772_s12 }
 0x108   :  { %p9814_p0 = pnand %p9812_p13, %p9809_p12 }
 0x10a   :  { %9817 = shalt.err (!%p9814_p0)
}
 0x10b   :  { %s9818_s18 = scalar_lea.vmem %s95_s27, 3072  ;;  %p9823_p2 = scmp.lt.s32.totalorder %s95_s27, %s95_s27 }
 0x10c   :  { %p9819_p1 = scmp.ne.s32.totalorder %s95_s27, %s9818_s18  ;;  %p9824_p3 = scmp.lt.s32.totalorder %s9818_s18, %s9818_s18 }
 0x10e   :  { %p9825_p4 = por %p9824_p3, %p9823_p2 }
 0x110   :  { %p9826_p5 = pnand %p9825_p4, %p9819_p1 }
 0x112   :  { %9829 = shalt.err (!%p9826_p5)
}
 0x113   :  { %s10093_s0 = smov 192   ;;  %s10094_s29 = smov 12  }
 0x114   :  { %100 = dma.hbm_to_vmem [thread:$0]  %s10772_s12, 3072, %s95_s27, [#allocation9], %s10093_s0, %s10093_s0, %s10094_s29  }
 0x115   :  { %s10095_s24 = smov [#allocation13]   ;;  %s10773_s5 = sld [smem:[#allocation58_spill]] }
 0x116   :  { %s116_s10 = sshll.u32 %s10095_s24, 4  ;;  %s117_s10 = int_to_ptr.vmem [resolvable:$true] %s116_s10 }
 0x11b   :  { %s9830_s3 = scalar_lea.hbm %s10773_s5, 6144 }
 0x11c   :  { %p9831_p6 = scmp.ne.s32.totalorder %s10773_s5, %s9830_s3  ;;  %p9834_p7 = scmp.lt.u32.totalorder %s9830_s3, %s10773_s5 }
 0x11e   :  { %p9836_p8 = pnand %p9834_p7, %p9831_p6 }
 0x120   :  { %9839 = shalt.err (!%p9836_p8)
}
 0x121   :  { %s9840_s14 = scalar_lea.vmem %s117_s10, 6144  ;;  %p9845_p10 = scmp.lt.s32.totalorder %s117_s10, %s117_s10 }
 0x122   :  { %p9841_p9 = scmp.ne.s32.totalorder %s117_s10, %s9840_s14  ;;  %p9846_p11 = scmp.lt.s32.totalorder %s9840_s14, %s9840_s14 }
 0x124   :  { %p9847_p12 = por %p9846_p11, %p9845_p10 }
 0x126   :  { %p9848_p13 = pnand %p9847_p12, %p9841_p9 }
 0x128   :  { %9851 = shalt.err (!%p9848_p13)
}
 0x129   :  { %s10096_s27 = smov 128   ;;  %s10097_s12 = smov 8  }
 0x12a   :  { %122 = dma.hbm_to_vmem [thread:$0]  %s10773_s5, 6144, %s117_s10, [#allocation12], %s10096_s27, %s10096_s27, %s10097_s12  }
 0x12b   :  { %s10098_s18 = smov [#allocation16]   ;;  %s10099_s1 = smov [#allocation19]  }
 0x12c   :  { %s138_s26 = sshll.u32 %s10098_s18, 4  ;;  %s160_s24 = sshll.u32 %s10099_s1, 4  ;;  %s139_s26 = int_to_ptr.vmem [resolvable:$true] %s138_s26  ;;  %s10416_s24 = int_to_ptr.vmem [resolvable:$true] %s160_s24 }
 0x12d   :  { %s9852_s3 = scalar_lea.hbm %s10731_s9, 4096 }
 0x12e   :  { %p9853_p0 = scmp.ne.s32.totalorder %s10731_s9, %s9852_s3  ;;  %p9856_p1 = scmp.lt.u32.totalorder %s9852_s3, %s10731_s9 }
 0x130   :  { %p9858_p2 = pnand %p9856_p1, %p9853_p0 }
 0x132   :  { %9861 = shalt.err (!%p9858_p2)
}
 0x133   :  { %s9862_s10 = scalar_lea.vmem %s139_s26, 4096  ;;  %p9867_p4 = scmp.lt.s32.totalorder %s139_s26, %s139_s26 }
 0x134   :  { %p9863_p3 = scmp.ne.s32.totalorder %s139_s26, %s9862_s10  ;;  %p9868_p5 = scmp.lt.s32.totalorder %s9862_s10, %s9862_s10 }
 0x136   :  { %p9869_p6 = por %p9868_p5, %p9867_p4 }
 0x138   :  { %p9870_p7 = pnand %p9869_p6, %p9863_p3 }
 0x13a   :  { %9873 = shalt.err (!%p9870_p7)
}
 0x13b   :  { %144 = dma.hbm_to_vmem [thread:$0]  %s10731_s9, 4096, %s139_s26, [#allocation15], %s10096_s27, %s10096_s27, %s10097_s12  }
 0x13c   :  { %s9874_s18 = scalar_lea.hbm %s10733_s11, 4096 }
 0x13d   :  { %p9875_p8 = scmp.ne.s32.totalorder %s10733_s11, %s9874_s18  ;;  %p9878_p9 = scmp.lt.u32.totalorder %s9874_s18, %s10733_s11 }
 0x13f   :  { %p9880_p10 = pnand %p9878_p9, %p9875_p8 }
 0x141   :  { %9883 = shalt.err (!%p9880_p10)
}
 0x142   :  { %s9884_s25 = scalar_lea.vmem %s10416_s24, 4096  ;;  %p9889_p12 = scmp.lt.s32.totalorder %s10416_s24, %s10416_s24 }
 0x143   :  { %p9885_p11 = scmp.ne.s32.totalorder %s10416_s24, %s9884_s25  ;;  %p9890_p13 = scmp.lt.s32.totalorder %s9884_s25, %s9884_s25 }
 0x145   :  { %p9891_p0 = por %p9890_p13, %p9889_p12 }
 0x147   :  { %p9892_p1 = pnand %p9891_p0, %p9885_p11 }
 0x149   :  { %9895 = shalt.err (!%p9892_p1)
}
 0x14a   :  { %166 = dma.hbm_to_vmem [thread:$0]  %s10733_s11, 4096, %s10416_s24, [#allocation18], %s10096_s27, %s10096_s27, %s10097_s12  }
 0x14b   :  { %s10100_s20 = smov [#allocation22]   ;;  %s10101_s7 = smov [#allocation25]  }
 0x14c   :  { %s182_s4 = sshll.u32 %s10100_s20, 4  ;;  %s204_s10 = sshll.u32 %s10101_s7, 4  ;;  %s183_s4 = int_to_ptr.vmem [resolvable:$true] %s182_s4  ;;  %s10453_s10 = int_to_ptr.vmem [resolvable:$true] %s204_s10 }
 0x14d   :  { %s9896_s28 = scalar_lea.hbm %s10735_s13, 6144 }
 0x14e   :  { %p9897_p2 = scmp.ne.s32.totalorder %s10735_s13, %s9896_s28  ;;  %p9900_p3 = scmp.lt.u32.totalorder %s9896_s28, %s10735_s13 }
 0x150   :  { %p9902_p4 = pnand %p9900_p3, %p9897_p2 }
 0x152   :  { %9905 = shalt.err (!%p9902_p4)
}
 0x153   :  { %s9906_s11 = scalar_lea.vmem %s183_s4, 6144  ;;  %p9911_p6 = scmp.lt.s32.totalorder %s183_s4, %s183_s4 }
 0x154   :  { %p9907_p5 = scmp.ne.s32.totalorder %s183_s4, %s9906_s11  ;;  %p9912_p7 = scmp.lt.s32.totalorder %s9906_s11, %s9906_s11 }
 0x156   :  { %p9913_p8 = por %p9912_p7, %p9911_p6 }
 0x158   :  { %p9914_p9 = pnand %p9913_p8, %p9907_p5 }
 0x15a   :  { %9917 = shalt.err (!%p9914_p9)
}
 0x15b   :  { %188 = dma.hbm_to_vmem [thread:$0]  %s10735_s13, 6144, %s183_s4, [#allocation21], %s10093_s0, %s10093_s0, %s10094_s29  }
 0x15c   :  { %s9918_s9 = scalar_lea.hbm %s10737_s15, 3072 }
 0x15d   :  { %p9919_p10 = scmp.ne.s32.totalorder %s10737_s15, %s9918_s9  ;;  %p9922_p11 = scmp.lt.u32.totalorder %s9918_s9, %s10737_s15 }
 0x15f   :  { %p9924_p12 = pnand %p9922_p11, %p9919_p10 }
 0x161   :  { %9927 = shalt.err (!%p9924_p12)
}
 0x162   :  { %s9928_s14 = scalar_lea.vmem %s10453_s10, 3072  ;;  %p9933_p0 = scmp.lt.s32.totalorder %s10453_s10, %s10453_s10 }
 0x163   :  { %p9929_p13 = scmp.ne.s32.totalorder %s10453_s10, %s9928_s14  ;;  %p9934_p1 = scmp.lt.s32.totalorder %s9928_s14, %s9928_s14 }
 0x165   :  { %p9935_p2 = por %p9934_p1, %p9933_p0 }
 0x167   :  { %p9936_p3 = pnand %p9935_p2, %p9929_p13 }
 0x169   :  { %9939 = shalt.err (!%p9936_p3)
}
 0x16a   :  { %s10102_s13 = smov 64   ;;  %s10103_s4 = smov 4  }
 0x16b   :  { %210 = dma.hbm_to_vmem [thread:$0]  %s10737_s15, 3072, %s10453_s10, [#allocation24], %s10102_s13, %s10102_s13, %s10103_s4  }
 0x16c   :  { %s10104_s18 = smov [#allocation28]   ;;  %s10105_s30 = smov [#allocation31]  }
 0x16d   :  { %s226_s1 = sshll.u32 %s10104_s18, 4  ;;  %s248_s11 = sshll.u32 %s10105_s30, 4  ;;  %s227_s1 = int_to_ptr.vmem [resolvable:$true] %s226_s1  ;;  %s10487_s11 = int_to_ptr.vmem [resolvable:$true] %s248_s11 }
 0x16e   :  { %s9940_s3 = scalar_lea.hbm %s10739_s17, 3072 }
 0x16f   :  { %p9941_p4 = scmp.ne.s32.totalorder %s10739_s17, %s9940_s3  ;;  %p9944_p5 = scmp.lt.u32.totalorder %s9940_s3, %s10739_s17 }
 0x171   :  { %p9946_p6 = pnand %p9944_p5, %p9941_p4 }
 0x173   :  { %9949 = shalt.err (!%p9946_p6)
}
 0x174   :  { %s9950_s15 = scalar_lea.vmem %s227_s1, 3072  ;;  %p9955_p8 = scmp.lt.s32.totalorder %s227_s1, %s227_s1 }
 0x175   :  { %p9951_p7 = scmp.ne.s32.totalorder %s227_s1, %s9950_s15  ;;  %p9956_p9 = scmp.lt.s32.totalorder %s9950_s15, %s9950_s15 }
 0x177   :  { %p9957_p10 = por %p9956_p9, %p9955_p8 }
 0x179   :  { %p9958_p11 = pnand %p9957_p10, %p9951_p7 }
 0x17b   :  { %9961 = shalt.err (!%p9958_p11)
}
 0x17c   :  { %232 = dma.hbm_to_vmem [thread:$0]  %s10739_s17, 3072, %s227_s1, [#allocation27], %s10093_s0, %s10093_s0, %s10094_s29  }
 0x17d   :  { %s9962_s13 = scalar_lea.hbm %s10741_s19, 12288 }
 0x17e   :  { %p9963_p12 = scmp.ne.s32.totalorder %s10741_s19, %s9962_s13  ;;  %p9966_p13 = scmp.lt.u32.totalorder %s9962_s13, %s10741_s19 }
 0x180   :  { %p9968_p0 = pnand %p9966_p13, %p9963_p12 }
 0x182   :  { %9971 = shalt.err (!%p9968_p0)
}
 0x183   :  { %s9972_s30 = scalar_lea.vmem %s10487_s11, 12288  ;;  %p9977_p2 = scmp.lt.s32.totalorder %s10487_s11, %s10487_s11 }
 0x184   :  { %p9973_p1 = scmp.ne.s32.totalorder %s10487_s11, %s9972_s30  ;;  %p9978_p3 = scmp.lt.s32.totalorder %s9972_s30, %s9972_s30 }
 0x186   :  { %p9979_p4 = por %p9978_p3, %p9977_p2 }
 0x188   :  { %p9980_p5 = pnand %p9979_p4, %p9973_p1 }
 0x18a   :  { %9983 = shalt.err (!%p9980_p5)
}
 0x18b   :  { %254 = dma.hbm_to_vmem [thread:$0]  %s10741_s19, 12288, %s10487_s11, [#allocation30], %s10090_s2, %s10090_s2, %s10091_s6  }
 0x18c   :  { %s10106_s29 = smov [#allocation34]   ;;  %s10107_s24 = smov [#allocation35]  }
 0x18d   :  { %s270_s1 = sshll.u32 %s10106_s29, 4  ;;  %s283_s16 = sshll.u32 %s10107_s24, 4  ;;  %s271_s1 = int_to_ptr.vmem [resolvable:$true] %s270_s1  ;;  %s284_s16 = int_to_ptr.vmem [resolvable:$true] %s283_s16 }
 0x18e   :  { %s9984_s9 = scalar_lea.hbm %s10743_s21, 8192 }
 0x18f   :  { %p9985_p6 = scmp.ne.s32.totalorder %s10743_s21, %s9984_s9  ;;  %p9988_p7 = scmp.lt.u32.totalorder %s9984_s9, %s10743_s21 }
 0x191   :  { %p9990_p8 = pnand %p9988_p7, %p9985_p6 }
 0x193   :  { %9993 = shalt.err (!%p9990_p8)
}
 0x194   :  { %s9994_s19 = scalar_lea.vmem %s271_s1, 8192  ;;  %p9999_p10 = scmp.lt.s32.totalorder %s271_s1, %s271_s1 }
 0x195   :  { %p9995_p9 = scmp.ne.s32.totalorder %s271_s1, %s9994_s19  ;;  %p10000_p11 = scmp.lt.s32.totalorder %s9994_s19, %s9994_s19 }
 0x197   :  { %p10001_p12 = por %p10000_p11, %p9999_p10 }
 0x199   :  { %p10002_p13 = pnand %p10001_p12, %p9995_p9 }
 0x19b   :  { %10005 = shalt.err (!%p10002_p13)
}
 0x19c   :  { %276 = dma.hbm_to_vmem [thread:$0]  %s10743_s21, 8192, %s271_s1, [#allocation33], %s10096_s27, %s10096_s27, %s10097_s12  }
 0x19d   :  { %s10006_s5 = scalar_lea.hbm %s10744_s22, 16 }
 0x19e   :  { %p10007_p0 = scmp.ne.s32.totalorder %s10744_s22, %s10006_s5  ;;  %p10010_p1 = scmp.lt.u32.totalorder %s10006_s5, %s10744_s22 }
 0x1a0   :  { %p10012_p2 = pnand %p10010_p1, %p10007_p0 }
 0x1a2   :  { %10015 = shalt.err (!%p10012_p2)
}
 0x1a3   :  { %s10016_s8 = scalar_lea.vmem %s284_s16, 16  ;;  %s10020_s18 = scalar_lea.vmem %s284_s16, 32 }
 0x1a4   :  { %p10017_p3 = scmp.ne.s32.totalorder %s284_s16, %s10016_s8  ;;  %p10021_p4 = scmp.lt.s32.totalorder %s284_s16, %s284_s16 }
 0x1a5   :  { %p10022_p5 = scmp.lt.s32.totalorder %s10020_s18, %s10016_s8 }
 0x1a7   :  { %p10023_p6 = por %p10022_p5, %p10021_p4 }
 0x1a9   :  { %p10024_p7 = pnand %p10023_p6, %p10017_p3 }
 0x1ab   :  { %10027 = shalt.err (!%p10024_p7)
}
 0x1ac   :  { %286 = dma.hbm_to_vmem [thread:$0]  %s10744_s22, 16, %s284_s16, [#allocation36]  }
 0x1ad   :  { %10050 = dma.done.wait [#allocation3], 49152  }
 0x1ae   :  { %10051 = vsyncadd [#allocation3], 4294918144 }
 0x1af   :  { %10052 = dma.done.wait [#allocation6], 12480  }
 0x1b0   :  { %10053 = vsyncadd [#allocation6], 4294954816 }
 0x1b1   :  { %10054 = dma.done.wait [#allocation9], 3136  }
 0x1b2   :  { %10055 = vsyncadd [#allocation9], 4294964160 }
 0x1b3   :  { %10056 = dma.done.wait [#allocation12], 6192  }
 0x1b4   :  { %10057 = vsyncadd [#allocation12], 4294961104 }
 0x1b5   :  { %10058 = dma.done.wait [#allocation15], 4128  }
 0x1b6   :  { %10059 = vsyncadd [#allocation15], 4294963168 }
 0x1b7   :  { %10060 = dma.done.wait [#allocation18], 4128  }
 0x1b8   :  { %10061 = vsyncadd [#allocation18], 4294963168 }
 0x1b9   :  { %10062 = dma.done.wait [#allocation21], 6176  }
 0x1ba   :  { %10063 = vsyncadd [#allocation21], 4294961120 }
 0x1bb   :  { %10064 = dma.done.wait [#allocation24], 3120  }
 0x1bc   :  { %10065 = vsyncadd [#allocation24], 4294964176 }
 0x1bd   :  { %10066 = dma.done.wait [#allocation27], 3088  }
 0x1be   :  { %10067 = vsyncadd [#allocation27], 4294964208 }
 0x1bf   :  { %10068 = dma.done.wait [#allocation30], 12336  }
 0x1c0   :  { %10069 = vsyncadd [#allocation30], 4294954960 }
 0x1c1   :  { %10070 = dma.done.wait [#allocation33], 8256  }
 0x1c2   :  { %10071 = vsyncadd [#allocation33], 4294959040 }
 0x1c3   :  { %10072 = dma.done.wait [#allocation36], 16  }
 0x1c4   :  { %10073 = vsyncadd [#allocation36], 4294967280  ;;  %v8359_v0 = vld [vmem:[#allocation2 + $0x4] ss:$48 sps:$4 sm:$0xff]   ;;  %v8361_v1 = vld [vmem:[#allocation2 + $0xc] ss:$48 sps:$4 sm:$0xff]   ;;  %v743_v38 = vlaneseq }
 0x1c5   :  { %2752 = vmatprep.subr.bf16.mxu0 %v8359_v0  ;;  %v8363_v2 = vld [vmem:[#allocation2] ss:$48 sps:$4 sm:$0xff]   ;;  %v8364_v3 = vld [vmem:[#allocation2 + $0x8] ss:$48 sps:$4 sm:$0xff]   ;;  %2834 = vmatprep.subr.bf16.mxu1 %v8361_v1  ;;  %v8365_v4 = vld [vmem:[#allocation2 + $0x64] ss:$48 sps:$4 sm:$0xff]  }
 0x1c6   :  { %2753 = vmatpush1.bf16.msra.mxu0 %v8363_v2  ;;  %2835 = vmatpush1.bf16.msra.mxu1 %v8364_v3  ;;  %v8367_v5 = vld [vmem:[#allocation2 + $0x6c] ss:$48 sps:$4 sm:$0xff]   ;;  %v8369_v6 = vld [vmem:[#allocation2 + $0x60] ss:$48 sps:$4 sm:$0xff]   ;;  %v8370_v7 = vld [vmem:[#allocation2 + $0x68] ss:$48 sps:$4 sm:$0xff]  }
 0x1c7   :  { %2754 = vmatprep.subr.bf16.mxu0 %v8365_v4  ;;  %2836 = vmatprep.subr.bf16.mxu1 %v8367_v5  ;;  %v8371_v8 = vld [vmem:[#allocation2 + $0xc4] ss:$48 sps:$4 sm:$0xff]   ;;  %v8373_v9 = vld [vmem:[#allocation2 + $0xcc] ss:$48 sps:$4 sm:$0xff]   ;;  %v8375_v10 = vld [vmem:[#allocation2 + $0xc0] ss:$48 sps:$4 sm:$0xff]  }
 0x1c8   :  { %v8376_v11 = vld [vmem:[#allocation2 + $0xc8] ss:$48 sps:$4 sm:$0xff]   ;;  %v8377_v12 = vld [vmem:[#allocation2 + $0x124] ss:$48 sps:$4 sm:$0xff]   ;;  %v8379_v13 = vld [vmem:[#allocation2 + $0x12c] ss:$48 sps:$4 sm:$0xff]  }
 0x1c9   :  { %v8381_v14 = vld [vmem:[#allocation2 + $0x120] ss:$48 sps:$4 sm:$0xff]   ;;  %v8382_v15 = vld [vmem:[#allocation2 + $0x128] ss:$48 sps:$4 sm:$0xff]   ;;  %v8383_v16 = vld [vmem:[#allocation2 + $0x184] ss:$48 sps:$4 sm:$0xff]  }
 0x1ca   :  { %2755 = vmatpush1.bf16.msra.mxu0 %v8369_v6  ;;  %2837 = vmatpush1.bf16.msra.mxu1 %v8370_v7  ;;  %v8385_v17 = vld [vmem:[#allocation2 + $0x18c] ss:$48 sps:$4 sm:$0xff]   ;;  %v8387_v18 = vld [vmem:[#allocation2 + $0x180] ss:$48 sps:$4 sm:$0xff]   ;;  %v8388_v19 = vld [vmem:[#allocation2 + $0x188] ss:$48 sps:$4 sm:$0xff]  }
 0x1cb   :  { %2756 = vmatprep.subr.bf16.mxu0 %v8371_v8  ;;  %2838 = vmatprep.subr.bf16.mxu1 %v8373_v9  ;;  %v8389_v20 = vld [vmem:[#allocation2 + $0x1e4] ss:$48 sps:$4 sm:$0xff]   ;;  %v8391_v21 = vld [vmem:[#allocation2 + $0x1ec] ss:$48 sps:$4 sm:$0xff]   ;;  %v8393_v22 = vld [vmem:[#allocation2 + $0x1e0] ss:$48 sps:$4 sm:$0xff]  }
 0x1cc   :  { %v8394_v23 = vld [vmem:[#allocation2 + $0x1e8] ss:$48 sps:$4 sm:$0xff]   ;;  %v8395_v24 = vld [vmem:[#allocation2 + $0x244] ss:$48 sps:$4 sm:$0xff]   ;;  %v8397_v25 = vld [vmem:[#allocation2 + $0x24c] ss:$48 sps:$4 sm:$0xff]  }
 0x1cd   :  { %v8399_v26 = vld [vmem:[#allocation2 + $0x240] ss:$48 sps:$4 sm:$0xff]   ;;  %v8400_v27 = vld [vmem:[#allocation2 + $0x248] ss:$48 sps:$4 sm:$0xff]   ;;  %v8401_v28 = vld [vmem:[#allocation2 + $0x2a4] ss:$48 sps:$4 sm:$0xff]  }
 0x1ce   :  { %2757 = vmatpush1.bf16.msra.mxu0 %v8375_v10  ;;  %2839 = vmatpush1.bf16.msra.mxu1 %v8376_v11  ;;  %v8403_v29 = vld [vmem:[#allocation2 + $0x2ac] ss:$48 sps:$4 sm:$0xff]   ;;  %v8405_v30 = vld [vmem:[#allocation2 + $0x2a0] ss:$48 sps:$4 sm:$0xff]   ;;  %v8406_v31 = vld [vmem:[#allocation2 + $0x2a8] ss:$48 sps:$4 sm:$0xff]  }
 0x1cf   :  { %2758 = vmatprep.subr.bf16.mxu0 %v8377_v12  ;;  %2840 = vmatprep.subr.bf16.mxu1 %v8379_v13  ;;  %v8407_v32 = vld [vmem:[#allocation2 + $0x304] ss:$48 sps:$4 sm:$0xff]   ;;  %v8409_v33 = vld [vmem:[#allocation2 + $0x30c] ss:$48 sps:$4 sm:$0xff]   ;;  %v8411_v34 = vld [vmem:[#allocation2 + $0x300] ss:$48 sps:$4 sm:$0xff]  }
 0x1d0   :  { %v8412_v35 = vld [vmem:[#allocation2 + $0x308] ss:$48 sps:$4 sm:$0xff]   ;;  %v8413_v36 = vld [vmem:[#allocation2 + $0x364] ss:$48 sps:$4 sm:$0xff]   ;;  %v8415_v37 = vld [vmem:[#allocation2 + $0x36c] ss:$48 sps:$4 sm:$0xff]  }
 0x1d1   :  { %v10108_v39 = vmov 1966171168   ;;  %v8417_v41 = vld [vmem:[#allocation2 + $0x360] ss:$48 sps:$4 sm:$0xff]   ;;  %v8418_v42 = vld [vmem:[#allocation2 + $0x368] ss:$48 sps:$4 sm:$0xff]  }
 0x1d2   :  { %2759 = vmatpush1.bf16.msra.mxu0 %v8381_v14  ;;  %2841 = vmatpush1.bf16.msra.mxu1 %v8382_v15  ;;  %v813_v40 = vunpack.c.l.s4 %v10108_v39  ;;  %v8419_v43 = vld [vmem:[#allocation2 + $0x3c4] ss:$48 sps:$4 sm:$0xff]   ;;  %v8421_v44 = vld [vmem:[#allocation2 + $0x3cc] ss:$48 sps:$4 sm:$0xff]   ;;  %v10551_v45 = vshrl.u32 %v743_v38, 7  ;;  %s10774_s30 = sld [smem:[#allocation51_spill]] }
 0x1d3   :  { %2760 = vmatprep.subr.bf16.mxu0 %v8383_v16  ;;  %2842 = vmatprep.subr.bf16.mxu1 %v8385_v17  ;;  %v8423_v47 = vld [vmem:[#allocation2 + $0x3c0] ss:$48 sps:$4 sm:$0xff]   ;;  %v8424_v48 = vld [vmem:[#allocation2 + $0x3c8] ss:$48 sps:$4 sm:$0xff]   ;;  %v8425_v49 = vld [vmem:[#allocation2 + $0x424] ss:$48 sps:$4 sm:$0xff]  }
 0x1d4   :  { %v814_v46 = vunpack.c.0.s8 %v813_v40  ;;  %v8427_v50 = vld [vmem:[#allocation2 + $0x42c] ss:$48 sps:$4 sm:$0xff]   ;;  %v8429_v53 = vld [vmem:[#allocation2 + $0x420] ss:$48 sps:$4 sm:$0xff]   ;;  %v8430_v54 = vld [vmem:[#allocation2 + $0x428] ss:$48 sps:$4 sm:$0xff]  }
 0x1d5   :  { %v8431_v56 = vld [vmem:[#allocation2 + $0x484] ss:$48 sps:$4 sm:$0xff]   ;;  %v8433_v57 = vld [vmem:[#allocation2 + $0x48c] ss:$48 sps:$4 sm:$0xff]   ;;  %v8435_v59 = vld [vmem:[#allocation2 + $0x480] ss:$48 sps:$4 sm:$0xff]  }
 0x1d6   :  { %2761 = vmatpush1.bf16.msra.mxu0 %v8387_v18  ;;  %2843 = vmatpush1.bf16.msra.mxu1 %v8388_v19  ;;  %v817_v51 = vsub.s32 %v814_v46, %v10551_v45  ;;  %v8436_v60 = vld [vmem:[#allocation2 + $0x488] ss:$48 sps:$4 sm:$0xff]   ;;  %v8437_v61 = vld [vmem:[#allocation2 + $0x4e4] ss:$48 sps:$4 sm:$0xff]   ;;  %v8439_v62 = vld [vmem:[#allocation2 + $0x4ec] ss:$48 sps:$4 sm:$0xff]  }
 0x1d7   :  { %2762 = vmatprep.subr.bf16.mxu0 %v8389_v20  ;;  %2844 = vmatprep.subr.bf16.mxu1 %v8391_v21  ;;  %v8441_v63 = vld [vmem:[#allocation2 + $0x4e0] ss:$48 sps:$4 sm:$0xff]   ;;  %v8442_v0 = vld [vmem:[#allocation2 + $0x4e8] ss:$48 sps:$4 sm:$0xff]   ;;  %v8443_v1 = vld [vmem:[#allocation2 + $0x544] ss:$48 sps:$4 sm:$0xff]  }
 0x1d8   :  { %v7179_v52 = vld.sshfl [vmem:[%s10774_s30] sm:$0x33 pattern:$0x75316420]  ;;  %v8445_v2 = vld [vmem:[#allocation2 + $0x54c] ss:$48 sps:$4 sm:$0xff]  }
 0x1d9   :  { %v811_v55 = vcombine.high %v7179_v52, %v7179_v52  ;;  %v8447_v3 = vld [vmem:[#allocation2 + $0x540] ss:$48 sps:$4 sm:$0xff]   ;;  %v8448_v4 = vld [vmem:[#allocation2 + $0x548] ss:$48 sps:$4 sm:$0xff]   ;;  %v8449_v5 = vld [vmem:[#allocation2 + $0x5a4] ss:$48 sps:$4 sm:$0xff]   ;;  %v10561_v12 = vrot.slane %v7179_v52, %v817_v51 }
 0x1da   :  { %2763 = vmatpush1.bf16.msra.mxu0 %v8393_v22  ;;  %2845 = vmatpush1.bf16.msra.mxu1 %v8394_v23  ;;  %v8451_v6 = vld [vmem:[#allocation2 + $0x5ac] ss:$48 sps:$4 sm:$0xff]   ;;  %v8453_v7 = vld [vmem:[#allocation2 + $0x5a0] ss:$48 sps:$4 sm:$0xff]   ;;  %v8454_v8 = vld [vmem:[#allocation2 + $0x5a8] ss:$48 sps:$4 sm:$0xff]  }
 0x1db   :  { %2764 = vmatprep.subr.bf16.mxu0 %v8395_v24  ;;  %2846 = vmatprep.subr.bf16.mxu1 %v8397_v25  ;;  %v10557_v58 = vrot.slane %v811_v55, %v817_v51  ;;  %v8457_v9 = vld [vmem:[#allocation2 + $0x604] ss:$48 sps:$4 sm:$0xff]   ;;  %v8460_v10 = vld [vmem:[#allocation2 + $0x60c] ss:$48 sps:$4 sm:$0xff]   ;;  %v8455_v11 = vld [vmem:[#allocation2 + $0x600] ss:$48 sps:$4 sm:$0xff]  }
 0x1dc   :  { %v8458_v13 = vld [vmem:[#allocation2 + $0x608] ss:$48 sps:$4 sm:$0xff]   ;;  %v8463_v14 = vld [vmem:[#allocation2 + $0x664] ss:$48 sps:$4 sm:$0xff]   ;;  %v8466_v15 = vld [vmem:[#allocation2 + $0x66c] ss:$48 sps:$4 sm:$0xff]  }
 0x1dd   :  { %2784 = vmatprep.mubr.bf16.mxu0 %v10557_v58  ;;  %2866 = vmatprep.mubr.bf16.mxu1 %v10557_v58  ;;  %v10565_v16 = vcombine.high %v10557_v58, %v10557_v58  ;;  %v8461_v17 = vld [vmem:[#allocation2 + $0x660] ss:$48 sps:$4 sm:$0xff]   ;;  %v8464_v18 = vld [vmem:[#allocation2 + $0x668] ss:$48 sps:$4 sm:$0xff]   ;;  %v8469_v19 = vld [vmem:[#allocation2 + $0x6c4] ss:$48 sps:$4 sm:$0xff]  }
 0x1de   :  { %2765 = vmatpush1.bf16.msra.mxu0 %v8399_v26  ;;  %2847 = vmatpush1.bf16.msra.mxu1 %v8400_v27  ;;  %v8472_v20 = vld [vmem:[#allocation2 + $0x6cc] ss:$48 sps:$4 sm:$0xff]   ;;  %v8467_v21 = vld [vmem:[#allocation2 + $0x6c0] ss:$48 sps:$4 sm:$0xff]   ;;  %v8470_v22 = vld [vmem:[#allocation2 + $0x6c8] ss:$48 sps:$4 sm:$0xff]  }
 0x1df   :  { %2766 = vmatprep.subr.bf16.mxu0 %v8401_v28  ;;  %2848 = vmatprep.subr.bf16.mxu1 %v8403_v29  ;;  %v8475_v23 = vld [vmem:[#allocation2 + $0x724] ss:$48 sps:$4 sm:$0xff]   ;;  %v8478_v24 = vld [vmem:[#allocation2 + $0x72c] ss:$48 sps:$4 sm:$0xff]   ;;  %v8473_v25 = vld [vmem:[#allocation2 + $0x720] ss:$48 sps:$4 sm:$0xff]  }
 0x1e0   :  { %v8476_v26 = vld [vmem:[#allocation2 + $0x728] ss:$48 sps:$4 sm:$0xff]   ;;  %v8481_v27 = vld [vmem:[#allocation2 + $0x784] ss:$48 sps:$4 sm:$0xff]   ;;  %v8484_v28 = vld [vmem:[#allocation2 + $0x78c] ss:$48 sps:$4 sm:$0xff]  }
 0x1e1   :  { %v8479_v29 = vld [vmem:[#allocation2 + $0x780] ss:$48 sps:$4 sm:$0xff]   ;;  %v8494_v38 = vld [vmem:[#allocation2 + $0x848] ss:$48 sps:$4 sm:$0xff]   ;;  %v8499_v39 = vld [vmem:[#allocation2 + $0x8a4] ss:$48 sps:$4 sm:$0xff]  }
 0x1e2   :  { %2767 = vmatpush1.bf16.msra.mxu0 %v8405_v30  ;;  %2849 = vmatpush1.bf16.msra.mxu1 %v8406_v31  ;;  %v8482_v30 = vld [vmem:[#allocation2 + $0x788] ss:$48 sps:$4 sm:$0xff]   ;;  %v8487_v31 = vld [vmem:[#allocation2 + $0x7e4] ss:$48 sps:$4 sm:$0xff]   ;;  %v8502_v40 = vld [vmem:[#allocation2 + $0x8ac] ss:$48 sps:$4 sm:$0xff]  }
 0x1e3   :  { %2768 = vmatprep.subr.bf16.mxu0 %v8407_v32  ;;  %2850 = vmatprep.subr.bf16.mxu1 %v8409_v33  ;;  %v8490_v32 = vld [vmem:[#allocation2 + $0x7ec] ss:$48 sps:$4 sm:$0xff]   ;;  %v8485_v33 = vld [vmem:[#allocation2 + $0x7e0] ss:$48 sps:$4 sm:$0xff]   ;;  %v8512_v51 = vld [vmem:[#allocation2 + $0x968] ss:$48 sps:$4 sm:$0xff]  }
 0x1e4   :  { %v8503_v46 = vld [vmem:[#allocation2 + $0x900] ss:$48 sps:$4 sm:$0xff]   ;;  %v8517_v52 = vld [vmem:[#allocation2 + $0x9c4] ss:$48 sps:$4 sm:$0xff]   ;;  %v8518_v55 = vld [vmem:[#allocation2 + $0x9c8] ss:$48 sps:$4 sm:$0xff]  }
 0x1e5   :  { %vm10111_vm0 = vmmov 0   ;;  %s10113_s29 = smov [#allocation37]  }
 0x1e6   :  { %2769 = vmatpush1.bf16.msra.mxu0 %v8411_v34  ;;  %2851 = vmatpush1.bf16.msra.mxu1 %v8412_v35  ;;  %v8488_v34 = vld [vmem:[#allocation2 + $0x7e8] ss:$48 sps:$4 sm:$0xff]   ;;  %v8493_v35 = vld [vmem:[#allocation2 + $0x844] ss:$48 sps:$4 sm:$0xff]   ;;  %s7157_s1 = sshll.u32 %s10113_s29, 4  ;;  %s7158_s1 = int_to_ptr.vmem [resolvable:$true] %s7157_s1 }
 0x1e7   :  { %2770 = vmatprep.subr.bf16.mxu0 %v8413_v36  ;;  %2852 = vmatprep.subr.bf16.mxu1 %v8415_v37  ;;  %v8496_v36 = vld [vmem:[#allocation2 + $0x84c] ss:$48 sps:$4 sm:$0xff]   ;;  %v8491_v37 = vld [vmem:[#allocation2 + $0x840] ss:$48 sps:$4 sm:$0xff]   ;;  %s10028_s24 = scalar_lea.vmem %s7158_s1, 32  ;;  %p10033_p9 = scmp.lt.s32.totalorder %s7158_s1, %s7158_s1 }
 0x1e8   :  { %p10029_p8 = scmp.ne.s32.totalorder %s7158_s1, %s10028_s24  ;;  %p10034_p10 = scmp.lt.s32.totalorder %s10028_s24, %s10028_s24 }
 0x1ea   :  { %2771 = vmatpush1.bf16.msra.mxu0 %v8417_v41  ;;  %2853 = vmatpush1.bf16.msra.mxu1 %v8418_v42  ;;  %v8497_v41 = vld [vmem:[#allocation2 + $0x8a0] ss:$48 sps:$4 sm:$0xff]   ;;  %v8500_v42 = vld [vmem:[#allocation2 + $0x8a8] ss:$48 sps:$4 sm:$0xff]   ;;  %p10035_p11 = por %p10034_p10, %p10033_p9 }
 0x1eb   :  { %2772 = vmatprep.subr.bf16.mxu0 %v8419_v43  ;;  %2854 = vmatprep.subr.bf16.mxu1 %v8421_v44  ;;  %v8505_v43 = vld [vmem:[#allocation2 + $0x904] ss:$48 sps:$4 sm:$0xff]   ;;  %v8508_v44 = vld [vmem:[#allocation2 + $0x90c] ss:$48 sps:$4 sm:$0xff]  }
 0x1ec   :  { %p10036_p12 = pnand %p10035_p11, %p10029_p8 }
 0x1ee   :  { %2773 = vmatpush1.bf16.msra.mxu0 %v8423_v47  ;;  %2855 = vmatpush1.bf16.msra.mxu1 %v8424_v48  ;;  %v8506_v47 = vld [vmem:[#allocation2 + $0x908] ss:$48 sps:$4 sm:$0xff]   ;;  %v8511_v48 = vld [vmem:[#allocation2 + $0x964] ss:$48 sps:$4 sm:$0xff]  }
 0x1ef   :  { %2774 = vmatprep.subr.bf16.mxu0 %v8425_v49  ;;  %2856 = vmatprep.subr.bf16.mxu1 %v8427_v50  ;;  %v8514_v49 = vld [vmem:[#allocation2 + $0x96c] ss:$48 sps:$4 sm:$0xff]   ;;  %v8509_v50 = vld [vmem:[#allocation2 + $0x960] ss:$48 sps:$4 sm:$0xff]  }
 0x1f2   :  { %2775 = vmatpush1.bf16.msra.mxu0 %v8429_v53  ;;  %2857 = vmatpush1.bf16.msra.mxu1 %v8430_v54  ;;  %v8520_v53 = vld [vmem:[#allocation2 + $0x9cc] ss:$48 sps:$4 sm:$0xff]   ;;  %v8515_v54 = vld [vmem:[#allocation2 + $0x9c0] ss:$48 sps:$4 sm:$0xff]  }
 0x1f3   :  { %2776 = vmatprep.subr.bf16.mxu0 %v8431_v56  ;;  %2858 = vmatprep.subr.bf16.mxu1 %v8433_v57  ;;  %v8523_v56 = vld [vmem:[#allocation2 + $0xa24] ss:$48 sps:$4 sm:$0xff]   ;;  %v8526_v57 = vld [vmem:[#allocation2 + $0xa2c] ss:$48 sps:$4 sm:$0xff]  }
 0x1f6   :  { %2777 = vmatpush1.bf16.msra.mxu0 %v8435_v59  ;;  %2859 = vmatpush1.bf16.msra.mxu1 %v8436_v60  ;;  %v8521_v59 = vld [vmem:[#allocation2 + $0xa20] ss:$48 sps:$4 sm:$0xff]   ;;  %v8524_v60 = vld [vmem:[#allocation2 + $0xa28] ss:$48 sps:$4 sm:$0xff]  }
 0x1f7   :  { %2778 = vmatprep.subr.bf16.mxu0 %v8437_v61  ;;  %2860 = vmatprep.subr.bf16.mxu1 %v8439_v62  ;;  %v8529_v61 = vld [vmem:[#allocation2 + $0xa84] ss:$48 sps:$4 sm:$0xff]   ;;  %v8532_v62 = vld [vmem:[#allocation2 + $0xa8c] ss:$48 sps:$4 sm:$0xff]  }
 0x1fa   :  { %2779 = vmatpush1.bf16.msra.mxu0 %v8441_v63  ;;  %2861 = vmatpush1.bf16.msra.mxu1 %v8442_v0  ;;  %v8527_v63 = vld [vmem:[#allocation2 + $0xa80] ss:$48 sps:$4 sm:$0xff]   ;;  %v8530_v0 = vld [vmem:[#allocation2 + $0xa88] ss:$48 sps:$4 sm:$0xff]  }
 0x1fb   :  { %2780 = vmatprep.subr.bf16.mxu0 %v8443_v1  ;;  %2862 = vmatprep.subr.bf16.mxu1 %v8445_v2  ;;  %v8535_v1 = vld [vmem:[#allocation2 + $0xae4] ss:$48 sps:$4 sm:$0xff]   ;;  %v8538_v2 = vld [vmem:[#allocation2 + $0xaec] ss:$48 sps:$4 sm:$0xff]  }
 0x1fe   :  { %2781 = vmatpush1.bf16.msra.mxu0 %v8447_v3  ;;  %2863 = vmatpush1.bf16.msra.mxu1 %v8448_v4  ;;  %v8533_v3 = vld [vmem:[#allocation2 + $0xae0] ss:$48 sps:$4 sm:$0xff]   ;;  %v8536_v4 = vld [vmem:[#allocation2 + $0xae8] ss:$48 sps:$4 sm:$0xff]  }
 0x1ff   :  { %2782 = vmatprep.subr.bf16.mxu0 %v8449_v5  ;;  %2864 = vmatprep.subr.bf16.mxu1 %v8451_v6  ;;  %v8541_v5 = vld [vmem:[#allocation2 + $0xb44] ss:$48 sps:$4 sm:$0xff]   ;;  %v8544_v6 = vld [vmem:[#allocation2 + $0xb4c] ss:$48 sps:$4 sm:$0xff]  }
 0x202   :  { %2783 = vmatpush1.bf16.msra.mxu0 %v8453_v7  ;;  %2865 = vmatpush1.bf16.msra.mxu1 %v8454_v8  ;;  %v8539_v7 = vld [vmem:[#allocation2 + $0xb40] ss:$48 sps:$4 sm:$0xff]   ;;  %v8542_v8 = vld [vmem:[#allocation2 + $0xb48] ss:$48 sps:$4 sm:$0xff]  }
 0x203   :  { %2793 = vmatprep.subr.bf16.mxu0 %v8457_v9  ;;  %2875 = vmatprep.subr.bf16.mxu1 %v8460_v10  ;;  %v8547_v9 = vld [vmem:[#allocation2 + $0xba4] ss:$48 sps:$4 sm:$0xff]   ;;  %v8550_v10 = vld [vmem:[#allocation2 + $0xbac] ss:$48 sps:$4 sm:$0xff]  }
 0x205   :  { %2785 = vmatmul.mubr.bf16.vlgmr.msra.gmra.mrb[0].mxu0 %v10561_v12  ;;  %2867 = vmatmul.mubr.bf16.vlgmr.msra.gmra.mrb[0].mxu1 %v10561_v12 }
 0x206   :  { %2794 = vmatpush1.bf16.msra.mxu0 %v8455_v11  ;;  %2876 = vmatpush1.bf16.msra.mxu1 %v8458_v13  ;;  %v8545_v11 = vld [vmem:[#allocation2 + $0xba0] ss:$48 sps:$4 sm:$0xff]   ;;  %v8548_v13 = vld [vmem:[#allocation2 + $0xba8] ss:$48 sps:$4 sm:$0xff]  }
 0x207   :  { %2795 = vmatprep.subr.bf16.mxu0 %v8463_v14  ;;  %2877 = vmatprep.subr.bf16.mxu1 %v8466_v15  ;;  %v8553_v14 = vld [vmem:[#allocation2 + $0x14] ss:$48 sps:$4 sm:$0xff]   ;;  %v8556_v15 = vld [vmem:[#allocation2 + $0x1c] ss:$48 sps:$4 sm:$0xff]  }
 0x208   :  { %2825 = vmatprep.mubr.bf16.mxu0 %v10565_v16  ;;  %2907 = vmatprep.mubr.bf16.mxu1 %v10565_v16 }
 0x20a   :  { %2796 = vmatpush1.bf16.msra.mxu0 %v8461_v17  ;;  %2878 = vmatpush1.bf16.msra.mxu1 %v8464_v18  ;;  %v10573_v17 = vcombine.high %v10561_v12, %v10561_v12  ;;  %v8551_v18 = vld [vmem:[#allocation2 + $0x10] ss:$48 sps:$4 sm:$0xff]  }
 0x20b   :  { %2797 = vmatprep.subr.bf16.mxu0 %v8469_v19  ;;  %2879 = vmatprep.subr.bf16.mxu1 %v8472_v20  ;;  %v8554_v19 = vld [vmem:[#allocation2 + $0x18] ss:$48 sps:$4 sm:$0xff]   ;;  %v8559_v20 = vld [vmem:[#allocation2 + $0x74] ss:$48 sps:$4 sm:$0xff]  }
 0x20e   :  { %2798 = vmatpush1.bf16.msra.mxu0 %v8467_v21  ;;  %2880 = vmatpush1.bf16.msra.mxu1 %v8470_v22  ;;  %v8562_v21 = vld [vmem:[#allocation2 + $0x7c] ss:$48 sps:$4 sm:$0xff]   ;;  %v8557_v22 = vld [vmem:[#allocation2 + $0x70] ss:$48 sps:$4 sm:$0xff]  }
 0x20f   :  { %2799 = vmatprep.subr.bf16.mxu0 %v8475_v23  ;;  %2881 = vmatprep.subr.bf16.mxu1 %v8478_v24  ;;  %v8560_v23 = vld [vmem:[#allocation2 + $0x78] ss:$48 sps:$4 sm:$0xff]   ;;  %v8565_v24 = vld [vmem:[#allocation2 + $0xd4] ss:$48 sps:$4 sm:$0xff]  }
 0x212   :  { %2800 = vmatpush1.bf16.msra.mxu0 %v8473_v25  ;;  %2882 = vmatpush1.bf16.msra.mxu1 %v8476_v26  ;;  %v8568_v25 = vld [vmem:[#allocation2 + $0xdc] ss:$48 sps:$4 sm:$0xff]   ;;  %v8563_v26 = vld [vmem:[#allocation2 + $0xd0] ss:$48 sps:$4 sm:$0xff]  }
 0x213   :  { %2801 = vmatprep.subr.bf16.mxu0 %v8481_v27  ;;  %2883 = vmatprep.subr.bf16.mxu1 %v8484_v28  ;;  %v8566_v27 = vld [vmem:[#allocation2 + $0xd8] ss:$48 sps:$4 sm:$0xff]   ;;  %v8571_v28 = vld [vmem:[#allocation2 + $0x134] ss:$48 sps:$4 sm:$0xff]  }
 0x216   :  { %2802 = vmatpush1.bf16.msra.mxu0 %v8479_v29  ;;  %2884 = vmatpush1.bf16.msra.mxu1 %v8482_v30  ;;  %v8574_v29 = vld [vmem:[#allocation2 + $0x13c] ss:$48 sps:$4 sm:$0xff]   ;;  %v8569_v30 = vld [vmem:[#allocation2 + $0x130] ss:$48 sps:$4 sm:$0xff]  }
 0x217   :  { %2803 = vmatprep.subr.bf16.mxu0 %v8487_v31  ;;  %2885 = vmatprep.subr.bf16.mxu1 %v8490_v32  ;;  %v8572_v31 = vld [vmem:[#allocation2 + $0x138] ss:$48 sps:$4 sm:$0xff]   ;;  %v8577_v32 = vld [vmem:[#allocation2 + $0x194] ss:$48 sps:$4 sm:$0xff]  }
 0x21a   :  { %2804 = vmatpush1.bf16.msra.mxu0 %v8485_v33  ;;  %2886 = vmatpush1.bf16.msra.mxu1 %v8488_v34  ;;  %v8580_v33 = vld [vmem:[#allocation2 + $0x19c] ss:$48 sps:$4 sm:$0xff]   ;;  %v8575_v34 = vld [vmem:[#allocation2 + $0x190] ss:$48 sps:$4 sm:$0xff]  }
 0x21b   :  { %2805 = vmatprep.subr.bf16.mxu0 %v8493_v35  ;;  %2887 = vmatprep.subr.bf16.mxu1 %v8496_v36  ;;  %v8578_v35 = vld [vmem:[#allocation2 + $0x198] ss:$48 sps:$4 sm:$0xff]   ;;  %v8583_v36 = vld [vmem:[#allocation2 + $0x1f4] ss:$48 sps:$4 sm:$0xff]  }
 0x21e   :  { %2806 = vmatpush1.bf16.msra.mxu0 %v8491_v37  ;;  %2888 = vmatpush1.bf16.msra.mxu1 %v8494_v38  ;;  %v8586_v37 = vld [vmem:[#allocation2 + $0x1fc] ss:$48 sps:$4 sm:$0xff]   ;;  %v8581_v38 = vld [vmem:[#allocation2 + $0x1f0] ss:$48 sps:$4 sm:$0xff]  }
 0x21f   :  { %2807 = vmatprep.subr.bf16.mxu0 %v8499_v39  ;;  %2889 = vmatprep.subr.bf16.mxu1 %v8502_v40  ;;  %v8584_v39 = vld [vmem:[#allocation2 + $0x1f8] ss:$48 sps:$4 sm:$0xff]   ;;  %v8589_v40 = vld [vmem:[#allocation2 + $0x254] ss:$48 sps:$4 sm:$0xff]  }
 0x222   :  { %2808 = vmatpush1.bf16.msra.mxu0 %v8497_v41  ;;  %2890 = vmatpush1.bf16.msra.mxu1 %v8500_v42  ;;  %v8592_v41 = vld [vmem:[#allocation2 + $0x25c] ss:$48 sps:$4 sm:$0xff]   ;;  %v8587_v42 = vld [vmem:[#allocation2 + $0x250] ss:$48 sps:$4 sm:$0xff]  }
 0x223   :  { %2809 = vmatprep.subr.bf16.mxu0 %v8505_v43  ;;  %2891 = vmatprep.subr.bf16.mxu1 %v8508_v44  ;;  %v8590_v43 = vld [vmem:[#allocation2 + $0x258] ss:$48 sps:$4 sm:$0xff]   ;;  %v8595_v44 = vld [vmem:[#allocation2 + $0x2b4] ss:$48 sps:$4 sm:$0xff]  }
 0x226   :  { %2810 = vmatpush1.bf16.msra.mxu0 %v8503_v46  ;;  %2892 = vmatpush1.bf16.msra.mxu1 %v8506_v47  ;;  %v8598_v46 = vld [vmem:[#allocation2 + $0x2bc] ss:$48 sps:$4 sm:$0xff]   ;;  %v8593_v47 = vld [vmem:[#allocation2 + $0x2b0] ss:$48 sps:$4 sm:$0xff]  }
 0x227   :  { %2811 = vmatprep.subr.bf16.mxu0 %v8511_v48  ;;  %2893 = vmatprep.subr.bf16.mxu1 %v8514_v49  ;;  %v8596_v48 = vld [vmem:[#allocation2 + $0x2b8] ss:$48 sps:$4 sm:$0xff]   ;;  %v8601_v49 = vld [vmem:[#allocation2 + $0x314] ss:$48 sps:$4 sm:$0xff]  }
 0x22a   :  { %2812 = vmatpush1.bf16.msra.mxu0 %v8509_v50  ;;  %2894 = vmatpush1.bf16.msra.mxu1 %v8512_v51  ;;  %v8604_v50 = vld [vmem:[#allocation2 + $0x31c] ss:$48 sps:$4 sm:$0xff]   ;;  %v8599_v51 = vld [vmem:[#allocation2 + $0x310] ss:$48 sps:$4 sm:$0xff]  }
 0x22b   :  { %2813 = vmatprep.subr.bf16.mxu0 %v8517_v52  ;;  %2895 = vmatprep.subr.bf16.mxu1 %v8520_v53  ;;  %v8602_v52 = vld [vmem:[#allocation2 + $0x318] ss:$48 sps:$4 sm:$0xff]   ;;  %v8607_v53 = vld [vmem:[#allocation2 + $0x374] ss:$48 sps:$4 sm:$0xff]  }
 0x22e   :  { %2814 = vmatpush1.bf16.msra.mxu0 %v8515_v54  ;;  %2896 = vmatpush1.bf16.msra.mxu1 %v8518_v55  ;;  %v8610_v54 = vld [vmem:[#allocation2 + $0x37c] ss:$48 sps:$4 sm:$0xff]   ;;  %v8605_v55 = vld [vmem:[#allocation2 + $0x370] ss:$48 sps:$4 sm:$0xff]  }
 0x22f   :  { %2815 = vmatprep.subr.bf16.mxu0 %v8523_v56  ;;  %2897 = vmatprep.subr.bf16.mxu1 %v8526_v57  ;;  %v8608_v56 = vld [vmem:[#allocation2 + $0x378] ss:$48 sps:$4 sm:$0xff]   ;;  %v8613_v57 = vld [vmem:[#allocation2 + $0x3d4] ss:$48 sps:$4 sm:$0xff]  }
 0x232   :  { %2816 = vmatpush1.bf16.msra.mxu0 %v8521_v59  ;;  %2898 = vmatpush1.bf16.msra.mxu1 %v8524_v60  ;;  %v8616_v59 = vld [vmem:[#allocation2 + $0x3dc] ss:$48 sps:$4 sm:$0xff]   ;;  %v8611_v60 = vld [vmem:[#allocation2 + $0x3d0] ss:$48 sps:$4 sm:$0xff]  }
 0x233   :  { %2817 = vmatprep.subr.bf16.mxu0 %v8529_v61  ;;  %2899 = vmatprep.subr.bf16.mxu1 %v8532_v62  ;;  %v8614_v61 = vld [vmem:[#allocation2 + $0x3d8] ss:$48 sps:$4 sm:$0xff]   ;;  %v8619_v62 = vld [vmem:[#allocation2 + $0x434] ss:$48 sps:$4 sm:$0xff]  }
 0x236   :  { %2818 = vmatpush1.bf16.msra.mxu0 %v8527_v63  ;;  %2900 = vmatpush1.bf16.msra.mxu1 %v8530_v0  ;;  %v8622_v63 = vld [vmem:[#allocation2 + $0x43c] ss:$48 sps:$4 sm:$0xff]   ;;  %v8617_v0 = vld [vmem:[#allocation2 + $0x430] ss:$48 sps:$4 sm:$0xff]  }
 0x237   :  { %2819 = vmatprep.subr.bf16.mxu0 %v8535_v1  ;;  %2901 = vmatprep.subr.bf16.mxu1 %v8538_v2  ;;  %v8620_v1 = vld [vmem:[#allocation2 + $0x438] ss:$48 sps:$4 sm:$0xff]   ;;  %v8625_v2 = vld [vmem:[#allocation2 + $0x494] ss:$48 sps:$4 sm:$0xff]  }
 0x23a   :  { %2820 = vmatpush1.bf16.msra.mxu0 %v8533_v3  ;;  %2902 = vmatpush1.bf16.msra.mxu1 %v8536_v4  ;;  %v8628_v3 = vld [vmem:[#allocation2 + $0x49c] ss:$48 sps:$4 sm:$0xff]   ;;  %v8623_v4 = vld [vmem:[#allocation2 + $0x490] ss:$48 sps:$4 sm:$0xff]  }
 0x23b   :  { %2821 = vmatprep.subr.bf16.mxu0 %v8541_v5  ;;  %2903 = vmatprep.subr.bf16.mxu1 %v8544_v6  ;;  %v8626_v5 = vld [vmem:[#allocation2 + $0x498] ss:$48 sps:$4 sm:$0xff]   ;;  %v8631_v6 = vld [vmem:[#allocation2 + $0x4f4] ss:$48 sps:$4 sm:$0xff]  }
 0x23e   :  { %2822 = vmatpush1.bf16.msra.mxu0 %v8539_v7  ;;  %2904 = vmatpush1.bf16.msra.mxu1 %v8542_v8  ;;  %v8634_v7 = vld [vmem:[#allocation2 + $0x4fc] ss:$48 sps:$4 sm:$0xff]   ;;  %v8629_v8 = vld [vmem:[#allocation2 + $0x4f0] ss:$48 sps:$4 sm:$0xff]  }
 0x23f   :  { %2823 = vmatprep.subr.bf16.mxu0 %v8547_v9  ;;  %2905 = vmatprep.subr.bf16.mxu1 %v8550_v10  ;;  %v8632_v9 = vld [vmem:[#allocation2 + $0x4f8] ss:$48 sps:$4 sm:$0xff]   ;;  %v8637_v10 = vld [vmem:[#allocation2 + $0x554] ss:$48 sps:$4 sm:$0xff]  }
 0x242   :  { %2824 = vmatpush1.bf16.msra.mxu0 %v8545_v11  ;;  %2906 = vmatpush1.bf16.msra.mxu1 %v8548_v13  ;;  %v8640_v11 = vld [vmem:[#allocation2 + $0x55c] ss:$48 sps:$4 sm:$0xff]   ;;  %v8635_v13 = vld [vmem:[#allocation2 + $0x550] ss:$48 sps:$4 sm:$0xff]  }
 0x243   :  { %2916 = vmatprep.subr.bf16.mxu0 %v8553_v14  ;;  %2998 = vmatprep.subr.bf16.mxu1 %v8556_v15  ;;  %v8638_v14 = vld [vmem:[#allocation2 + $0x558] ss:$48 sps:$4 sm:$0xff]   ;;  %v8643_v15 = vld [vmem:[#allocation2 + $0x5b4] ss:$48 sps:$4 sm:$0xff]  }
 0x245   :  { %2826 = vmatmul.mubr.bf16.vlgmr.msra.gmra.mrb[0].mxu0 %v10573_v17  ;;  %2908 = vmatmul.mubr.bf16.vlgmr.msra.gmra.mrb[0].mxu1 %v10573_v17 }
 0x246   :  { %2917 = vmatpush1.bf16.msra.mxu0 %v8551_v18  ;;  %2999 = vmatpush1.bf16.msra.mxu1 %v8554_v19  ;;  %v8646_v18 = vld [vmem:[#allocation2 + $0x5bc] ss:$48 sps:$4 sm:$0xff]   ;;  %v8641_v19 = vld [vmem:[#allocation2 + $0x5b0] ss:$48 sps:$4 sm:$0xff]  }
 0x247   :  { %2918 = vmatprep.subr.bf16.mxu0 %v8559_v20  ;;  %3000 = vmatprep.subr.bf16.mxu1 %v8562_v21  ;;  %v8644_v20 = vld [vmem:[#allocation2 + $0x5b8] ss:$48 sps:$4 sm:$0xff]   ;;  %v8649_v21 = vld [vmem:[#allocation2 + $0x614] ss:$48 sps:$4 sm:$0xff]  }
 0x248   :  { %2948 = vmatprep.mubr.bf16.mxu0 %v10557_v58  ;;  %3030 = vmatprep.mubr.bf16.mxu1 %v10557_v58 }
 0x24a   :  { %2919 = vmatpush1.bf16.msra.mxu0 %v8557_v22  ;;  %3001 = vmatpush1.bf16.msra.mxu1 %v8560_v23  ;;  %v8652_v22 = vld [vmem:[#allocation2 + $0x61c] ss:$48 sps:$4 sm:$0xff]   ;;  %v8647_v23 = vld [vmem:[#allocation2 + $0x610] ss:$48 sps:$4 sm:$0xff]  }
 0x24b   :  { %2920 = vmatprep.subr.bf16.mxu0 %v8565_v24  ;;  %3002 = vmatprep.subr.bf16.mxu1 %v8568_v25  ;;  %v8650_v24 = vld [vmem:[#allocation2 + $0x618] ss:$48 sps:$4 sm:$0xff]   ;;  %v8655_v25 = vld [vmem:[#allocation2 + $0x674] ss:$48 sps:$4 sm:$0xff]  }
 0x24e   :  { %2921 = vmatpush1.bf16.msra.mxu0 %v8563_v26  ;;  %3003 = vmatpush1.bf16.msra.mxu1 %v8566_v27  ;;  %v8658_v26 = vld [vmem:[#allocation2 + $0x67c] ss:$48 sps:$4 sm:$0xff]   ;;  %v8653_v27 = vld [vmem:[#allocation2 + $0x670] ss:$48 sps:$4 sm:$0xff]  }
 0x24f   :  { %2922 = vmatprep.subr.bf16.mxu0 %v8571_v28  ;;  %3004 = vmatprep.subr.bf16.mxu1 %v8574_v29  ;;  %v8656_v28 = vld [vmem:[#allocation2 + $0x678] ss:$48 sps:$4 sm:$0xff]   ;;  %v8661_v29 = vld [vmem:[#allocation2 + $0x6d4] ss:$48 sps:$4 sm:$0xff]  }
 0x252   :  { %2923 = vmatpush1.bf16.msra.mxu0 %v8569_v30  ;;  %3005 = vmatpush1.bf16.msra.mxu1 %v8572_v31  ;;  %v8664_v30 = vld [vmem:[#allocation2 + $0x6dc] ss:$48 sps:$4 sm:$0xff]   ;;  %v8659_v31 = vld [vmem:[#allocation2 + $0x6d0] ss:$48 sps:$4 sm:$0xff]  }
 0x253   :  { %2924 = vmatprep.subr.bf16.mxu0 %v8577_v32  ;;  %3006 = vmatprep.subr.bf16.mxu1 %v8580_v33  ;;  %v8662_v32 = vld [vmem:[#allocation2 + $0x6d8] ss:$48 sps:$4 sm:$0xff]   ;;  %v8667_v33 = vld [vmem:[#allocation2 + $0x734] ss:$48 sps:$4 sm:$0xff]  }
 0x256   :  { %2925 = vmatpush1.bf16.msra.mxu0 %v8575_v34  ;;  %3007 = vmatpush1.bf16.msra.mxu1 %v8578_v35  ;;  %v8670_v34 = vld [vmem:[#allocation2 + $0x73c] ss:$48 sps:$4 sm:$0xff]   ;;  %v8665_v35 = vld [vmem:[#allocation2 + $0x730] ss:$48 sps:$4 sm:$0xff]  }
 0x257   :  { %2926 = vmatprep.subr.bf16.mxu0 %v8583_v36  ;;  %3008 = vmatprep.subr.bf16.mxu1 %v8586_v37  ;;  %v8668_v36 = vld [vmem:[#allocation2 + $0x738] ss:$48 sps:$4 sm:$0xff]   ;;  %v8673_v37 = vld [vmem:[#allocation2 + $0x794] ss:$48 sps:$4 sm:$0xff]  }
 0x25a   :  { %2927 = vmatpush1.bf16.msra.mxu0 %v8581_v38  ;;  %3009 = vmatpush1.bf16.msra.mxu1 %v8584_v39  ;;  %v8676_v38 = vld [vmem:[#allocation2 + $0x79c] ss:$48 sps:$4 sm:$0xff]   ;;  %v8671_v39 = vld [vmem:[#allocation2 + $0x790] ss:$48 sps:$4 sm:$0xff]  }
 0x25b   :  { %2928 = vmatprep.subr.bf16.mxu0 %v8589_v40  ;;  %3010 = vmatprep.subr.bf16.mxu1 %v8592_v41  ;;  %v8674_v40 = vld [vmem:[#allocation2 + $0x798] ss:$48 sps:$4 sm:$0xff]   ;;  %v8679_v41 = vld [vmem:[#allocation2 + $0x7f4] ss:$48 sps:$4 sm:$0xff]  }
 0x25e   :  { %2929 = vmatpush1.bf16.msra.mxu0 %v8587_v42  ;;  %3011 = vmatpush1.bf16.msra.mxu1 %v8590_v43  ;;  %v8682_v42 = vld [vmem:[#allocation2 + $0x7fc] ss:$48 sps:$4 sm:$0xff]   ;;  %v8677_v43 = vld [vmem:[#allocation2 + $0x7f0] ss:$48 sps:$4 sm:$0xff]  }
 0x25f   :  { %2930 = vmatprep.subr.bf16.mxu0 %v8595_v44  ;;  %3012 = vmatprep.subr.bf16.mxu1 %v8598_v46  ;;  %v8680_v44 = vld [vmem:[#allocation2 + $0x7f8] ss:$48 sps:$4 sm:$0xff]   ;;  %v8685_v46 = vld [vmem:[#allocation2 + $0x854] ss:$48 sps:$4 sm:$0xff]  }
 0x262   :  { %2931 = vmatpush1.bf16.msra.mxu0 %v8593_v47  ;;  %3013 = vmatpush1.bf16.msra.mxu1 %v8596_v48  ;;  %v8688_v47 = vld [vmem:[#allocation2 + $0x85c] ss:$48 sps:$4 sm:$0xff]   ;;  %v8683_v48 = vld [vmem:[#allocation2 + $0x850] ss:$48 sps:$4 sm:$0xff]  }
 0x263   :  { %2932 = vmatprep.subr.bf16.mxu0 %v8601_v49  ;;  %3014 = vmatprep.subr.bf16.mxu1 %v8604_v50  ;;  %v8686_v49 = vld [vmem:[#allocation2 + $0x858] ss:$48 sps:$4 sm:$0xff]   ;;  %v8691_v50 = vld [vmem:[#allocation2 + $0x8b4] ss:$48 sps:$4 sm:$0xff]  }
 0x266   :  { %2933 = vmatpush1.bf16.msra.mxu0 %v8599_v51  ;;  %3015 = vmatpush1.bf16.msra.mxu1 %v8602_v52  ;;  %v8694_v51 = vld [vmem:[#allocation2 + $0x8bc] ss:$48 sps:$4 sm:$0xff]   ;;  %v8689_v52 = vld [vmem:[#allocation2 + $0x8b0] ss:$48 sps:$4 sm:$0xff]  }
 0x267   :  { %2934 = vmatprep.subr.bf16.mxu0 %v8607_v53  ;;  %3016 = vmatprep.subr.bf16.mxu1 %v8610_v54  ;;  %v8692_v53 = vld [vmem:[#allocation2 + $0x8b8] ss:$48 sps:$4 sm:$0xff]   ;;  %v8697_v54 = vld [vmem:[#allocation2 + $0x914] ss:$48 sps:$4 sm:$0xff]  }
 0x26a   :  { %2935 = vmatpush1.bf16.msra.mxu0 %v8605_v55  ;;  %3017 = vmatpush1.bf16.msra.mxu1 %v8608_v56  ;;  %v8700_v55 = vld [vmem:[#allocation2 + $0x91c] ss:$48 sps:$4 sm:$0xff]   ;;  %v8695_v56 = vld [vmem:[#allocation2 + $0x910] ss:$48 sps:$4 sm:$0xff]  }
 0x26b   :  { %2936 = vmatprep.subr.bf16.mxu0 %v8613_v57  ;;  %3018 = vmatprep.subr.bf16.mxu1 %v8616_v59  ;;  %v8698_v57 = vld [vmem:[#allocation2 + $0x918] ss:$48 sps:$4 sm:$0xff]   ;;  %v8703_v59 = vld [vmem:[#allocation2 + $0x974] ss:$48 sps:$4 sm:$0xff]  }
 0x26e   :  { %2937 = vmatpush1.bf16.msra.mxu0 %v8611_v60  ;;  %3019 = vmatpush1.bf16.msra.mxu1 %v8614_v61  ;;  %v8706_v60 = vld [vmem:[#allocation2 + $0x97c] ss:$48 sps:$4 sm:$0xff]   ;;  %v8701_v61 = vld [vmem:[#allocation2 + $0x970] ss:$48 sps:$4 sm:$0xff]  }
 0x26f   :  { %2938 = vmatprep.subr.bf16.mxu0 %v8619_v62  ;;  %3020 = vmatprep.subr.bf16.mxu1 %v8622_v63  ;;  %v8704_v62 = vld [vmem:[#allocation2 + $0x978] ss:$48 sps:$4 sm:$0xff]   ;;  %v8709_v63 = vld [vmem:[#allocation2 + $0x9d4] ss:$48 sps:$4 sm:$0xff]  }
 0x272   :  { %2939 = vmatpush1.bf16.msra.mxu0 %v8617_v0  ;;  %3021 = vmatpush1.bf16.msra.mxu1 %v8620_v1  ;;  %v8712_v0 = vld [vmem:[#allocation2 + $0x9dc] ss:$48 sps:$4 sm:$0xff]   ;;  %v8707_v1 = vld [vmem:[#allocation2 + $0x9d0] ss:$48 sps:$4 sm:$0xff]  }
 0x273   :  { %2940 = vmatprep.subr.bf16.mxu0 %v8625_v2  ;;  %3022 = vmatprep.subr.bf16.mxu1 %v8628_v3  ;;  %v8710_v2 = vld [vmem:[#allocation2 + $0x9d8] ss:$48 sps:$4 sm:$0xff]   ;;  %v8715_v3 = vld [vmem:[#allocation2 + $0xa34] ss:$48 sps:$4 sm:$0xff]  }
 0x276   :  { %2941 = vmatpush1.bf16.msra.mxu0 %v8623_v4  ;;  %3023 = vmatpush1.bf16.msra.mxu1 %v8626_v5  ;;  %v8718_v4 = vld [vmem:[#allocation2 + $0xa3c] ss:$48 sps:$4 sm:$0xff]   ;;  %v8713_v5 = vld [vmem:[#allocation2 + $0xa30] ss:$48 sps:$4 sm:$0xff]  }
 0x277   :  { %2942 = vmatprep.subr.bf16.mxu0 %v8631_v6  ;;  %3024 = vmatprep.subr.bf16.mxu1 %v8634_v7  ;;  %v8716_v6 = vld [vmem:[#allocation2 + $0xa38] ss:$48 sps:$4 sm:$0xff]   ;;  %v8721_v7 = vld [vmem:[#allocation2 + $0xa94] ss:$48 sps:$4 sm:$0xff]  }
 0x27a   :  { %2943 = vmatpush1.bf16.msra.mxu0 %v8629_v8  ;;  %3025 = vmatpush1.bf16.msra.mxu1 %v8632_v9  ;;  %v8724_v8 = vld [vmem:[#allocation2 + $0xa9c] ss:$48 sps:$4 sm:$0xff]   ;;  %v8719_v9 = vld [vmem:[#allocation2 + $0xa90] ss:$48 sps:$4 sm:$0xff]  }
 0x27b   :  { %2944 = vmatprep.subr.bf16.mxu0 %v8637_v10  ;;  %3026 = vmatprep.subr.bf16.mxu1 %v8640_v11  ;;  %v8722_v10 = vld [vmem:[#allocation2 + $0xa98] ss:$48 sps:$4 sm:$0xff]   ;;  %v8727_v11 = vld [vmem:[#allocation2 + $0xaf4] ss:$48 sps:$4 sm:$0xff]  }
 0x27e   :  { %2945 = vmatpush1.bf16.msra.mxu0 %v8635_v13  ;;  %3027 = vmatpush1.bf16.msra.mxu1 %v8638_v14  ;;  %v8730_v13 = vld [vmem:[#allocation2 + $0xafc] ss:$48 sps:$4 sm:$0xff]   ;;  %v8725_v14 = vld [vmem:[#allocation2 + $0xaf0] ss:$48 sps:$4 sm:$0xff]  }
 0x27f   :  { %2946 = vmatprep.subr.bf16.mxu0 %v8643_v15  ;;  %3028 = vmatprep.subr.bf16.mxu1 %v8646_v18  ;;  %v8728_v15 = vld [vmem:[#allocation2 + $0xaf8] ss:$48 sps:$4 sm:$0xff]   ;;  %v8733_v18 = vld [vmem:[#allocation2 + $0xb54] ss:$48 sps:$4 sm:$0xff]  }
 0x282   :  { %2947 = vmatpush1.bf16.msra.mxu0 %v8641_v19  ;;  %3029 = vmatpush1.bf16.msra.mxu1 %v8644_v20  ;;  %v8736_v19 = vld [vmem:[#allocation2 + $0xb5c] ss:$48 sps:$4 sm:$0xff]   ;;  %v8731_v20 = vld [vmem:[#allocation2 + $0xb50] ss:$48 sps:$4 sm:$0xff]  }
 0x283   :  { %2957 = vmatprep.subr.bf16.mxu0 %v8649_v21  ;;  %3039 = vmatprep.subr.bf16.mxu1 %v8652_v22  ;;  %v8734_v21 = vld [vmem:[#allocation2 + $0xb58] ss:$48 sps:$4 sm:$0xff]   ;;  %v8739_v22 = vld [vmem:[#allocation2 + $0xbb4] ss:$48 sps:$4 sm:$0xff]  }
 0x285   :  { %2949 = vmatmul.mubr.bf16.vlgmr.msra.gmra.mrb[4].mxu0 %v10561_v12  ;;  %3031 = vmatmul.mubr.bf16.vlgmr.msra.gmra.mrb[4].mxu1 %v10561_v12 }
 0x286   :  { %2958 = vmatpush1.bf16.msra.mxu0 %v8647_v23  ;;  %3040 = vmatpush1.bf16.msra.mxu1 %v8650_v24  ;;  %v8742_v23 = vld [vmem:[#allocation2 + $0xbbc] ss:$48 sps:$4 sm:$0xff]   ;;  %v8737_v24 = vld [vmem:[#allocation2 + $0xbb0] ss:$48 sps:$4 sm:$0xff]  }
 0x287   :  { %2959 = vmatprep.subr.bf16.mxu0 %v8655_v25  ;;  %3041 = vmatprep.subr.bf16.mxu1 %v8658_v26  ;;  %v8740_v25 = vld [vmem:[#allocation2 + $0xbb8] ss:$48 sps:$4 sm:$0xff]   ;;  %v8745_v26 = vld [vmem:[#allocation2 + $0x24] ss:$48 sps:$4 sm:$0xff]  }
 0x288   :  { %2989 = vmatprep.mubr.bf16.mxu0 %v10565_v16  ;;  %3071 = vmatprep.mubr.bf16.mxu1 %v10565_v16 }
 0x28a   :  { %2960 = vmatpush1.bf16.msra.mxu0 %v8653_v27  ;;  %3042 = vmatpush1.bf16.msra.mxu1 %v8656_v28  ;;  %v8748_v27 = vld [vmem:[#allocation2 + $0x2c] ss:$48 sps:$4 sm:$0xff]   ;;  %v8743_v28 = vld [vmem:[#allocation2 + $0x20] ss:$48 sps:$4 sm:$0xff]  }
 0x28b   :  { %2961 = vmatprep.subr.bf16.mxu0 %v8661_v29  ;;  %3043 = vmatprep.subr.bf16.mxu1 %v8664_v30  ;;  %v8746_v29 = vld [vmem:[#allocation2 + $0x28] ss:$48 sps:$4 sm:$0xff]   ;;  %v8751_v30 = vld [vmem:[#allocation2 + $0x84] ss:$48 sps:$4 sm:$0xff]  }
 0x28e   :  { %2962 = vmatpush1.bf16.msra.mxu0 %v8659_v31  ;;  %3044 = vmatpush1.bf16.msra.mxu1 %v8662_v32  ;;  %v8754_v31 = vld [vmem:[#allocation2 + $0x8c] ss:$48 sps:$4 sm:$0xff]   ;;  %v8749_v32 = vld [vmem:[#allocation2 + $0x80] ss:$48 sps:$4 sm:$0xff]  }
 0x28f   :  { %2963 = vmatprep.subr.bf16.mxu0 %v8667_v33  ;;  %3045 = vmatprep.subr.bf16.mxu1 %v8670_v34  ;;  %v8752_v33 = vld [vmem:[#allocation2 + $0x88] ss:$48 sps:$4 sm:$0xff]   ;;  %v8757_v34 = vld [vmem:[#allocation2 + $0xe4] ss:$48 sps:$4 sm:$0xff]  }
 0x292   :  { %2964 = vmatpush1.bf16.msra.mxu0 %v8665_v35  ;;  %3046 = vmatpush1.bf16.msra.mxu1 %v8668_v36  ;;  %v8760_v35 = vld [vmem:[#allocation2 + $0xec] ss:$48 sps:$4 sm:$0xff]   ;;  %v8755_v36 = vld [vmem:[#allocation2 + $0xe0] ss:$48 sps:$4 sm:$0xff]  }
 0x293   :  { %2965 = vmatprep.subr.bf16.mxu0 %v8673_v37  ;;  %3047 = vmatprep.subr.bf16.mxu1 %v8676_v38  ;;  %v8758_v37 = vld [vmem:[#allocation2 + $0xe8] ss:$48 sps:$4 sm:$0xff]   ;;  %v8763_v38 = vld [vmem:[#allocation2 + $0x144] ss:$48 sps:$4 sm:$0xff]  }
 0x296   :  { %2966 = vmatpush1.bf16.msra.mxu0 %v8671_v39  ;;  %3048 = vmatpush1.bf16.msra.mxu1 %v8674_v40  ;;  %v8766_v39 = vld [vmem:[#allocation2 + $0x14c] ss:$48 sps:$4 sm:$0xff]   ;;  %v8761_v40 = vld [vmem:[#allocation2 + $0x140] ss:$48 sps:$4 sm:$0xff]  }
 0x297   :  { %2967 = vmatprep.subr.bf16.mxu0 %v8679_v41  ;;  %3049 = vmatprep.subr.bf16.mxu1 %v8682_v42  ;;  %v8764_v41 = vld [vmem:[#allocation2 + $0x148] ss:$48 sps:$4 sm:$0xff]   ;;  %v8769_v42 = vld [vmem:[#allocation2 + $0x1a4] ss:$48 sps:$4 sm:$0xff]  }
 0x29a   :  { %2968 = vmatpush1.bf16.msra.mxu0 %v8677_v43  ;;  %3050 = vmatpush1.bf16.msra.mxu1 %v8680_v44  ;;  %v8772_v43 = vld [vmem:[#allocation2 + $0x1ac] ss:$48 sps:$4 sm:$0xff]   ;;  %v8767_v44 = vld [vmem:[#allocation2 + $0x1a0] ss:$48 sps:$4 sm:$0xff]  }
 0x29b   :  { %2969 = vmatprep.subr.bf16.mxu0 %v8685_v46  ;;  %3051 = vmatprep.subr.bf16.mxu1 %v8688_v47  ;;  %v8770_v46 = vld [vmem:[#allocation2 + $0x1a8] ss:$48 sps:$4 sm:$0xff]   ;;  %v8775_v47 = vld [vmem:[#allocation2 + $0x204] ss:$48 sps:$4 sm:$0xff]  }
 0x29e   :  { %2970 = vmatpush1.bf16.msra.mxu0 %v8683_v48  ;;  %3052 = vmatpush1.bf16.msra.mxu1 %v8686_v49  ;;  %v8778_v48 = vld [vmem:[#allocation2 + $0x20c] ss:$48 sps:$4 sm:$0xff]   ;;  %v8776_v49 = vld [vmem:[#allocation2 + $0x208] ss:$48 sps:$4 sm:$0xff]  }
 0x29f   :  { %2971 = vmatprep.subr.bf16.mxu0 %v8691_v50  ;;  %3053 = vmatprep.subr.bf16.mxu1 %v8694_v51  ;;  %v8781_v50 = vld [vmem:[#allocation2 + $0x264] ss:$48 sps:$4 sm:$0xff]   ;;  %v8784_v51 = vld [vmem:[#allocation2 + $0x26c] ss:$48 sps:$4 sm:$0xff]  }
 0x2a2   :  { %2972 = vmatpush1.bf16.msra.mxu0 %v8689_v52  ;;  %3054 = vmatpush1.bf16.msra.mxu1 %v8692_v53  ;;  %v8779_v52 = vld [vmem:[#allocation2 + $0x260] ss:$48 sps:$4 sm:$0xff]   ;;  %v8782_v53 = vld [vmem:[#allocation2 + $0x268] ss:$48 sps:$4 sm:$0xff]  }
 0x2a3   :  { %2973 = vmatprep.subr.bf16.mxu0 %v8697_v54  ;;  %3055 = vmatprep.subr.bf16.mxu1 %v8700_v55  ;;  %v8787_v54 = vld [vmem:[#allocation2 + $0x2c4] ss:$48 sps:$4 sm:$0xff]   ;;  %v8790_v55 = vld [vmem:[#allocation2 + $0x2cc] ss:$48 sps:$4 sm:$0xff]  }
 0x2a6   :  { %2974 = vmatpush1.bf16.msra.mxu0 %v8695_v56  ;;  %3056 = vmatpush1.bf16.msra.mxu1 %v8698_v57  ;;  %v8785_v56 = vld [vmem:[#allocation2 + $0x2c0] ss:$48 sps:$4 sm:$0xff]   ;;  %v8788_v57 = vld [vmem:[#allocation2 + $0x2c8] ss:$48 sps:$4 sm:$0xff]  }
 0x2a7   :  { %2975 = vmatprep.subr.bf16.mxu0 %v8703_v59  ;;  %3057 = vmatprep.subr.bf16.mxu1 %v8706_v60  ;;  %v8793_v59 = vld [vmem:[#allocation2 + $0x324] ss:$48 sps:$4 sm:$0xff]   ;;  %v8796_v60 = vld [vmem:[#allocation2 + $0x32c] ss:$48 sps:$4 sm:$0xff]  }
 0x2aa   :  { %2976 = vmatpush1.bf16.msra.mxu0 %v8701_v61  ;;  %3058 = vmatpush1.bf16.msra.mxu1 %v8704_v62  ;;  %v8791_v61 = vld [vmem:[#allocation2 + $0x320] ss:$48 sps:$4 sm:$0xff]   ;;  %v8794_v62 = vld [vmem:[#allocation2 + $0x328] ss:$48 sps:$4 sm:$0xff]  }
 0x2ab   :  { %2977 = vmatprep.subr.bf16.mxu0 %v8709_v63  ;;  %3059 = vmatprep.subr.bf16.mxu1 %v8712_v0  ;;  %v8799_v63 = vld [vmem:[#allocation2 + $0x384] ss:$48 sps:$4 sm:$0xff]   ;;  %v8802_v0 = vld [vmem:[#allocation2 + $0x38c] ss:$48 sps:$4 sm:$0xff]  }
 0x2ae   :  { %2978 = vmatpush1.bf16.msra.mxu0 %v8707_v1  ;;  %3060 = vmatpush1.bf16.msra.mxu1 %v8710_v2  ;;  %v8797_v1 = vld [vmem:[#allocation2 + $0x380] ss:$48 sps:$4 sm:$0xff]   ;;  %v8800_v2 = vld [vmem:[#allocation2 + $0x388] ss:$48 sps:$4 sm:$0xff]  }
 0x2af   :  { %2979 = vmatprep.subr.bf16.mxu0 %v8715_v3  ;;  %3061 = vmatprep.subr.bf16.mxu1 %v8718_v4  ;;  %v8805_v3 = vld [vmem:[#allocation2 + $0x3e4] ss:$48 sps:$4 sm:$0xff]   ;;  %v8808_v4 = vld [vmem:[#allocation2 + $0x3ec] ss:$48 sps:$4 sm:$0xff]  }
 0x2b2   :  { %2980 = vmatpush1.bf16.msra.mxu0 %v8713_v5  ;;  %3062 = vmatpush1.bf16.msra.mxu1 %v8716_v6  ;;  %v8803_v5 = vld [vmem:[#allocation2 + $0x3e0] ss:$48 sps:$4 sm:$0xff]   ;;  %v8806_v6 = vld [vmem:[#allocation2 + $0x3e8] ss:$48 sps:$4 sm:$0xff]  }
 0x2b3   :  { %2981 = vmatprep.subr.bf16.mxu0 %v8721_v7  ;;  %3063 = vmatprep.subr.bf16.mxu1 %v8724_v8  ;;  %v8811_v7 = vld [vmem:[#allocation2 + $0x444] ss:$48 sps:$4 sm:$0xff]   ;;  %v8814_v8 = vld [vmem:[#allocation2 + $0x44c] ss:$48 sps:$4 sm:$0xff]  }
 0x2b6   :  { %2982 = vmatpush1.bf16.msra.mxu0 %v8719_v9  ;;  %3064 = vmatpush1.bf16.msra.mxu1 %v8722_v10  ;;  %v8809_v9 = vld [vmem:[#allocation2 + $0x440] ss:$48 sps:$4 sm:$0xff]   ;;  %v8812_v10 = vld [vmem:[#allocation2 + $0x448] ss:$48 sps:$4 sm:$0xff]  }
 0x2b7   :  { %2983 = vmatprep.subr.bf16.mxu0 %v8727_v11  ;;  %3065 = vmatprep.subr.bf16.mxu1 %v8730_v13  ;;  %v8817_v11 = vld [vmem:[#allocation2 + $0x4a4] ss:$48 sps:$4 sm:$0xff]   ;;  %v8820_v13 = vld [vmem:[#allocation2 + $0x4ac] ss:$48 sps:$4 sm:$0xff]  }
 0x2ba   :  { %2984 = vmatpush1.bf16.msra.mxu0 %v8725_v14  ;;  %3066 = vmatpush1.bf16.msra.mxu1 %v8728_v15  ;;  %v8815_v14 = vld [vmem:[#allocation2 + $0x4a0] ss:$48 sps:$4 sm:$0xff]   ;;  %v8818_v15 = vld [vmem:[#allocation2 + $0x4a8] ss:$48 sps:$4 sm:$0xff]  }
 0x2bb   :  { %2985 = vmatprep.subr.bf16.mxu0 %v8733_v18  ;;  %3067 = vmatprep.subr.bf16.mxu1 %v8736_v19  ;;  %v8823_v18 = vld [vmem:[#allocation2 + $0x504] ss:$48 sps:$4 sm:$0xff]   ;;  %v8826_v19 = vld [vmem:[#allocation2 + $0x50c] ss:$48 sps:$4 sm:$0xff]  }
 0x2be   :  { %2986 = vmatpush1.bf16.msra.mxu0 %v8731_v20  ;;  %3068 = vmatpush1.bf16.msra.mxu1 %v8734_v21  ;;  %v8821_v20 = vld [vmem:[#allocation2 + $0x500] ss:$48 sps:$4 sm:$0xff]   ;;  %v8824_v21 = vld [vmem:[#allocation2 + $0x508] ss:$48 sps:$4 sm:$0xff]  }
 0x2bf   :  { %2987 = vmatprep.subr.bf16.mxu0 %v8739_v22  ;;  %3069 = vmatprep.subr.bf16.mxu1 %v8742_v23  ;;  %v8829_v22 = vld [vmem:[#allocation2 + $0x564] ss:$48 sps:$4 sm:$0xff]   ;;  %v8832_v23 = vld [vmem:[#allocation2 + $0x56c] ss:$48 sps:$4 sm:$0xff]  }
 0x2c2   :  { %2988 = vmatpush1.bf16.msra.mxu0 %v8737_v24  ;;  %3070 = vmatpush1.bf16.msra.mxu1 %v8740_v25  ;;  %v8827_v24 = vld [vmem:[#allocation2 + $0x560] ss:$48 sps:$4 sm:$0xff]   ;;  %v8830_v25 = vld [vmem:[#allocation2 + $0x568] ss:$48 sps:$4 sm:$0xff]  }
 0x2c3   :  { %3080 = vmatprep.subr.bf16.mxu0 %v8745_v26  ;;  %3162 = vmatprep.subr.bf16.mxu1 %v8748_v27  ;;  %v8835_v26 = vld [vmem:[#allocation2 + $0x5c4] ss:$48 sps:$4 sm:$0xff]   ;;  %v8838_v27 = vld [vmem:[#allocation2 + $0x5cc] ss:$48 sps:$4 sm:$0xff]  }
 0x2c5   :  { %2990 = vmatmul.mubr.bf16.vlgmr.msra.gmra.mrb[4].mxu0 %v10573_v17  ;;  %3072 = vmatmul.mubr.bf16.vlgmr.msra.gmra.mrb[4].mxu1 %v10573_v17 }
 0x2c6   :  { %3081 = vmatpush1.bf16.msra.mxu0 %v8743_v28  ;;  %3163 = vmatpush1.bf16.msra.mxu1 %v8746_v29  ;;  %v8833_v28 = vld [vmem:[#allocation2 + $0x5c0] ss:$48 sps:$4 sm:$0xff]   ;;  %v8836_v29 = vld [vmem:[#allocation2 + $0x5c8] ss:$48 sps:$4 sm:$0xff]  }
 0x2c7   :  { %3082 = vmatprep.subr.bf16.mxu0 %v8751_v30  ;;  %3164 = vmatprep.subr.bf16.mxu1 %v8754_v31  ;;  %v8841_v30 = vld [vmem:[#allocation2 + $0x624] ss:$48 sps:$4 sm:$0xff]   ;;  %v8844_v31 = vld [vmem:[#allocation2 + $0x62c] ss:$48 sps:$4 sm:$0xff]  }
 0x2c8   :  { %3112 = vmatprep.mubr.bf16.mxu0 %v10557_v58  ;;  %3194 = vmatprep.mubr.bf16.mxu1 %v10557_v58  ;;  %v8773_v58 = vld [vmem:[#allocation2 + $0x200] ss:$48 sps:$4 sm:$0xff]  }
 0x2ca   :  { %3083 = vmatpush1.bf16.msra.mxu0 %v8749_v32  ;;  %3165 = vmatpush1.bf16.msra.mxu1 %v8752_v33  ;;  %v8839_v32 = vld [vmem:[#allocation2 + $0x620] ss:$48 sps:$4 sm:$0xff]   ;;  %v8842_v33 = vld [vmem:[#allocation2 + $0x628] ss:$48 sps:$4 sm:$0xff]  }
 0x2cb   :  { %3084 = vmatprep.subr.bf16.mxu0 %v8757_v34  ;;  %3166 = vmatprep.subr.bf16.mxu1 %v8760_v35  ;;  %v8847_v34 = vld [vmem:[#allocation2 + $0x684] ss:$48 sps:$4 sm:$0xff]   ;;  %v8850_v35 = vld [vmem:[#allocation2 + $0x68c] ss:$48 sps:$4 sm:$0xff]  }
 0x2ce   :  { %3085 = vmatpush1.bf16.msra.mxu0 %v8755_v36  ;;  %3167 = vmatpush1.bf16.msra.mxu1 %v8758_v37  ;;  %v8845_v36 = vld [vmem:[#allocation2 + $0x680] ss:$48 sps:$4 sm:$0xff]   ;;  %v8848_v37 = vld [vmem:[#allocation2 + $0x688] ss:$48 sps:$4 sm:$0xff]  }
 0x2cf   :  { %3086 = vmatprep.subr.bf16.mxu0 %v8763_v38  ;;  %3168 = vmatprep.subr.bf16.mxu1 %v8766_v39  ;;  %v8853_v38 = vld [vmem:[#allocation2 + $0x6e4] ss:$48 sps:$4 sm:$0xff]   ;;  %v8856_v39 = vld [vmem:[#allocation2 + $0x6ec] ss:$48 sps:$4 sm:$0xff]  }
 0x2d2   :  { %3087 = vmatpush1.bf16.msra.mxu0 %v8761_v40  ;;  %3169 = vmatpush1.bf16.msra.mxu1 %v8764_v41  ;;  %v8851_v40 = vld [vmem:[#allocation2 + $0x6e0] ss:$48 sps:$4 sm:$0xff]   ;;  %v8854_v41 = vld [vmem:[#allocation2 + $0x6e8] ss:$48 sps:$4 sm:$0xff]  }
 0x2d3   :  { %3088 = vmatprep.subr.bf16.mxu0 %v8769_v42  ;;  %3170 = vmatprep.subr.bf16.mxu1 %v8772_v43  ;;  %v8859_v42 = vld [vmem:[#allocation2 + $0x744] ss:$48 sps:$4 sm:$0xff]   ;;  %v8862_v43 = vld [vmem:[#allocation2 + $0x74c] ss:$48 sps:$4 sm:$0xff]  }
 0x2d6   :  { %3089 = vmatpush1.bf16.msra.mxu0 %v8767_v44  ;;  %3171 = vmatpush1.bf16.msra.mxu1 %v8770_v46  ;;  %v8857_v44 = vld [vmem:[#allocation2 + $0x740] ss:$48 sps:$4 sm:$0xff]   ;;  %v8865_v46 = vld [vmem:[#allocation2 + $0x7a4] ss:$48 sps:$4 sm:$0xff]  }
 0x2d7   :  { %3090 = vmatprep.subr.bf16.mxu0 %v8775_v47  ;;  %3172 = vmatprep.subr.bf16.mxu1 %v8778_v48  ;;  %v8868_v47 = vld [vmem:[#allocation2 + $0x7ac] ss:$48 sps:$4 sm:$0xff]   ;;  %v8863_v48 = vld [vmem:[#allocation2 + $0x7a0] ss:$48 sps:$4 sm:$0xff]  }
 0x2da   :  { %3091 = vmatpush1.bf16.msra.mxu0 %v8773_v58  ;;  %3173 = vmatpush1.bf16.msra.mxu1 %v8776_v49  ;;  %v8866_v58 = vld [vmem:[#allocation2 + $0x7a8] ss:$48 sps:$4 sm:$0xff]   ;;  %v10591_v49 = vld [vmem:[#allocation5] sm:$0xff] }
 0x2db   :  { %3092 = vmatprep.subr.bf16.mxu0 %v8781_v50  ;;  %3174 = vmatprep.subr.bf16.mxu1 %v8784_v51  ;;  %v8871_v50 = vld [vmem:[#allocation2 + $0x804] ss:$48 sps:$4 sm:$0xff]   ;;  %v8874_v51 = vld [vmem:[#allocation2 + $0x80c] ss:$48 sps:$4 sm:$0xff]  }
 0x2de   :  { %3093 = vmatpush1.bf16.msra.mxu0 %v8779_v52  ;;  %3175 = vmatpush1.bf16.msra.mxu1 %v8782_v53  ;;  %v10597_v52 = vsub.s32 3, %v10551_v45  ;;  %v8869_v53 = vld [vmem:[#allocation2 + $0x800] ss:$48 sps:$4 sm:$0xff]  }
 0x2df   :  { %3094 = vmatprep.subr.bf16.mxu0 %v8787_v54  ;;  %3176 = vmatprep.subr.bf16.mxu1 %v8790_v55  ;;  %v8872_v54 = vld [vmem:[#allocation2 + $0x808] ss:$48 sps:$4 sm:$0xff]  }
 0x2e2   :  { %3095 = vmatpush1.bf16.msra.mxu0 %v8785_v56  ;;  %3177 = vmatpush1.bf16.msra.mxu1 %v8788_v57  ;;  %v8877_v56 = vld [vmem:[#allocation2 + $0x864] ss:$48 sps:$4 sm:$0xff]   ;;  %v8880_v57 = vld [vmem:[#allocation2 + $0x86c] ss:$48 sps:$4 sm:$0xff]  }
 0x2e3   :  { %3096 = vmatprep.subr.bf16.mxu0 %v8793_v59  ;;  %3178 = vmatprep.subr.bf16.mxu1 %v8796_v60  ;;  %v758_v59 = vrot.slane %v10591_v49, %v10597_v52 }
 0x2e6   :  { %3097 = vmatpush1.bf16.msra.mxu0 %v8791_v61  ;;  %3179 = vmatpush1.bf16.msra.mxu1 %v8794_v62  ;;  %v8875_v62 = vld [vmem:[#allocation2 + $0x860] ss:$48 sps:$4 sm:$0xff]  }
 0x2e7   :  { %3098 = vmatprep.subr.bf16.mxu0 %v8799_v63  ;;  %3180 = vmatprep.subr.bf16.mxu1 %v8802_v0  ;;  %v8878_v63 = vld [vmem:[#allocation2 + $0x868] ss:$48 sps:$4 sm:$0xff]  }
 0x2ea   :  { %3099 = vmatpush1.bf16.msra.mxu0 %v8797_v1  ;;  %3181 = vmatpush1.bf16.msra.mxu1 %v8800_v2 }
 0x2eb   :  { %3100 = vmatprep.subr.bf16.mxu0 %v8805_v3  ;;  %3182 = vmatprep.subr.bf16.mxu1 %v8808_v4  ;;  %v8883_v3 = vld [vmem:[#allocation2 + $0x8c4] ss:$48 sps:$4 sm:$0xff]   ;;  %v8886_v4 = vld [vmem:[#allocation2 + $0x8cc] ss:$48 sps:$4 sm:$0xff]  }
 0x2ee   :  { %3101 = vmatpush1.bf16.msra.mxu0 %v8803_v5  ;;  %3183 = vmatpush1.bf16.msra.mxu1 %v8806_v6 }
 0x2ef   :  { %3102 = vmatprep.subr.bf16.mxu0 %v8811_v7  ;;  %3184 = vmatprep.subr.bf16.mxu1 %v8814_v8 }
 0x2f2   :  { %3103 = vmatpush1.bf16.msra.mxu0 %v8809_v9  ;;  %3185 = vmatpush1.bf16.msra.mxu1 %v8812_v10 }
 0x2f3   :  { %3104 = vmatprep.subr.bf16.mxu0 %v8817_v11  ;;  %3186 = vmatprep.subr.bf16.mxu1 %v8820_v13 }
 0x2f6   :  { %3105 = vmatpush1.bf16.msra.mxu0 %v8815_v14  ;;  %3187 = vmatpush1.bf16.msra.mxu1 %v8818_v15  ;;  %v8881_v14 = vld [vmem:[#allocation2 + $0x8c0] ss:$48 sps:$4 sm:$0xff]   ;;  %v8884_v15 = vld [vmem:[#allocation2 + $0x8c8] ss:$48 sps:$4 sm:$0xff]  }
 0x2f7   :  { %3106 = vmatprep.subr.bf16.mxu0 %v8823_v18  ;;  %3188 = vmatprep.subr.bf16.mxu1 %v8826_v19  ;;  %v8889_v18 = vld [vmem:[#allocation2 + $0x924] ss:$48 sps:$4 sm:$0xff]   ;;  %v8892_v19 = vld [vmem:[#allocation2 + $0x92c] ss:$48 sps:$4 sm:$0xff]  }
 0x2fa   :  { %3107 = vmatpush1.bf16.msra.mxu0 %v8821_v20  ;;  %3189 = vmatpush1.bf16.msra.mxu1 %v8824_v21  ;;  %v8887_v20 = vld [vmem:[#allocation2 + $0x920] ss:$48 sps:$4 sm:$0xff]   ;;  %v8890_v21 = vld [vmem:[#allocation2 + $0x928] ss:$48 sps:$4 sm:$0xff]  }
 0x2fb   :  { %3108 = vmatprep.subr.bf16.mxu0 %v8829_v22  ;;  %3190 = vmatprep.subr.bf16.mxu1 %v8832_v23  ;;  %v8895_v22 = vld [vmem:[#allocation2 + $0x984] ss:$48 sps:$4 sm:$0xff]   ;;  %v8898_v23 = vld [vmem:[#allocation2 + $0x98c] ss:$48 sps:$4 sm:$0xff]  }
 0x2fe   :  { %3109 = vmatpush1.bf16.msra.mxu0 %v8827_v24  ;;  %3191 = vmatpush1.bf16.msra.mxu1 %v8830_v25  ;;  %v8893_v24 = vld [vmem:[#allocation2 + $0x980] ss:$48 sps:$4 sm:$0xff]   ;;  %v8896_v25 = vld [vmem:[#allocation2 + $0x988] ss:$48 sps:$4 sm:$0xff]  }
 0x2ff   :  { %3110 = vmatprep.subr.bf16.mxu0 %v8835_v26  ;;  %3192 = vmatprep.subr.bf16.mxu1 %v8838_v27  ;;  %v8901_v26 = vld [vmem:[#allocation2 + $0x9e4] ss:$48 sps:$4 sm:$0xff]   ;;  %v8904_v27 = vld [vmem:[#allocation2 + $0x9ec] ss:$48 sps:$4 sm:$0xff]  }
 0x302   :  { %3111 = vmatpush1.bf16.msra.mxu0 %v8833_v28  ;;  %3193 = vmatpush1.bf16.msra.mxu1 %v8836_v29  ;;  %v8899_v28 = vld [vmem:[#allocation2 + $0x9e0] ss:$48 sps:$4 sm:$0xff]   ;;  %v8902_v29 = vld [vmem:[#allocation2 + $0x9e8] ss:$48 sps:$4 sm:$0xff]  }
 0x303   :  { %3121 = vmatprep.subr.bf16.mxu0 %v8841_v30  ;;  %3203 = vmatprep.subr.bf16.mxu1 %v8844_v31  ;;  %v8907_v30 = vld [vmem:[#allocation2 + $0xa44] ss:$48 sps:$4 sm:$0xff]   ;;  %v8910_v31 = vld [vmem:[#allocation2 + $0xa4c] ss:$48 sps:$4 sm:$0xff]  }
 0x305   :  { %3113 = vmatmul.mubr.bf16.vlgmr.msra.gmra.mrb[8].mxu0 %v10561_v12  ;;  %3195 = vmatmul.mubr.bf16.vlgmr.msra.gmra.mrb[8].mxu1 %v10561_v12  ;;  %v8860_v12 = vld [vmem:[#allocation2 + $0x748] ss:$48 sps:$4 sm:$0xff]  }
 0x306   :  { %3122 = vmatpush1.bf16.msra.mxu0 %v8839_v32  ;;  %3204 = vmatpush1.bf16.msra.mxu1 %v8842_v33  ;;  %v8905_v32 = vld [vmem:[#allocation2 + $0xa40] ss:$48 sps:$4 sm:$0xff]   ;;  %v8908_v33 = vld [vmem:[#allocation2 + $0xa48] ss:$48 sps:$4 sm:$0xff]  }
 0x307   :  { %3123 = vmatprep.subr.bf16.mxu0 %v8847_v34  ;;  %3205 = vmatprep.subr.bf16.mxu1 %v8850_v35  ;;  %v8913_v34 = vld [vmem:[#allocation2 + $0xaa4] ss:$48 sps:$4 sm:$0xff]   ;;  %v8916_v35 = vld [vmem:[#allocation2 + $0xaac] ss:$48 sps:$4 sm:$0xff]  }
 0x308   :  { %3153 = vmatprep.mubr.bf16.mxu0 %v10565_v16  ;;  %3235 = vmatprep.mubr.bf16.mxu1 %v10565_v16  ;;  %v10594_v16 = vsub.s32 0, %v10551_v45 }
 0x30a   :  { %3124 = vmatpush1.bf16.msra.mxu0 %v8845_v36  ;;  %3206 = vmatpush1.bf16.msra.mxu1 %v8848_v37  ;;  %v746_v55 = vrot.slane %v10591_v49, %v10594_v16  ;;  %v8911_v36 = vld [vmem:[#allocation2 + $0xaa0] ss:$48 sps:$4 sm:$0xff]   ;;  %v8914_v37 = vld [vmem:[#allocation2 + $0xaa8] ss:$48 sps:$4 sm:$0xff]  }
 0x30b   :  { %3125 = vmatprep.subr.bf16.mxu0 %v8853_v38  ;;  %3207 = vmatprep.subr.bf16.mxu1 %v8856_v39  ;;  %v8919_v38 = vld [vmem:[#allocation2 + $0xb04] ss:$48 sps:$4 sm:$0xff]   ;;  %v8922_v39 = vld [vmem:[#allocation2 + $0xb0c] ss:$48 sps:$4 sm:$0xff]  }
 0x30e   :  { %3126 = vmatpush1.bf16.msra.mxu0 %v8851_v40  ;;  %3208 = vmatpush1.bf16.msra.mxu1 %v8854_v41  ;;  %v8917_v40 = vld [vmem:[#allocation2 + $0xb00] ss:$48 sps:$4 sm:$0xff]   ;;  %v8920_v41 = vld [vmem:[#allocation2 + $0xb08] ss:$48 sps:$4 sm:$0xff]  }
 0x30f   :  { %3127 = vmatprep.subr.bf16.mxu0 %v8859_v42  ;;  %3209 = vmatprep.subr.bf16.mxu1 %v8862_v43  ;;  %v8925_v42 = vld [vmem:[#allocation2 + $0xb64] ss:$48 sps:$4 sm:$0xff]   ;;  %v8928_v43 = vld [vmem:[#allocation2 + $0xb6c] ss:$48 sps:$4 sm:$0xff]  }
 0x312   :  { %3128 = vmatpush1.bf16.msra.mxu0 %v8857_v44  ;;  %3210 = vmatpush1.bf16.msra.mxu1 %v8860_v12  ;;  %v8923_v44 = vld [vmem:[#allocation2 + $0xb60] ss:$48 sps:$4 sm:$0xff]   ;;  %v8926_v12 = vld [vmem:[#allocation2 + $0xb68] ss:$48 sps:$4 sm:$0xff]  }
 0x313   :  { %3129 = vmatprep.subr.bf16.mxu0 %v8865_v46  ;;  %3211 = vmatprep.subr.bf16.mxu1 %v8868_v47  ;;  %v8931_v46 = vld [vmem:[#allocation2 + $0xbc4] ss:$48 sps:$4 sm:$0xff]   ;;  %v8934_v47 = vld [vmem:[#allocation2 + $0xbcc] ss:$48 sps:$4 sm:$0xff]  }
 0x316   :  { %3130 = vmatpush1.bf16.msra.mxu0 %v8863_v48  ;;  %3212 = vmatpush1.bf16.msra.mxu1 %v8866_v58  ;;  %v8929_v48 = vld [vmem:[#allocation2 + $0xbc0] ss:$48 sps:$4 sm:$0xff]   ;;  %v8932_v58 = vld [vmem:[#allocation2 + $0xbc8] ss:$48 sps:$4 sm:$0xff]  }
 0x317   :  { %3131 = vmatprep.subr.bf16.mxu0 %v8871_v50  ;;  %3213 = vmatprep.subr.bf16.mxu1 %v8874_v51  ;;  %v8937_v50 = vld [vmem:[#allocation7 + $0x4] ss:$16 sps:$4 sm:$0xff]   ;;  %v8940_v51 = vld [vmem:[#allocation7 + $0xc] ss:$16 sps:$4 sm:$0xff]  }
 0x318   :  { %v2827_v60 = vpop.f32.mrb[0].mxu0  ;;  %v10603_v61 = vpop.f32.mrb[0].mxu1 }
 0x319   :  { %v8255_v0 = vadd.f32 %v2827_v60, %v746_v55  ;;  %v10605_v1 = vpop.f32.mrb[1].mxu0  ;;  %v2911_v2 = vpop.f32.mrb[1].mxu1  ;;  %v8943_v55 = vld [vmem:[#allocation7 + $0x24] ss:$16 sps:$4 sm:$0xff]  }
 0x31a   :  { %v8258_v5 = vadd.f32 %v2911_v2, %v758_v59  ;;  %v2831_v6 = vpop.f32.mrb[2].mxu0  ;;  %v2913_v7 = vpop.f32.mrb[2].mxu1  ;;  %3132 = vmatpush1.bf16.msra.mxu0 %v8869_v53  ;;  %3214 = vmatpush1.bf16.msra.mxu1 %v8872_v54  ;;  %v8935_v53 = vld [vmem:[#allocation7] ss:$16 sps:$4 sm:$0xff]   ;;  %v8938_v54 = vld [vmem:[#allocation7 + $0x8] ss:$16 sps:$4 sm:$0xff]  }
 0x31b   :  { %v3244_v8 = vmax.f32 %v8255_v0, 0.0  ;;  %v2832_v9 = vpop.f32.mrb[3].mxu0  ;;  %v2914_v10 = vpop.f32.mrb[3].mxu1  ;;  %3133 = vmatprep.subr.bf16.mxu0 %v8877_v56  ;;  %3215 = vmatprep.subr.bf16.mxu1 %v8880_v57  ;;  %v8946_v56 = vld [vmem:[#allocation7 + $0x2c] ss:$16 sps:$4 sm:$0xff]  }
 0x31c   :  { %v3247_v11 = vmax.f32 %v8258_v5, 0.0  ;;  %v8941_v57 = vld [vmem:[#allocation7 + $0x20] ss:$16 sps:$4 sm:$0xff]   ;;  %v8944_v59 = vld [vmem:[#allocation7 + $0x28] ss:$16 sps:$4 sm:$0xff]  }
 0x31d   :  { %v8949_v60 = vld [vmem:[#allocation7 + $0x44] ss:$16 sps:$4 sm:$0xff]   ;;  %v8950_v0 = vld [vmem:[#allocation7 + $0x48] ss:$16 sps:$4 sm:$0xff]   ;;  %v8964_v7 = vld [vmem:[#allocation7 + $0x8c] ss:$16 sps:$4 sm:$0xff]  }
 0x31e   :  { %v10607_v13 = vmax.f32 %v3244_v8, %v3247_v11  ;;  %3134 = vmatpush1.bf16.msra.mxu0 %v8875_v62  ;;  %3216 = vmatpush1.bf16.msra.mxu1 %v8878_v63  ;;  %v8952_v62 = vld [vmem:[#allocation7 + $0x4c] ss:$16 sps:$4 sm:$0xff]   ;;  %v8947_v63 = vld [vmem:[#allocation7 + $0x40] ss:$16 sps:$4 sm:$0xff]   ;;  %v8955_v2 = vld [vmem:[#allocation7 + $0x64] ss:$16 sps:$4 sm:$0xff]  }
 0x31f   :  { %3135 = vmatprep.subr.bf16.mxu0 %v8883_v3  ;;  %3217 = vmatprep.subr.bf16.mxu1 %v8886_v4  ;;  %v8958_v3 = vld [vmem:[#allocation7 + $0x6c] ss:$16 sps:$4 sm:$0xff]   ;;  %v8953_v4 = vld [vmem:[#allocation7 + $0x60] ss:$16 sps:$4 sm:$0xff]   ;;  %v8956_v5 = vld [vmem:[#allocation7 + $0x68] ss:$16 sps:$4 sm:$0xff]  }
 0x320   :  { %v8961_v6 = vld [vmem:[#allocation7 + $0x84] ss:$16 sps:$4 sm:$0xff]   ;;  %v8962_v8 = vld [vmem:[#allocation7 + $0x88] ss:$16 sps:$4 sm:$0xff]   ;;  %v8970_v10 = vld [vmem:[#allocation7 + $0xac] ss:$16 sps:$4 sm:$0xff]  }
 0x321   :  { %v8967_v9 = vld [vmem:[#allocation7 + $0xa4] ss:$16 sps:$4 sm:$0xff]   ;;  %v8965_v11 = vld [vmem:[#allocation7 + $0xa0] ss:$16 sps:$4 sm:$0xff]  }
 0x322   :  { %3136 = vmatpush1.bf16.msra.mxu0 %v8881_v14  ;;  %3218 = vmatpush1.bf16.msra.mxu1 %v8884_v15  ;;  %v8968_v14 = vld [vmem:[#allocation7 + $0xa8] ss:$16 sps:$4 sm:$0xff]   ;;  %v8973_v15 = vld [vmem:[#allocation7 + $0xc4] ss:$16 sps:$4 sm:$0xff]  }
 0x323   :  { %3137 = vmatprep.subr.bf16.mxu0 %v8889_v18  ;;  %3219 = vmatprep.subr.bf16.mxu1 %v8892_v19  ;;  %v8976_v18 = vld [vmem:[#allocation7 + $0xcc] ss:$16 sps:$4 sm:$0xff]   ;;  %v8971_v19 = vld [vmem:[#allocation7 + $0xc0] ss:$16 sps:$4 sm:$0xff]  }
 0x326   :  { %3138 = vmatpush1.bf16.msra.mxu0 %v8887_v20  ;;  %3220 = vmatpush1.bf16.msra.mxu1 %v8890_v21  ;;  %v8974_v20 = vld [vmem:[#allocation7 + $0xc8] ss:$16 sps:$4 sm:$0xff]   ;;  %v8979_v21 = vld [vmem:[#allocation7 + $0xe4] ss:$16 sps:$4 sm:$0xff]  }
 0x327   :  { %3139 = vmatprep.subr.bf16.mxu0 %v8895_v22  ;;  %3221 = vmatprep.subr.bf16.mxu1 %v8898_v23  ;;  %v8982_v22 = vld [vmem:[#allocation7 + $0xec] ss:$16 sps:$4 sm:$0xff]   ;;  %v8977_v23 = vld [vmem:[#allocation7 + $0xe0] ss:$16 sps:$4 sm:$0xff]  }
 0x32a   :  { %3140 = vmatpush1.bf16.msra.mxu0 %v8893_v24  ;;  %3222 = vmatpush1.bf16.msra.mxu1 %v8896_v25  ;;  %v8980_v24 = vld [vmem:[#allocation7 + $0xe8] ss:$16 sps:$4 sm:$0xff]   ;;  %v8985_v25 = vld [vmem:[#allocation7 + $0x104] ss:$16 sps:$4 sm:$0xff]  }
 0x32b   :  { %3141 = vmatprep.subr.bf16.mxu0 %v8901_v26  ;;  %3223 = vmatprep.subr.bf16.mxu1 %v8904_v27  ;;  %v8988_v26 = vld [vmem:[#allocation7 + $0x10c] ss:$16 sps:$4 sm:$0xff]   ;;  %v8983_v27 = vld [vmem:[#allocation7 + $0x100] ss:$16 sps:$4 sm:$0xff]  }
 0x32e   :  { %3142 = vmatpush1.bf16.msra.mxu0 %v8899_v28  ;;  %3224 = vmatpush1.bf16.msra.mxu1 %v8902_v29  ;;  %v8986_v28 = vld [vmem:[#allocation7 + $0x108] ss:$16 sps:$4 sm:$0xff]   ;;  %v8991_v29 = vld [vmem:[#allocation7 + $0x124] ss:$16 sps:$4 sm:$0xff]  }
 0x32f   :  { %3143 = vmatprep.subr.bf16.mxu0 %v8907_v30  ;;  %3225 = vmatprep.subr.bf16.mxu1 %v8910_v31  ;;  %v8994_v30 = vld [vmem:[#allocation7 + $0x12c] ss:$16 sps:$4 sm:$0xff]   ;;  %v8989_v31 = vld [vmem:[#allocation7 + $0x120] ss:$16 sps:$4 sm:$0xff]  }
 0x332   :  { %3144 = vmatpush1.bf16.msra.mxu0 %v8905_v32  ;;  %3226 = vmatpush1.bf16.msra.mxu1 %v8908_v33  ;;  %v8992_v32 = vld [vmem:[#allocation7 + $0x128] ss:$16 sps:$4 sm:$0xff]   ;;  %v8997_v33 = vld [vmem:[#allocation7 + $0x144] ss:$16 sps:$4 sm:$0xff]  }
 0x333   :  { %3145 = vmatprep.subr.bf16.mxu0 %v8913_v34  ;;  %3227 = vmatprep.subr.bf16.mxu1 %v8916_v35  ;;  %v9000_v34 = vld [vmem:[#allocation7 + $0x14c] ss:$16 sps:$4 sm:$0xff]   ;;  %v8995_v35 = vld [vmem:[#allocation7 + $0x140] ss:$16 sps:$4 sm:$0xff]  }
 0x336   :  { %3146 = vmatpush1.bf16.msra.mxu0 %v8911_v36  ;;  %3228 = vmatpush1.bf16.msra.mxu1 %v8914_v37  ;;  %v8998_v36 = vld [vmem:[#allocation7 + $0x148] ss:$16 sps:$4 sm:$0xff]   ;;  %v9003_v37 = vld [vmem:[#allocation7 + $0x164] ss:$16 sps:$4 sm:$0xff]  }
 0x337   :  { %3147 = vmatprep.subr.bf16.mxu0 %v8919_v38  ;;  %3229 = vmatprep.subr.bf16.mxu1 %v8922_v39  ;;  %v9006_v38 = vld [vmem:[#allocation7 + $0x16c] ss:$16 sps:$4 sm:$0xff]   ;;  %v9001_v39 = vld [vmem:[#allocation7 + $0x160] ss:$16 sps:$4 sm:$0xff]  }
 0x33a   :  { %3148 = vmatpush1.bf16.msra.mxu0 %v8917_v40  ;;  %3230 = vmatpush1.bf16.msra.mxu1 %v8920_v41  ;;  %v9004_v40 = vld [vmem:[#allocation7 + $0x168] ss:$16 sps:$4 sm:$0xff]   ;;  %v9009_v41 = vld [vmem:[#allocation7 + $0x184] ss:$16 sps:$4 sm:$0xff]  }
 0x33b   :  { %3149 = vmatprep.subr.bf16.mxu0 %v8925_v42  ;;  %3231 = vmatprep.subr.bf16.mxu1 %v8928_v43  ;;  %v9012_v42 = vld [vmem:[#allocation7 + $0x18c] ss:$16 sps:$4 sm:$0xff]   ;;  %v9007_v43 = vld [vmem:[#allocation7 + $0x180] ss:$16 sps:$4 sm:$0xff]  }
 0x33e   :  { %3150 = vmatpush1.bf16.msra.mxu0 %v8923_v44  ;;  %3232 = vmatpush1.bf16.msra.mxu1 %v8926_v12  ;;  %v9010_v44 = vld [vmem:[#allocation7 + $0x188] ss:$16 sps:$4 sm:$0xff]   ;;  %v9015_v12 = vld [vmem:[#allocation7 + $0x1a4] ss:$16 sps:$4 sm:$0xff]  }
 0x33f   :  { %3151 = vmatprep.subr.bf16.mxu0 %v8931_v46  ;;  %3233 = vmatprep.subr.bf16.mxu1 %v8934_v47  ;;  %v9018_v46 = vld [vmem:[#allocation7 + $0x1ac] ss:$16 sps:$4 sm:$0xff]   ;;  %v9013_v47 = vld [vmem:[#allocation7 + $0x1a0] ss:$16 sps:$4 sm:$0xff]  }
 0x342   :  { %3152 = vmatpush1.bf16.msra.mxu0 %v8929_v48  ;;  %3234 = vmatpush1.bf16.msra.mxu1 %v8932_v58  ;;  %v9016_v48 = vld [vmem:[#allocation7 + $0x1a8] ss:$16 sps:$4 sm:$0xff]   ;;  %v10612_v58 = vsub.s32 1, %v10551_v45 }
 0x343   :  { %3866 = vmatprep.subr.bf16.mxu0 %v8937_v50  ;;  %3948 = vmatprep.subr.bf16.mxu1 %v8940_v51  ;;  %v10615_v50 = vsub.s32 2, %v10551_v45  ;;  %v761_v51 = vsub.s32 4, %v10551_v45 }
 0x345   :  { %3154 = vmatmul.mubr.bf16.vlgmr.msra.gmra.mrb[8].mxu0 %v10573_v17  ;;  %3236 = vmatmul.mubr.bf16.vlgmr.msra.gmra.mrb[8].mxu1 %v10573_v17  ;;  %v8959_v17 = vld [vmem:[#allocation7 + $0x80] ss:$16 sps:$4 sm:$0xff]  }
 0x346   :  { %3867 = vmatpush1.bf16.msra.mxu0 %v8935_v53  ;;  %3949 = vmatpush1.bf16.msra.mxu1 %v8938_v54  ;;  %v765_v53 = vsub.s32 5, %v10551_v45  ;;  %v750_v54 = vrot.slane %v10591_v49, %v10612_v58 }
 0x347   :  { %3868 = vmatprep.subr.bf16.mxu0 %v8943_v55  ;;  %3950 = vmatprep.subr.bf16.mxu1 %v8946_v56  ;;  %v754_v55 = vrot.slane %v10591_v49, %v10615_v50  ;;  %v762_v56 = vrot.slane %v10591_v49, %v761_v51 }
 0x34a   :  { %3869 = vmatpush1.bf16.msra.mxu0 %v8941_v57  ;;  %3951 = vmatpush1.bf16.msra.mxu1 %v8944_v59  ;;  %v766_v57 = vrot.slane %v10591_v49, %v765_v53  ;;  %v8256_v59 = vadd.f32 %v10605_v1, %v750_v54 }
 0x34b   :  { %3870 = vmatprep.subr.bf16.mxu0 %v8949_v60  ;;  %3952 = vmatprep.subr.bf16.mxu1 %v8952_v62  ;;  %v8257_v60 = vadd.f32 %v10603_v61, %v754_v55 }
 0x34d   :  { %v3246_v1 = vmax.f32 %v8257_v60, 0.0 }
 0x34e   :  { %3871 = vmatpush1.bf16.msra.mxu0 %v8947_v63  ;;  %3953 = vmatpush1.bf16.msra.mxu1 %v8950_v0 }
 0x34f   :  { %3872 = vmatprep.subr.bf16.mxu0 %v8955_v2  ;;  %3954 = vmatprep.subr.bf16.mxu1 %v8958_v3 }
 0x352   :  { %3873 = vmatpush1.bf16.msra.mxu0 %v8953_v4  ;;  %3955 = vmatpush1.bf16.msra.mxu1 %v8956_v5  ;;  %v9021_v4 = vld [vmem:[#allocation7 + $0x1c4] ss:$16 sps:$4 sm:$0xff]   ;;  %v9024_v5 = vld [vmem:[#allocation7 + $0x1cc] ss:$16 sps:$4 sm:$0xff]  }
 0x353   :  { %3874 = vmatprep.subr.bf16.mxu0 %v8961_v6  ;;  %3956 = vmatprep.subr.bf16.mxu1 %v8964_v7 }
 0x356   :  { %3875 = vmatpush1.bf16.msra.mxu0 %v8959_v17  ;;  %3957 = vmatpush1.bf16.msra.mxu1 %v8962_v8  ;;  %v9019_v8 = vld [vmem:[#allocation7 + $0x1c0] ss:$16 sps:$4 sm:$0xff]  }
 0x357   :  { %3876 = vmatprep.subr.bf16.mxu0 %v8967_v9  ;;  %3958 = vmatprep.subr.bf16.mxu1 %v8970_v10  ;;  %v9022_v9 = vld [vmem:[#allocation7 + $0x1c8] ss:$16 sps:$4 sm:$0xff]   ;;  %v3245_v10 = vmax.f32 %v8256_v59, 0.0 }
 0x35a   :  { %3877 = vmatpush1.bf16.msra.mxu0 %v8965_v11  ;;  %3959 = vmatpush1.bf16.msra.mxu1 %v8968_v14 }
 0x35b   :  { %3878 = vmatprep.subr.bf16.mxu0 %v8973_v15  ;;  %3960 = vmatprep.subr.bf16.mxu1 %v8976_v18  ;;  %v9027_v18 = vld [vmem:[#allocation7 + $0x1e4] ss:$16 sps:$4 sm:$0xff]  }
 0x35e   :  { %3879 = vmatpush1.bf16.msra.mxu0 %v8971_v19  ;;  %3961 = vmatpush1.bf16.msra.mxu1 %v8974_v20  ;;  %v9030_v19 = vld [vmem:[#allocation7 + $0x1ec] ss:$16 sps:$4 sm:$0xff]  }
 0x35f   :  { %3880 = vmatprep.subr.bf16.mxu0 %v8979_v21  ;;  %3962 = vmatprep.subr.bf16.mxu1 %v8982_v22  ;;  %v9025_v21 = vld [vmem:[#allocation7 + $0x1e0] ss:$16 sps:$4 sm:$0xff]   ;;  %v9028_v22 = vld [vmem:[#allocation7 + $0x1e8] ss:$16 sps:$4 sm:$0xff]  }
 0x362   :  { %3881 = vmatpush1.bf16.msra.mxu0 %v8977_v23  ;;  %3963 = vmatpush1.bf16.msra.mxu1 %v8980_v24  ;;  %v9033_v23 = vld [vmem:[#allocation7 + $0x204] ss:$16 sps:$4 sm:$0xff]   ;;  %v9036_v24 = vld [vmem:[#allocation7 + $0x20c] ss:$16 sps:$4 sm:$0xff]  }
 0x363   :  { %3882 = vmatprep.subr.bf16.mxu0 %v8985_v25  ;;  %3964 = vmatprep.subr.bf16.mxu1 %v8988_v26  ;;  %v773_v25 = vsub.s32 7, %v10551_v45  ;;  %v769_v26 = vsub.s32 6, %v10551_v45 }
 0x366   :  { %3883 = vmatpush1.bf16.msra.mxu0 %v8983_v27  ;;  %3965 = vmatpush1.bf16.msra.mxu1 %v8986_v28  ;;  %v740_v27 = vld [vmem:[#allocation5 + $0x8] sm:$0xf]  ;;  %v9543_v28 = vld [vmem:[#allocation5] sm:$0xff] }
 0x367   :  { %3884 = vmatprep.subr.bf16.mxu0 %v8991_v29  ;;  %3966 = vmatprep.subr.bf16.mxu1 %v8994_v30  ;;  %v774_v29 = vrot.slane %v9543_v28, %v773_v25  ;;  %v770_v30 = vrot.slane %v9543_v28, %v769_v26  ;;  %v9061_v25 = vld [vmem:[#allocation7 + $0x2a0] ss:$16 sps:$4 sm:$0xff]   ;;  %v9064_v26 = vld [vmem:[#allocation7 + $0x2a8] ss:$16 sps:$4 sm:$0xff]   ;;  %v9072_v28 = vld [vmem:[#allocation7 + $0x2cc] ss:$16 sps:$4 sm:$0xff]  }
 0x36a   :  { %3885 = vmatpush1.bf16.msra.mxu0 %v8989_v31  ;;  %3967 = vmatpush1.bf16.msra.mxu1 %v8992_v32  ;;  %v778_v31 = vrot.slane %v740_v27, %v10594_v16  ;;  %v786_v32 = vrot.slane %v740_v27, %v10615_v50 }
 0x36b   :  { %3886 = vmatprep.subr.bf16.mxu0 %v8997_v33  ;;  %3968 = vmatprep.subr.bf16.mxu1 %v9000_v34  ;;  %v782_v33 = vrot.slane %v740_v27, %v10612_v58  ;;  %v790_v34 = vrot.slane %v740_v27, %v10597_v52  ;;  %v9069_v27 = vld [vmem:[#allocation7 + $0x2c4] ss:$16 sps:$4 sm:$0xff]  }
 0x36e   :  { %3887 = vmatpush1.bf16.msra.mxu0 %v8995_v35  ;;  %3969 = vmatpush1.bf16.msra.mxu1 %v8998_v36 }
 0x36f   :  { %3888 = vmatprep.subr.bf16.mxu0 %v9003_v37  ;;  %3970 = vmatprep.subr.bf16.mxu1 %v9006_v38 }
 0x372   :  { %3889 = vmatpush1.bf16.msra.mxu0 %v9001_v39  ;;  %3971 = vmatpush1.bf16.msra.mxu1 %v9004_v40 }
 0x373   :  { %3890 = vmatprep.subr.bf16.mxu0 %v9009_v41  ;;  %3972 = vmatprep.subr.bf16.mxu1 %v9012_v42 }
 0x376   :  { %3891 = vmatpush1.bf16.msra.mxu0 %v9007_v43  ;;  %3973 = vmatpush1.bf16.msra.mxu1 %v9010_v44 }
 0x377   :  { %3892 = vmatprep.subr.bf16.mxu0 %v9015_v12  ;;  %3974 = vmatprep.subr.bf16.mxu1 %v9018_v46 }
 0x37a   :  { %3893 = vmatpush1.bf16.msra.mxu0 %v9013_v47  ;;  %3975 = vmatpush1.bf16.msra.mxu1 %v9016_v48 }
 0x37b   :  { %3894 = vmatprep.subr.bf16.mxu0 %v9021_v4  ;;  %3976 = vmatprep.subr.bf16.mxu1 %v9024_v5  ;;  %v9031_v4 = vld [vmem:[#allocation7 + $0x200] ss:$16 sps:$4 sm:$0xff]   ;;  %v9034_v5 = vld [vmem:[#allocation7 + $0x208] ss:$16 sps:$4 sm:$0xff]  }
 0x37e   :  { %3895 = vmatpush1.bf16.msra.mxu0 %v9019_v8  ;;  %3977 = vmatpush1.bf16.msra.mxu1 %v9022_v9  ;;  %v9037_v8 = vld [vmem:[#allocation7 + $0x220] ss:$16 sps:$4 sm:$0xff]   ;;  %v9040_v9 = vld [vmem:[#allocation7 + $0x228] ss:$16 sps:$4 sm:$0xff]  }
 0x37f   :  { %3896 = vmatprep.subr.bf16.mxu0 %v9027_v18  ;;  %3978 = vmatprep.subr.bf16.mxu1 %v9030_v19  ;;  %v9052_v18 = vld [vmem:[#allocation7 + $0x268] ss:$16 sps:$4 sm:$0xff]   ;;  %v9057_v19 = vld [vmem:[#allocation7 + $0x284] ss:$16 sps:$4 sm:$0xff]  }
 0x382   :  { %3897 = vmatpush1.bf16.msra.mxu0 %v9025_v21  ;;  %3979 = vmatpush1.bf16.msra.mxu1 %v9028_v22  ;;  %v9055_v21 = vld [vmem:[#allocation7 + $0x280] ss:$16 sps:$4 sm:$0xff]   ;;  %v9058_v22 = vld [vmem:[#allocation7 + $0x288] ss:$16 sps:$4 sm:$0xff]  }
 0x383   :  { %3907 = vmatprep.subr.bf16.mxu0 %v9033_v23  ;;  %3989 = vmatprep.subr.bf16.mxu1 %v9036_v24  ;;  %v9063_v23 = vld [vmem:[#allocation7 + $0x2a4] ss:$16 sps:$4 sm:$0xff]   ;;  %v9066_v24 = vld [vmem:[#allocation7 + $0x2ac] ss:$16 sps:$4 sm:$0xff]  }
 0x398   :  { %v2991_v62 = vpop.f32.mrb[4].mxu0  ;;  %v3073_v63 = vpop.f32.mrb[4].mxu1 }
 0x399   :  { %v8259_v0 = vadd.f32 %v2991_v62, %v762_v56  ;;  %v2993_v2 = vpop.f32.mrb[5].mxu0  ;;  %v3075_v3 = vpop.f32.mrb[5].mxu1  ;;  %v8261_v36 = vadd.f32 %v3073_v63, %v770_v30  ;;  %v9070_v30 = vld [vmem:[#allocation7 + $0x2c8] ss:$16 sps:$4 sm:$0xff]  }
 0x39a   :  { %v8260_v6 = vadd.f32 %v2993_v2, %v766_v57  ;;  %v2995_v7 = vpop.f32.mrb[6].mxu0  ;;  %v3077_v17 = vpop.f32.mrb[6].mxu1  ;;  %v8262_v35 = vadd.f32 %v3075_v3, %v774_v29  ;;  %v9067_v29 = vld [vmem:[#allocation7 + $0x2c0] ss:$16 sps:$4 sm:$0xff]  }
 0x39b   :  { %v3248_v11 = vmax.f32 %v8259_v0, 0.0  ;;  %v2996_v14 = vpop.f32.mrb[7].mxu0  ;;  %v3078_v49 = vpop.f32.mrb[7].mxu1  ;;  %v3250_v55 = vmax.f32 %v8261_v36, 0.0  ;;  %v9039_v7 = vld [vmem:[#allocation7 + $0x224] ss:$16 sps:$4 sm:$0xff]  }
 0x39c   :  { %v3249_v61 = vmax.f32 %v8260_v6, 0.0  ;;  %v3251_v47 = vmax.f32 %v8262_v35, 0.0  ;;  %v9042_v17 = vld [vmem:[#allocation7 + $0x22c] ss:$16 sps:$4 sm:$0xff]   ;;  %v9043_v14 = vld [vmem:[#allocation7 + $0x240] ss:$16 sps:$4 sm:$0xff]  }
 0x39d   :  { %v3257_v15 = vmax.f32 %v3245_v10, %v3248_v11  ;;  %v9045_v10 = vld [vmem:[#allocation7 + $0x244] ss:$16 sps:$4 sm:$0xff]   ;;  %v10109_v11 = vmov 0   ;;  %v9046_v49 = vld [vmem:[#allocation7 + $0x248] ss:$16 sps:$4 sm:$0xff]  }
 0x39e   :  { %v3258_v20 = vmax.f32 %v3246_v1, %v3249_v61  ;;  %v9051_v1 = vld [vmem:[#allocation7 + $0x264] ss:$16 sps:$4 sm:$0xff]   ;;  %v9054_v61 = vld [vmem:[#allocation7 + $0x26c] ss:$16 sps:$4 sm:$0xff]  }
 0x39f   :  { %v9081_v35 = vld [vmem:[#allocation10 + $0x4] ss:$12 sps:$4 sm:$0xff]   ;;  %v9079_v36 = vld [vmem:[#allocation10] ss:$12 sps:$4 sm:$0xff]  }
 0x418   :  { %v3155_v37 = vpop.f32.mrb[8].mxu0  ;;  %v3237_v38 = vpop.f32.mrb[8].mxu1 }
 0x419   :  { %v8263_v39 = vadd.f32 %v3155_v37, %v778_v31  ;;  %v8265_v40 = vadd.f32 %v3237_v38, %v786_v32  ;;  %v3157_v41 = vpop.f32.mrb[9].mxu0  ;;  %v3239_v42 = vpop.f32.mrb[9].mxu1  ;;  %v9075_v31 = vld [vmem:[#allocation7 + $0x2e4] ss:$16 sps:$4 sm:$0xff]   ;;  %v9078_v32 = vld [vmem:[#allocation7 + $0x2ec] ss:$16 sps:$4 sm:$0xff]  }
 0x41a   :  { %v8264_v43 = vadd.f32 %v3157_v41, %v782_v33  ;;  %v8266_v44 = vadd.f32 %v3239_v42, %v790_v34  ;;  %v3159_v12 = vpop.f32.mrb[10].mxu0  ;;  %v3241_v46 = vpop.f32.mrb[10].mxu1  ;;  %v9073_v33 = vld [vmem:[#allocation7 + $0x2e0] ss:$16 sps:$4 sm:$0xff]   ;;  %v9076_v34 = vld [vmem:[#allocation7 + $0x2e8] ss:$16 sps:$4 sm:$0xff]  }
 0x41b   :  { %v3252_v48 = vmax.f32 %v8263_v39, 0.0  ;;  %v3254_v51 = vmax.f32 %v8265_v40, 0.0  ;;  %v3160_v53 = vpop.f32.mrb[11].mxu0  ;;  %v3242_v54 = vpop.f32.mrb[11].mxu1  ;;  %v9082_v37 = vld [vmem:[#allocation10 + $0x8] ss:$12 sps:$4 sm:$0xff]  }
 0x41c   :  { %v3253_v56 = vmax.f32 %v8264_v43, 0.0  ;;  %v3255_v57 = vmax.f32 %v8266_v44, 0.0  ;;  %v10110_v39 = vmov 0.0   ;;  %v9085_v40 = vld [vmem:[#allocation10 + $0x1c] ss:$12 sps:$4 sm:$0xff]  }
 0x41d   :  { %v3260_v59 = vmax.f32 %v3251_v47, %v3254_v51  ;;  %v9083_v41 = vld [vmem:[#allocation10 + $0x18] ss:$12 sps:$4 sm:$0xff]   ;;  %v9086_v42 = vld [vmem:[#allocation10 + $0x20] ss:$12 sps:$4 sm:$0xff]   ;;  %v9087_v44 = vld [vmem:[#allocation10 + $0x30] ss:$12 sps:$4 sm:$0xff]  }
 0x41e   :  { %v3259_v60 = vmax.f32 %v3250_v55, %v3253_v56  ;;  %v3261_v62 = vmax.f32 %v3252_v48, %v3255_v57  ;;  %v9089_v43 = vld [vmem:[#allocation10 + $0x34] ss:$12 sps:$4 sm:$0xff]   ;;  %v9090_v12 = vld [vmem:[#allocation10 + $0x38] ss:$12 sps:$4 sm:$0xff]   ;;  %v9094_v48 = vld [vmem:[#allocation10 + $0x50] ss:$12 sps:$4 sm:$0xff]  }
 0x41f   :  { %v3263_v63 = vmax.f32 %v3257_v15, %v3260_v59  ;;  %v9049_v15 = vld [vmem:[#allocation7 + $0x260] ss:$16 sps:$4 sm:$0xff]   ;;  %v9091_v47 = vld [vmem:[#allocation10 + $0x48] ss:$12 sps:$4 sm:$0xff]   ;;  %v9097_v51 = vld [vmem:[#allocation10 + $0x64] ss:$12 sps:$4 sm:$0xff]  }
 0x420   :  { %v3262_v0 = vmax.f32 %v10607_v13, %v3259_v60  ;;  %v10634_v2 = vmax.f32 %v3258_v20, %v3261_v62  ;;  %v9048_v13 = vld [vmem:[#allocation7 + $0x24c] ss:$16 sps:$4 sm:$0xff]   ;;  %v9095_v53 = vld [vmem:[#allocation10 + $0x60] ss:$12 sps:$4 sm:$0xff]   ;;  %v9103_v60 = vld [vmem:[#allocation10 + $0x90] ss:$12 sps:$4 sm:$0xff]  }
 0x421   :  { %v3266_v3 = vpack.c.bf16 %v3263_v63, %v3263_v63  ;;  %v9060_v20 = vld [vmem:[#allocation7 + $0x28c] ss:$16 sps:$4 sm:$0xff]   ;;  %v9102_v57 = vld [vmem:[#allocation10 + $0x80] ss:$12 sps:$4 sm:$0xff]  }
 0x422   :  { %v3265_v6 = vpack.c.bf16 %v3262_v0, %v3262_v0  ;;  %v3267_v38 = vpack.c.bf16 %v10634_v2, %v10634_v2  ;;  %v9093_v46 = vld [vmem:[#allocation10 + $0x4c] ss:$12 sps:$4 sm:$0xff]   ;;  %v9098_v54 = vld [vmem:[#allocation10 + $0x68] ss:$12 sps:$4 sm:$0xff]   ;;  %v9110_v2 = vld [vmem:[#allocation10 + $0xb0] ss:$12 sps:$4 sm:$0xff]  }
 0x423   :  { %3898 = vmatprep.mubr.bf16.mxu0 %v3266_v3  ;;  %3980 = vmatprep.mubr.bf16.mxu1 %v3266_v3  ;;  %v9101_v55 = vld [vmem:[#allocation10 + $0x7c] ss:$12 sps:$4 sm:$0xff]   ;;  %v9099_v56 = vld [vmem:[#allocation10 + $0x78] ss:$12 sps:$4 sm:$0xff]   ;;  %v9105_v59 = vld [vmem:[#allocation10 + $0x94] ss:$12 sps:$4 sm:$0xff]  }
 0x424   :  { %3899 = vmatmul.mubr.bf16.vlgmr.msra.gmra.mrb[12].mxu0 %v3265_v6  ;;  %3981 = vmatmul.mubr.bf16.vlgmr.msra.gmra.mrb[12].mxu1 %v3265_v6  ;;  %v9106_v62 = vld [vmem:[#allocation10 + $0x98] ss:$12 sps:$4 sm:$0xff]   ;;  %v9107_v0 = vld [vmem:[#allocation10 + $0xa8] ss:$12 sps:$4 sm:$0xff]  }
 0x425   :  { %3908 = vmatpush1.bf16.msra.mxu0 %v9031_v4  ;;  %3990 = vmatpush1.bf16.msra.mxu1 %v9034_v5  ;;  %v9109_v63 = vld [vmem:[#allocation10 + $0xac] ss:$12 sps:$4 sm:$0xff]   ;;  %v9113_v3 = vld [vmem:[#allocation13 + $0x4] ss:$8 sps:$4 sm:$0xff]   ;;  %v3364_v4 = vld [vmem:[#allocation8] sm:$0xf] }
 0x426   :  { %3909 = vmatprep.subr.bf16.mxu0 %v9039_v7  ;;  %3991 = vmatprep.subr.bf16.mxu1 %v9042_v17  ;;  %v3369_v5 = vrot.slane %v3364_v4, %v10594_v16  ;;  %v3377_v6 = vrot.slane %v3364_v4, %v10615_v50  ;;  %v3373_v7 = vrot.slane %v3364_v4, %v10612_v58 }
 0x427   :  { %3939 = vmatprep.mubr.bf16.mxu0 %v10109_v11  ;;  %4021 = vmatprep.mubr.bf16.mxu1 %v10109_v11  ;;  %v3381_v17 = vrot.slane %v3364_v4, %v10597_v52  ;;  %v9183_v4 = vld [vmem:[#allocation16] ss:$8 sps:$4 sm:$0xff]  }
 0x429   :  { %3910 = vmatpush1.bf16.msra.mxu0 %v9037_v8  ;;  %3992 = vmatpush1.bf16.msra.mxu1 %v9040_v9 }
 0x42a   :  { %3911 = vmatprep.subr.bf16.mxu0 %v9045_v10  ;;  %3993 = vmatprep.subr.bf16.mxu1 %v9048_v13 }
 0x42d   :  { %3912 = vmatpush1.bf16.msra.mxu0 %v9043_v14  ;;  %3994 = vmatpush1.bf16.msra.mxu1 %v9046_v49 }
 0x42e   :  { %3913 = vmatprep.subr.bf16.mxu0 %v9051_v1  ;;  %3995 = vmatprep.subr.bf16.mxu1 %v9054_v61 }
 0x431   :  { %3914 = vmatpush1.bf16.msra.mxu0 %v9049_v15  ;;  %3996 = vmatpush1.bf16.msra.mxu1 %v9052_v18 }
 0x432   :  { %3915 = vmatprep.subr.bf16.mxu0 %v9057_v19  ;;  %3997 = vmatprep.subr.bf16.mxu1 %v9060_v20 }
 0x435   :  { %3916 = vmatpush1.bf16.msra.mxu0 %v9055_v21  ;;  %3998 = vmatpush1.bf16.msra.mxu1 %v9058_v22 }
 0x436   :  { %3917 = vmatprep.subr.bf16.mxu0 %v9063_v23  ;;  %3999 = vmatprep.subr.bf16.mxu1 %v9066_v24 }
 0x439   :  { %3918 = vmatpush1.bf16.msra.mxu0 %v9061_v25  ;;  %4000 = vmatpush1.bf16.msra.mxu1 %v9064_v26 }
 0x43a   :  { %3919 = vmatprep.subr.bf16.mxu0 %v9069_v27  ;;  %4001 = vmatprep.subr.bf16.mxu1 %v9072_v28  ;;  %v9111_v28 = vld [vmem:[#allocation13] ss:$8 sps:$4 sm:$0xff]  }
 0x43d   :  { %3920 = vmatpush1.bf16.msra.mxu0 %v9067_v29  ;;  %4002 = vmatpush1.bf16.msra.mxu1 %v9070_v30  ;;  %v9116_v30 = vld [vmem:[#allocation13 + $0x14] ss:$8 sps:$4 sm:$0xff]  }
 0x43e   :  { %3921 = vmatprep.subr.bf16.mxu0 %v9075_v31  ;;  %4003 = vmatprep.subr.bf16.mxu1 %v9078_v32  ;;  %v9114_v31 = vld [vmem:[#allocation13 + $0x10] ss:$8 sps:$4 sm:$0xff]   ;;  %v9119_v32 = vld [vmem:[#allocation13 + $0x24] ss:$8 sps:$4 sm:$0xff]  }
 0x441   :  { %3922 = vmatpush1.bf16.msra.mxu0 %v9073_v33  ;;  %4004 = vmatpush1.bf16.msra.mxu1 %v9076_v34  ;;  %v9117_v33 = vld [vmem:[#allocation13 + $0x20] ss:$8 sps:$4 sm:$0xff]   ;;  %v9122_v34 = vld [vmem:[#allocation13 + $0x34] ss:$8 sps:$4 sm:$0xff]  }
 0x442   :  { %4215 = vmatprep.subr.bf16.mxu0 %v9081_v35  ;;  %8131 = vmatprep.subr.bf16.mxu1 %v10110_v39  ;;  %v9120_v35 = vld [vmem:[#allocation13 + $0x30] ss:$8 sps:$4 sm:$0xff]  }
 0x444   :  { %3940 = vmatmul.mubr.bf16.vlgmr.msra.gmra.mrb[12].mxu0 %v3267_v38  ;;  %4022 = vmatmul.mubr.bf16.vlgmr.msra.gmra.mrb[12].mxu1 %v3267_v38  ;;  %v9128_v38 = vld [vmem:[#allocation13 + $0x54] ss:$8 sps:$4 sm:$0xff]  }
 0x445   :  { %4216 = vmatpush1.bf16.msra.mxu0 %v9079_v36  ;;  %8132 = vmatpush3.bf16.msra.mxu1 %v9082_v37  ;;  %v9125_v36 = vld [vmem:[#allocation13 + $0x44] ss:$8 sps:$4 sm:$0xff]   ;;  %v9123_v37 = vld [vmem:[#allocation13 + $0x40] ss:$8 sps:$4 sm:$0xff]  }
 0x446   :  { %4217 = vmatprep.subr.bf16.mxu0 %v9085_v40  ;;  %8133 = vmatprep.subr.bf16.mxu1 %v10110_v39  ;;  %v9126_v40 = vld [vmem:[#allocation13 + $0x50] ss:$8 sps:$4 sm:$0xff]  }
 0x447   :  { %4247 = vmatprep.mubr.bf16.mxu0 %v10109_v11  ;;  %8147 = vmatprep.mubr.msk.bf16.mxu1 %vm10111_vm0, %v10110_v39 }
 0x449   :  { %4218 = vmatpush1.bf16.msra.mxu0 %v9083_v41  ;;  %8134 = vmatpush3.bf16.msra.mxu1 %v9086_v42  ;;  %v9131_v41 = vld [vmem:[#allocation13 + $0x64] ss:$8 sps:$4 sm:$0xff]   ;;  %v9129_v42 = vld [vmem:[#allocation13 + $0x60] ss:$8 sps:$4 sm:$0xff]  }
 0x44a   :  { %4219 = vmatprep.subr.bf16.mxu0 %v9089_v43  ;;  %8135 = vmatprep.subr.bf16.mxu1 %v10110_v39  ;;  %v9134_v43 = vld [vmem:[#allocation13 + $0x74] ss:$8 sps:$4 sm:$0xff]  }
 0x44d   :  { %4220 = vmatpush1.bf16.msra.mxu0 %v9087_v44  ;;  %8136 = vmatpush3.bf16.msra.mxu1 %v9090_v12  ;;  %v9132_v44 = vld [vmem:[#allocation13 + $0x70] ss:$8 sps:$4 sm:$0xff]   ;;  %v9137_v12 = vld [vmem:[#allocation13 + $0x84] ss:$8 sps:$4 sm:$0xff]  }
 0x44e   :  { %4221 = vmatprep.subr.bf16.mxu0 %v9093_v46  ;;  %8137 = vmatprep.subr.bf16.mxu1 %v10110_v39  ;;  %v9135_v46 = vld [vmem:[#allocation13 + $0x80] ss:$8 sps:$4 sm:$0xff]  }
 0x451   :  { %4222 = vmatpush1.bf16.msra.mxu0 %v9091_v47  ;;  %8138 = vmatpush3.bf16.msra.mxu1 %v9094_v48  ;;  %v9140_v47 = vld [vmem:[#allocation13 + $0x94] ss:$8 sps:$4 sm:$0xff]   ;;  %v9138_v48 = vld [vmem:[#allocation13 + $0x90] ss:$8 sps:$4 sm:$0xff]  }
 0x452   :  { %4223 = vmatprep.subr.bf16.mxu0 %v9097_v51  ;;  %8139 = vmatprep.subr.bf16.mxu1 %v10110_v39  ;;  %v9143_v51 = vld [vmem:[#allocation13 + $0xa4] ss:$8 sps:$4 sm:$0xff]  }
 0x455   :  { %4224 = vmatpush1.bf16.msra.mxu0 %v9095_v53  ;;  %8140 = vmatpush3.bf16.msra.mxu1 %v9098_v54  ;;  %v9141_v53 = vld [vmem:[#allocation13 + $0xa0] ss:$8 sps:$4 sm:$0xff]   ;;  %v9146_v54 = vld [vmem:[#allocation13 + $0xb4] ss:$8 sps:$4 sm:$0xff]  }
 0x456   :  { %8141 = vmatprep.subr.bf16.mxu1 %v10110_v39  ;;  %4225 = vmatprep.subr.bf16.mxu0 %v9101_v55  ;;  %v9144_v55 = vld [vmem:[#allocation13 + $0xb0] ss:$8 sps:$4 sm:$0xff]  }
 0x459   :  { %4226 = vmatpush1.bf16.msra.mxu0 %v9099_v56  ;;  %8142 = vmatpush3.bf16.msra.mxu1 %v9102_v57  ;;  %v9149_v56 = vld [vmem:[#allocation13 + $0xc4] ss:$8 sps:$4 sm:$0xff]   ;;  %v9147_v57 = vld [vmem:[#allocation13 + $0xc0] ss:$8 sps:$4 sm:$0xff]  }
 0x45a   :  { %8143 = vmatprep.subr.bf16.mxu1 %v10110_v39  ;;  %4227 = vmatprep.subr.bf16.mxu0 %v9105_v59  ;;  %v9152_v59 = vld [vmem:[#allocation13 + $0xd4] ss:$8 sps:$4 sm:$0xff]  }
 0x45d   :  { %4228 = vmatpush1.bf16.msra.mxu0 %v9103_v60  ;;  %8144 = vmatpush3.bf16.msra.mxu1 %v9106_v62  ;;  %v9150_v60 = vld [vmem:[#allocation13 + $0xd0] ss:$8 sps:$4 sm:$0xff]   ;;  %v9155_v62 = vld [vmem:[#allocation13 + $0xe4] ss:$8 sps:$4 sm:$0xff]  }
 0x45e   :  { %8145 = vmatprep.subr.bf16.mxu1 %v10110_v39  ;;  %4229 = vmatprep.subr.bf16.mxu0 %v9109_v63  ;;  %v9153_v63 = vld [vmem:[#allocation13 + $0xe0] ss:$8 sps:$4 sm:$0xff]  }
 0x461   :  { %4230 = vmatpush1.bf16.msra.mxu0 %v9107_v0  ;;  %8146 = vmatpush3.bf16.msra.mxu1 %v9110_v2  ;;  %v9158_v0 = vld [vmem:[#allocation13 + $0xf4] ss:$8 sps:$4 sm:$0xff]   ;;  %v9156_v2 = vld [vmem:[#allocation13 + $0xf0] ss:$8 sps:$4 sm:$0xff]  }
 0x462   :  { %4602 = vmatprep.subr.bf16.mxu0 %v9113_v3  ;;  %v9161_v3 = vld [vmem:[#allocation13 + $0x104] ss:$8 sps:$4 sm:$0xff]  }
 0x517   :  { %v3941_v8 = vpop.f32.mrb[12].mxu0  ;;  %v4023_v9 = vpop.f32.mrb[12].mxu1 }
 0x518   :  { %v8267_v10 = vadd.f32 %v3941_v8, %v3369_v5  ;;  %v8269_v13 = vadd.f32 %v4023_v9, %v3377_v6  ;;  %v3943_v14 = vpop.f32.mrb[13].mxu0  ;;  %v4025_v49 = vpop.f32.mrb[13].mxu1  ;;  %v9185_v5 = vld [vmem:[#allocation16 + $0x4] ss:$8 sps:$4 sm:$0xff]   ;;  %v9188_v6 = vld [vmem:[#allocation16 + $0x14] ss:$8 sps:$4 sm:$0xff]  }
 0x519   :  { %v8268_v1 = vadd.f32 %v3943_v14, %v3373_v7  ;;  %v8270_v61 = vadd.f32 %v4025_v49, %v3381_v17  ;;  %v3945_v15 = vpop.f32.mrb[14].mxu0  ;;  %v4027_v18 = vpop.f32.mrb[14].mxu1  ;;  %4892 = vmatprep.subr.bf16.mxu1 %v9185_v5  ;;  %v9186_v7 = vld [vmem:[#allocation16 + $0x10] ss:$8 sps:$4 sm:$0xff]   ;;  %v9191_v17 = vld [vmem:[#allocation16 + $0x24] ss:$8 sps:$4 sm:$0xff]  }
 0x51a   :  { %v4030_v19 = vmax.f32 %v8267_v10, 0.0  ;;  %v4032_v20 = vmax.f32 %v8269_v13, 0.0  ;;  %v3946_v21 = vpop.f32.mrb[15].mxu0  ;;  %v4028_v22 = vpop.f32.mrb[15].mxu1  ;;  %v9189_v8 = vld [vmem:[#allocation16 + $0x20] ss:$8 sps:$4 sm:$0xff]  }
 0x51b   :  { %v4031_v23 = vmax.f32 %v8268_v1, 0.0  ;;  %v4033_v24 = vmax.f32 %v8270_v61, 0.0  ;;  %v9194_v9 = vld [vmem:[#allocation16 + $0x34] ss:$8 sps:$4 sm:$0xff]   ;;  %v9192_v10 = vld [vmem:[#allocation16 + $0x30] ss:$8 sps:$4 sm:$0xff]  }
 0x51c   :  { %v9197_v13 = vld [vmem:[#allocation16 + $0x44] ss:$8 sps:$4 sm:$0xff]   ;;  %v9195_v14 = vld [vmem:[#allocation16 + $0x40] ss:$8 sps:$4 sm:$0xff]   ;;  %v9200_v49 = vld [vmem:[#allocation16 + $0x54] ss:$8 sps:$4 sm:$0xff]  }
 0x51d   :  { %v4034_v25 = vmax.f32 %v4030_v19, %v4031_v23  ;;  %v4035_v26 = vmax.f32 %v4032_v20, %v4033_v24  ;;  %v9198_v1 = vld [vmem:[#allocation16 + $0x50] ss:$8 sps:$4 sm:$0xff]   ;;  %v9203_v61 = vld [vmem:[#allocation16 + $0x64] ss:$8 sps:$4 sm:$0xff]   ;;  %v9201_v15 = vld [vmem:[#allocation16 + $0x60] ss:$8 sps:$4 sm:$0xff]  }
 0x51e   :  { %v9206_v18 = vld [vmem:[#allocation16 + $0x74] ss:$8 sps:$4 sm:$0xff]   ;;  %v9204_v19 = vld [vmem:[#allocation16 + $0x70] ss:$8 sps:$4 sm:$0xff]   ;;  %v9209_v20 = vld [vmem:[#allocation16 + $0x84] ss:$8 sps:$4 sm:$0xff]  }
 0x51f   :  { %v4036_v27 = vmax.f32 %v4034_v25, %v4035_v26  ;;  %v9207_v21 = vld [vmem:[#allocation16 + $0x80] ss:$8 sps:$4 sm:$0xff]   ;;  %v9212_v22 = vld [vmem:[#allocation16 + $0x94] ss:$8 sps:$4 sm:$0xff]   ;;  %v9210_v23 = vld [vmem:[#allocation16 + $0x90] ss:$8 sps:$4 sm:$0xff]  }
 0x520   :  { %v9215_v24 = vld [vmem:[#allocation16 + $0xa4] ss:$8 sps:$4 sm:$0xff]   ;;  %v9213_v25 = vld [vmem:[#allocation16 + $0xa0] ss:$8 sps:$4 sm:$0xff]   ;;  %v9218_v26 = vld [vmem:[#allocation16 + $0xb4] ss:$8 sps:$4 sm:$0xff]  }
 0x521   :  { %v4037_v29 = vpack.c.bf16 %v4036_v27, %v4036_v27  ;;  %v9216_v27 = vld [vmem:[#allocation16 + $0xb0] ss:$8 sps:$4 sm:$0xff]   ;;  %v9177_v5 = vld [vmem:[#allocation13 + $0x160] ss:$8 sps:$4 sm:$0xff]  }
 0x523   :  { %4248 = vmatmul.mubr.bf16.vlgmr.msra.gmra.mrb[16].mxu0 %v4037_v29  ;;  %8148 = vmatmul.mubr.bf16.vlgmr.msra.gmra.mrb[16].mxu1 %v4037_v29  ;;  %v9219_v29 = vld [vmem:[#allocation16 + $0xc0] ss:$8 sps:$4 sm:$0xff]  }
 0x524   :  { %4603 = vmatpush1.bf16.msra.mxu0 %v9111_v28  ;;  %4893 = vmatpush1.bf16.msra.mxu1 %v9183_v4  ;;  %v9221_v28 = vld [vmem:[#allocation16 + $0xc4] ss:$8 sps:$4 sm:$0xff]  }
 0x525   :  { %4604 = vmatprep.subr.bf16.mxu0 %v9116_v30  ;;  %4894 = vmatprep.subr.bf16.mxu1 %v9188_v6  ;;  %v9224_v30 = vld [vmem:[#allocation16 + $0xd4] ss:$8 sps:$4 sm:$0xff]   ;;  %v9179_v4 = vld [vmem:[#allocation13 + $0x164] ss:$8 sps:$4 sm:$0xff]  }
 0x528   :  { %4605 = vmatpush1.bf16.msra.mxu0 %v9114_v31  ;;  %4895 = vmatpush1.bf16.msra.mxu1 %v9186_v7  ;;  %v9222_v31 = vld [vmem:[#allocation16 + $0xd0] ss:$8 sps:$4 sm:$0xff]  }
 0x529   :  { %4606 = vmatprep.subr.bf16.mxu0 %v9119_v32  ;;  %4896 = vmatprep.subr.bf16.mxu1 %v9191_v17  ;;  %v4070_v32 = vld [vmem:[#allocation11] sm:$0x7]  ;;  %v9180_v17 = vld [vmem:[#allocation13 + $0x170] ss:$8 sps:$4 sm:$0xff]  }
 0x52a   :  { %v9182_v7 = vld [vmem:[#allocation13 + $0x174] ss:$8 sps:$4 sm:$0xff]  }
 0x52c   :  { %4607 = vmatpush1.bf16.msra.mxu0 %v9117_v33  ;;  %4897 = vmatpush1.bf16.msra.mxu1 %v9189_v8  ;;  %v4075_v33 = vrot.slane %v4070_v32, %v10594_v16 }
 0x52d   :  { %4608 = vmatprep.subr.bf16.mxu0 %v9122_v34  ;;  %4898 = vmatprep.subr.bf16.mxu1 %v9194_v9  ;;  %v4079_v34 = vrot.slane %v4070_v32, %v10612_v58 }
 0x530   :  { %4609 = vmatpush1.bf16.msra.mxu0 %v9120_v35  ;;  %4899 = vmatpush1.bf16.msra.mxu1 %v9192_v10  ;;  %v9227_v10 = vld [vmem:[#allocation16 + $0xe4] ss:$8 sps:$4 sm:$0xff]  }
 0x531   :  { %4610 = vmatprep.subr.bf16.mxu0 %v9125_v36  ;;  %4900 = vmatprep.subr.bf16.mxu1 %v9197_v13  ;;  %v9225_v13 = vld [vmem:[#allocation16 + $0xe0] ss:$8 sps:$4 sm:$0xff]  }
 0x534   :  { %4611 = vmatpush1.bf16.msra.mxu0 %v9123_v37  ;;  %4901 = vmatpush1.bf16.msra.mxu1 %v9195_v14  ;;  %v9230_v14 = vld [vmem:[#allocation16 + $0xf4] ss:$8 sps:$4 sm:$0xff]  }
 0x535   :  { %4612 = vmatprep.subr.bf16.mxu0 %v9128_v38  ;;  %4902 = vmatprep.subr.bf16.mxu1 %v9200_v49  ;;  %v9228_v49 = vld [vmem:[#allocation16 + $0xf0] ss:$8 sps:$4 sm:$0xff]  }
 0x538   :  { %4613 = vmatpush1.bf16.msra.mxu0 %v9126_v40  ;;  %4903 = vmatpush1.bf16.msra.mxu1 %v9198_v1  ;;  %v9233_v1 = vld [vmem:[#allocation19 + $0x4] ss:$8 sps:$4 sm:$0xff]  }
 0x539   :  { %4614 = vmatprep.subr.bf16.mxu0 %v9131_v41  ;;  %4904 = vmatprep.subr.bf16.mxu1 %v9203_v61  ;;  %v4350_v61 = vld [vmem:[#allocation14] sm:$0x3] }
 0x53c   :  { %4615 = vmatpush1.bf16.msra.mxu0 %v9129_v42  ;;  %4905 = vmatpush1.bf16.msra.mxu1 %v9201_v15  ;;  %v4355_v15 = vrot.slane %v4350_v61, %v10594_v16 }
 0x53d   :  { %4616 = vmatprep.subr.bf16.mxu0 %v9134_v43  ;;  %4906 = vmatprep.subr.bf16.mxu1 %v9206_v18  ;;  %v4359_v18 = vrot.slane %v4350_v61, %v10612_v58  ;;  %v9299_v61 = vld [vmem:[#allocation22 + $0x94] ss:$12 sps:$4 sm:$0xff]  }
 0x540   :  { %4617 = vmatpush1.bf16.msra.mxu0 %v9132_v44  ;;  %4907 = vmatpush1.bf16.msra.mxu1 %v9204_v19 }
 0x541   :  { %4618 = vmatprep.subr.bf16.mxu0 %v9137_v12  ;;  %4908 = vmatprep.subr.bf16.mxu1 %v9209_v20 }
 0x544   :  { %4619 = vmatpush1.bf16.msra.mxu0 %v9135_v46  ;;  %4909 = vmatpush1.bf16.msra.mxu1 %v9207_v21 }
 0x545   :  { %4620 = vmatprep.subr.bf16.mxu0 %v9140_v47  ;;  %4910 = vmatprep.subr.bf16.mxu1 %v9212_v22 }
 0x548   :  { %4621 = vmatpush1.bf16.msra.mxu0 %v9138_v48  ;;  %4911 = vmatpush1.bf16.msra.mxu1 %v9210_v23 }
 0x549   :  { %4622 = vmatprep.subr.bf16.mxu0 %v9143_v51  ;;  %4912 = vmatprep.subr.bf16.mxu1 %v9215_v24  ;;  %v9159_v51 = vld [vmem:[#allocation13 + $0x100] ss:$8 sps:$4 sm:$0xff]  }
 0x54c   :  { %4623 = vmatpush1.bf16.msra.mxu0 %v9141_v53  ;;  %4913 = vmatpush1.bf16.msra.mxu1 %v9213_v25 }
 0x54d   :  { %4624 = vmatprep.subr.bf16.mxu0 %v9146_v54  ;;  %4914 = vmatprep.subr.bf16.mxu1 %v9218_v26  ;;  %v9164_v54 = vld [vmem:[#allocation13 + $0x114] ss:$8 sps:$4 sm:$0xff]  }
 0x550   :  { %4625 = vmatpush1.bf16.msra.mxu0 %v9144_v55  ;;  %4915 = vmatpush1.bf16.msra.mxu1 %v9216_v27  ;;  %v9162_v55 = vld [vmem:[#allocation13 + $0x110] ss:$8 sps:$4 sm:$0xff]  }
 0x551   :  { %4626 = vmatprep.subr.bf16.mxu0 %v9149_v56  ;;  %4916 = vmatprep.subr.bf16.mxu1 %v9221_v28  ;;  %v9167_v56 = vld [vmem:[#allocation13 + $0x124] ss:$8 sps:$4 sm:$0xff]  }
 0x552   :  { %v9231_v28 = vld [vmem:[#allocation19] ss:$8 sps:$4 sm:$0xff]  }
 0x554   :  { %4627 = vmatpush1.bf16.msra.mxu0 %v9147_v57  ;;  %4917 = vmatpush1.bf16.msra.mxu1 %v9219_v29  ;;  %v9165_v57 = vld [vmem:[#allocation13 + $0x120] ss:$8 sps:$4 sm:$0xff]  }
 0x555   :  { %4628 = vmatprep.subr.bf16.mxu0 %v9152_v59  ;;  %4918 = vmatprep.subr.bf16.mxu1 %v9224_v30  ;;  %v9170_v59 = vld [vmem:[#allocation13 + $0x134] ss:$8 sps:$4 sm:$0xff]   ;;  %v9236_v30 = vld [vmem:[#allocation19 + $0x14] ss:$8 sps:$4 sm:$0xff]  }
 0x558   :  { %4629 = vmatpush1.bf16.msra.mxu0 %v9150_v60  ;;  %4919 = vmatpush1.bf16.msra.mxu1 %v9222_v31  ;;  %v9168_v60 = vld [vmem:[#allocation13 + $0x130] ss:$8 sps:$4 sm:$0xff]   ;;  %v9234_v31 = vld [vmem:[#allocation19 + $0x10] ss:$8 sps:$4 sm:$0xff]  }
 0x559   :  { %4630 = vmatprep.subr.bf16.mxu0 %v9155_v62  ;;  %v9173_v62 = vld [vmem:[#allocation13 + $0x144] ss:$8 sps:$4 sm:$0xff]   ;;  %4920 = vmatprep.subr.bf16.mxu1 %v9227_v10 }
 0x55a   :  { %v9288_v10 = vld [vmem:[#allocation22 + $0x48] ss:$12 sps:$4 sm:$0xff]  }
 0x55c   :  { %4631 = vmatpush1.bf16.msra.mxu0 %v9153_v63  ;;  %v9171_v63 = vld [vmem:[#allocation13 + $0x140] ss:$8 sps:$4 sm:$0xff]   ;;  %4921 = vmatpush1.bf16.msra.mxu1 %v9225_v13 }
 0x55d   :  { %4632 = vmatprep.subr.bf16.mxu0 %v9158_v0  ;;  %v9176_v0 = vld [vmem:[#allocation13 + $0x154] ss:$8 sps:$4 sm:$0xff]   ;;  %4922 = vmatprep.subr.bf16.mxu1 %v9230_v14 }
 0x55e   :  { %v9293_v13 = vld [vmem:[#allocation22 + $0x64] ss:$12 sps:$4 sm:$0xff]   ;;  %v9291_v14 = vld [vmem:[#allocation22 + $0x60] ss:$12 sps:$4 sm:$0xff]  }
 0x560   :  { %4633 = vmatpush1.bf16.msra.mxu0 %v9156_v2  ;;  %v9174_v2 = vld [vmem:[#allocation13 + $0x150] ss:$8 sps:$4 sm:$0xff]   ;;  %4923 = vmatpush1.bf16.msra.mxu1 %v9228_v49 }
 0x561   :  { %4643 = vmatprep.subr.bf16.mxu0 %v9161_v3  ;;  %v4083_v3 = vrot.slane %v4070_v32, %v10615_v50  ;;  %5139 = vmatprep.subr.bf16.mxu1 %v9233_v1  ;;  %v9239_v32 = vld [vmem:[#allocation19 + $0x24] ss:$8 sps:$4 sm:$0xff]  }
 0x562   :  { %v9296_v49 = vld [vmem:[#allocation22 + $0x7c] ss:$12 sps:$4 sm:$0xff]   ;;  %v9294_v1 = vld [vmem:[#allocation22 + $0x78] ss:$12 sps:$4 sm:$0xff]  }
 0x5f6   :  { %v4249_v35 = vpop.f32.mrb[16].mxu0  ;;  %v4290_v36 = vpop.f32.mrb[16].mxu1 }
 0x5f7   :  { %v4250_v37 = vadd.f32 %v4249_v35, %v4075_v33  ;;  %v4251_v38 = vpop.f32.mrb[17].mxu0  ;;  %v8149_v40 = vpop.f32.mrb[17].mxu1  ;;  %v4291_v6 = vadd.f32 %v4290_v36, %v4083_v3  ;;  %v9237_v33 = vld [vmem:[#allocation19 + $0x20] ss:$8 sps:$4 sm:$0xff]   ;;  %v9240_v35 = vld [vmem:[#allocation19 + $0x30] ss:$8 sps:$4 sm:$0xff]  }
 0x5f8   :  { %v4252_v41 = vadd.f32 %v4251_v38, %v4079_v34  ;;  %v4253_v42 = vpop.f32.mrb[18].mxu0  ;;  %v4293_v43 = vpop.f32.mrb[18].mxu1  ;;  %v9242_v34 = vld [vmem:[#allocation19 + $0x34] ss:$8 sps:$4 sm:$0xff]   ;;  %v9245_v36 = vld [vmem:[#allocation19 + $0x44] ss:$8 sps:$4 sm:$0xff]  }
 0x5f9   :  { %v4296_v44 = vmax.f32 %v4250_v37, 0.0  ;;  %v4254_v12 = vpop.f32.mrb[19].mxu0  ;;  %v8150_v46 = vpop.f32.mrb[19].mxu1  ;;  %v4298_v8 = vmax.f32 %v4291_v6, 0.0  ;;  %v9243_v37 = vld [vmem:[#allocation19 + $0x40] ss:$8 sps:$4 sm:$0xff]  }
 0x5fa   :  { %v4297_v47 = vmax.f32 %v4252_v41, 0.0  ;;  %v9248_v38 = vld [vmem:[#allocation19 + $0x54] ss:$8 sps:$4 sm:$0xff]   ;;  %v9246_v40 = vld [vmem:[#allocation19 + $0x50] ss:$8 sps:$4 sm:$0xff]  }
 0x5fb   :  { %v4299_v53 = vpack.c.bf16 %v4296_v44, %v4296_v44  ;;  %v4301_v9 = vpack.c.bf16 %v4298_v8, %v4298_v8  ;;  %v9251_v41 = vld [vmem:[#allocation19 + $0x64] ss:$8 sps:$4 sm:$0xff]   ;;  %v9249_v42 = vld [vmem:[#allocation19 + $0x60] ss:$8 sps:$4 sm:$0xff]   ;;  %v9254_v43 = vld [vmem:[#allocation19 + $0x74] ss:$8 sps:$4 sm:$0xff]  }
 0x5fc   :  { %v4300_v48 = vpack.c.bf16 %v4297_v47, %v4297_v47  ;;  %v9252_v44 = vld [vmem:[#allocation19 + $0x70] ss:$8 sps:$4 sm:$0xff]   ;;  %v9257_v12 = vld [vmem:[#allocation19 + $0x84] ss:$8 sps:$4 sm:$0xff]   ;;  %v9255_v46 = vld [vmem:[#allocation19 + $0x80] ss:$8 sps:$4 sm:$0xff]  }
 0x5fd   :  { %v9260_v47 = vld [vmem:[#allocation19 + $0x94] ss:$8 sps:$4 sm:$0xff]   ;;  %v9279_v3 = vld [vmem:[#allocation22] ss:$12 sps:$4 sm:$0xff]  }
 0x5fe   :  { %4634 = vmatprep.mubr.bf16.mxu0 %v4300_v48  ;;  %v9258_v48 = vld [vmem:[#allocation19 + $0x90] ss:$8 sps:$4 sm:$0xff]  }
 0x5ff   :  { %4635 = vmatmul.mubr.bf16.vlgmr.msra.gmra.mrb[20].mxu0 %v4299_v53  ;;  %v9261_v53 = vld [vmem:[#allocation19 + $0xa0] ss:$8 sps:$4 sm:$0xff]  }
 0x600   :  { %4644 = vmatpush1.bf16.msra.mxu0 %v9159_v51  ;;  %4675 = vmatprep.mubr.bf16.mxu0 %v10109_v11  ;;  %v9263_v51 = vld [vmem:[#allocation19 + $0xa4] ss:$8 sps:$4 sm:$0xff]   ;;  %v9285_v8 = vld [vmem:[#allocation22 + $0x30] ss:$12 sps:$4 sm:$0xff]  }
 0x601   :  { %4645 = vmatprep.subr.bf16.mxu0 %v9164_v54  ;;  %v9266_v54 = vld [vmem:[#allocation19 + $0xb4] ss:$8 sps:$4 sm:$0xff]  }
 0x602   :  { %v9282_v6 = vld [vmem:[#allocation22 + $0x18] ss:$12 sps:$4 sm:$0xff]  }
 0x604   :  { %4646 = vmatpush1.bf16.msra.mxu0 %v9162_v55  ;;  %v9264_v55 = vld [vmem:[#allocation19 + $0xb0] ss:$8 sps:$4 sm:$0xff]  }
 0x605   :  { %4647 = vmatprep.subr.bf16.mxu0 %v9167_v56  ;;  %v9269_v56 = vld [vmem:[#allocation19 + $0xc4] ss:$8 sps:$4 sm:$0xff]  }
 0x608   :  { %4648 = vmatpush1.bf16.msra.mxu0 %v9165_v57  ;;  %v9267_v57 = vld [vmem:[#allocation19 + $0xc0] ss:$8 sps:$4 sm:$0xff]  }
 0x609   :  { %4649 = vmatprep.subr.bf16.mxu0 %v9170_v59  ;;  %v9272_v59 = vld [vmem:[#allocation19 + $0xd4] ss:$8 sps:$4 sm:$0xff]  }
 0x60c   :  { %4650 = vmatpush1.bf16.msra.mxu0 %v9168_v60  ;;  %v9270_v60 = vld [vmem:[#allocation19 + $0xd0] ss:$8 sps:$4 sm:$0xff]  }
 0x60d   :  { %4651 = vmatprep.subr.bf16.mxu0 %v9173_v62  ;;  %v9275_v62 = vld [vmem:[#allocation19 + $0xe4] ss:$8 sps:$4 sm:$0xff]  }
 0x610   :  { %4652 = vmatpush1.bf16.msra.mxu0 %v9171_v63  ;;  %v9273_v63 = vld [vmem:[#allocation19 + $0xe0] ss:$8 sps:$4 sm:$0xff]  }
 0x611   :  { %4653 = vmatprep.subr.bf16.mxu0 %v9176_v0  ;;  %v9278_v0 = vld [vmem:[#allocation19 + $0xf4] ss:$8 sps:$4 sm:$0xff]  }
 0x614   :  { %4654 = vmatpush1.bf16.msra.mxu0 %v9174_v2  ;;  %v9276_v2 = vld [vmem:[#allocation19 + $0xf0] ss:$8 sps:$4 sm:$0xff]  }
 0x615   :  { %4655 = vmatprep.subr.bf16.mxu0 %v9179_v4  ;;  %v9281_v4 = vld [vmem:[#allocation22 + $0x4] ss:$12 sps:$4 sm:$0xff]  }
 0x618   :  { %4656 = vmatpush1.bf16.msra.mxu0 %v9177_v5  ;;  %v9284_v5 = vld [vmem:[#allocation22 + $0x1c] ss:$12 sps:$4 sm:$0xff]  }
 0x619   :  { %4657 = vmatprep.subr.bf16.mxu0 %v9182_v7  ;;  %v9287_v7 = vld [vmem:[#allocation22 + $0x34] ss:$12 sps:$4 sm:$0xff]  }
 0x61c   :  { %4658 = vmatpush1.bf16.msra.mxu0 %v9180_v17  ;;  %v9306_v17 = vld [vmem:[#allocation22 + $0xc8] ss:$12 sps:$4 sm:$0xff]  }
 0x61d   :  { %5521 = vmatprep.subr.bf16.mxu0 %v9281_v4  ;;  %v9342_v4 = vld [vmem:[#allocation22 + $0xb0] ss:$12 sps:$4 sm:$0xff]  }
 0x61f   :  { %4676 = vmatmul.mubr.bf16.vlgmr.msra.gmra.mrb[20].mxu0 %v4301_v9  ;;  %v9290_v9 = vld [vmem:[#allocation22 + $0x4c] ss:$12 sps:$4 sm:$0xff]  }
 0x620   :  { %5522 = vmatpush1.bf16.msra.mxu0 %v9279_v3  ;;  %v9338_v3 = vld [vmem:[#allocation22 + $0x168] ss:$12 sps:$4 sm:$0xff]  }
 0x621   :  { %5523 = vmatprep.subr.bf16.mxu0 %v9284_v5  ;;  %v9343_v5 = vld [vmem:[#allocation25 + $0x40] sm:$0xff]  }
 0x624   :  { %5524 = vmatpush1.bf16.msra.mxu0 %v9282_v6  ;;  %v4967_v6 = vld [vmem:[#allocation20] sm:$0x3] }
 0x625   :  { %5525 = vmatprep.subr.bf16.mxu0 %v9287_v7  ;;  %v4972_v7 = vrot.slane %v4967_v6, %v10594_v16 }
 0x628   :  { %5526 = vmatpush1.bf16.msra.mxu0 %v9285_v8 }
 0x629   :  { %5527 = vmatprep.subr.bf16.mxu0 %v9290_v9 }
 0x62c   :  { %5528 = vmatpush1.bf16.msra.mxu0 %v9288_v10 }
 0x62d   :  { %5529 = vmatprep.subr.bf16.mxu0 %v9293_v13 }
 0x630   :  { %5530 = vmatpush1.bf16.msra.mxu0 %v9291_v14 }
 0x631   :  { %5531 = vmatprep.subr.bf16.mxu0 %v9296_v49 }
 0x634   :  { %5532 = vmatpush1.bf16.msra.mxu0 %v9294_v1 }
 0x635   :  { %5533 = vmatprep.subr.bf16.mxu0 %v9299_v61 }
 0x6f2   :  { %v4677_v19 = vpop.f32.mrb[20].mxu0 }
 0x6f3   :  { %v8271_v20 = vadd.f32 %v4677_v19, %v4355_v15  ;;  %v4679_v21 = vpop.f32.mrb[21].mxu0  ;;  %v9297_v15 = vld [vmem:[#allocation22 + $0x90] ss:$12 sps:$4 sm:$0xff]   ;;  %v9300_v19 = vld [vmem:[#allocation22 + $0xa8] ss:$12 sps:$4 sm:$0xff]  }
 0x6f4   :  { %v8272_v22 = vadd.f32 %v4679_v21, %v4359_v18  ;;  %v4681_v23 = vpop.f32.mrb[22].mxu0  ;;  %v9302_v18 = vld [vmem:[#allocation22 + $0xac] ss:$12 sps:$4 sm:$0xff]   ;;  %5534 = vmatpush1.bf16.msra.mxu0 %v9297_v15 }
 0x6f5   :  { %v4684_v24 = vmax.f32 %v8271_v20, 0.0  ;;  %v4682_v25 = vpop.f32.mrb[23].mxu0  ;;  %5535 = vmatprep.subr.bf16.mxu0 %v9302_v18  ;;  %v9305_v20 = vld [vmem:[#allocation22 + $0xc4] ss:$12 sps:$4 sm:$0xff]   ;;  %v9303_v21 = vld [vmem:[#allocation22 + $0xc0] ss:$12 sps:$4 sm:$0xff]  }
 0x6f6   :  { %v4685_v26 = vmax.f32 %v8272_v22, 0.0  ;;  %v9310_v22 = vld [vmem:[#allocation22 + $0xdc] ss:$12 sps:$4 sm:$0xff]   ;;  %v9308_v23 = vld [vmem:[#allocation22 + $0xd8] ss:$12 sps:$4 sm:$0xff]  }
 0x6f7   :  { %v4686_v29 = vpack.c.bf16 %v4684_v24, %v4684_v24  ;;  %v9315_v24 = vld [vmem:[#allocation22 + $0xf4] ss:$12 sps:$4 sm:$0xff]   ;;  %v9313_v25 = vld [vmem:[#allocation22 + $0xf0] ss:$12 sps:$4 sm:$0xff]   ;;  %v9344_v18 = vld [vmem:[#allocation25] sm:$0xff]  }
 0x6f8   :  { %v4687_v27 = vpack.c.bf16 %v4685_v26, %v4685_v26  ;;  %5536 = vmatpush1.bf16.msra.mxu0 %v9300_v19  ;;  %v9320_v26 = vld [vmem:[#allocation22 + $0x10c] ss:$12 sps:$4 sm:$0xff]   ;;  %v9345_v19 = vld [vmem:[#allocation25 + $0x80] sm:$0xff]  }
 0x6f9   :  { %5537 = vmatprep.subr.bf16.mxu0 %v9305_v20 }
 0x6fa   :  { %4924 = vmatprep.mubr.bf16.mxu1 %v4687_v27  ;;  %v9318_v27 = vld [vmem:[#allocation22 + $0x108] ss:$12 sps:$4 sm:$0xff]  }
 0x6fb   :  { %4925 = vmatmul.mubr.bf16.vlgmr.msra.gmra.mrb[20].mxu1 %v4686_v29  ;;  %v9323_v29 = vld [vmem:[#allocation22 + $0x120] ss:$12 sps:$4 sm:$0xff]  }
 0x6fc   :  { %5140 = vmatpush1.bf16.msra.mxu1 %v9231_v28  ;;  %5538 = vmatpush1.bf16.msra.mxu0 %v9303_v21  ;;  %v9325_v28 = vld [vmem:[#allocation22 + $0x124] ss:$12 sps:$4 sm:$0xff]  }
 0x6fd   :  { %5141 = vmatprep.subr.bf16.mxu1 %v9236_v30  ;;  %5539 = vmatprep.subr.bf16.mxu0 %v9310_v22  ;;  %v9330_v30 = vld [vmem:[#allocation22 + $0x13c] ss:$12 sps:$4 sm:$0xff]   ;;  %v9346_v21 = vld [vmem:[#allocation25 + $0x48] sm:$0xff]  }
 0x6fe   :  { %v9347_v22 = vld [vmem:[#allocation25 + $0x8] sm:$0xff]  }
 0x700   :  { %5142 = vmatpush1.bf16.msra.mxu1 %v9234_v31  ;;  %5540 = vmatpush1.bf16.msra.mxu0 %v9308_v23  ;;  %v9328_v31 = vld [vmem:[#allocation22 + $0x138] ss:$12 sps:$4 sm:$0xff]   ;;  %v9348_v23 = vld [vmem:[#allocation25 + $0x88] sm:$0xff]  }
 0x701   :  { %5143 = vmatprep.subr.bf16.mxu1 %v9239_v32  ;;  %5541 = vmatprep.subr.bf16.mxu0 %v9315_v24  ;;  %v4720_v32 = vld [vmem:[#allocation17] sm:$0x3]  ;;  %v9349_v24 = vld [vmem:[#allocation25 + $0x50] sm:$0xff]  }
 0x704   :  { %5144 = vmatpush1.bf16.msra.mxu1 %v9237_v33  ;;  %5542 = vmatpush1.bf16.msra.mxu0 %v9313_v25  ;;  %v4725_v33 = vrot.slane %v4720_v32, %v10594_v16  ;;  %v9350_v25 = vld [vmem:[#allocation25 + $0x10] sm:$0xff]  }
 0x705   :  { %5145 = vmatprep.subr.bf16.mxu1 %v9242_v34  ;;  %5543 = vmatprep.subr.bf16.mxu0 %v9320_v26  ;;  %v4729_v34 = vrot.slane %v4720_v32, %v10612_v58  ;;  %v9351_v26 = vld [vmem:[#allocation25 + $0x90] sm:$0xff]   ;;  %v9357_v32 = vld [vmem:[#allocation25 + $0xa0] sm:$0xff]  }
 0x708   :  { %5146 = vmatpush1.bf16.msra.mxu1 %v9240_v35  ;;  %5544 = vmatpush1.bf16.msra.mxu0 %v9318_v27  ;;  %v9352_v27 = vld [vmem:[#allocation25 + $0x58] sm:$0xff]  }
 0x709   :  { %5147 = vmatprep.subr.bf16.mxu1 %v9245_v36  ;;  %5545 = vmatprep.subr.bf16.mxu0 %v9325_v28  ;;  %v9353_v28 = vld [vmem:[#allocation25 + $0x18] sm:$0xff]  }
 0x70c   :  { %5148 = vmatpush1.bf16.msra.mxu1 %v9243_v37  ;;  %5546 = vmatpush1.bf16.msra.mxu0 %v9323_v29  ;;  %v9354_v29 = vld [vmem:[#allocation25 + $0x98] sm:$0xff]  }
 0x70d   :  { %5149 = vmatprep.subr.bf16.mxu1 %v9248_v38  ;;  %5547 = vmatprep.subr.bf16.mxu0 %v9330_v30  ;;  %v9355_v30 = vld [vmem:[#allocation25 + $0x60] sm:$0xff]  }
 0x710   :  { %5150 = vmatpush1.bf16.msra.mxu1 %v9246_v40  ;;  %5548 = vmatpush1.bf16.msra.mxu0 %v9328_v31  ;;  %v9356_v31 = vld [vmem:[#allocation25 + $0x20] sm:$0xff]  }
 0x711   :  { %5151 = vmatprep.subr.bf16.mxu1 %v9251_v41 }
 0x714   :  { %5152 = vmatpush1.bf16.msra.mxu1 %v9249_v42 }
 0x715   :  { %5153 = vmatprep.subr.bf16.mxu1 %v9254_v43  ;;  %v9307_v43 = vld [vmem:[#allocation22 + $0x8] ss:$12 sps:$4 sm:$0xff]  }
 0x718   :  { %5154 = vmatpush1.bf16.msra.mxu1 %v9252_v44 }
 0x719   :  { %5155 = vmatprep.subr.bf16.mxu1 %v9257_v12  ;;  %v9311_v12 = vld [vmem:[#allocation22 + $0xe0] ss:$12 sps:$4 sm:$0xff]  }
 0x71c   :  { %5156 = vmatpush1.bf16.msra.mxu1 %v9255_v46  ;;  %v9312_v46 = vld [vmem:[#allocation22 + $0x20] ss:$12 sps:$4 sm:$0xff]  }
 0x71d   :  { %5157 = vmatprep.subr.bf16.mxu1 %v9260_v47  ;;  %v9316_v47 = vld [vmem:[#allocation22 + $0xf8] ss:$12 sps:$4 sm:$0xff]  }
 0x720   :  { %5158 = vmatpush1.bf16.msra.mxu1 %v9258_v48  ;;  %v9317_v48 = vld [vmem:[#allocation22 + $0x38] ss:$12 sps:$4 sm:$0xff]  }
 0x721   :  { %5159 = vmatprep.subr.bf16.mxu1 %v9263_v51  ;;  %v9321_v51 = vld [vmem:[#allocation22 + $0x110] ss:$12 sps:$4 sm:$0xff]  }
 0x724   :  { %5160 = vmatpush1.bf16.msra.mxu1 %v9261_v53  ;;  %v9322_v53 = vld [vmem:[#allocation22 + $0x50] ss:$12 sps:$4 sm:$0xff]  }
 0x725   :  { %5161 = vmatprep.subr.bf16.mxu1 %v9266_v54  ;;  %v9326_v54 = vld [vmem:[#allocation22 + $0x128] ss:$12 sps:$4 sm:$0xff]  }
 0x728   :  { %5162 = vmatpush1.bf16.msra.mxu1 %v9264_v55  ;;  %v9327_v55 = vld [vmem:[#allocation22 + $0x68] ss:$12 sps:$4 sm:$0xff]  }
 0x729   :  { %5163 = vmatprep.subr.bf16.mxu1 %v9269_v56  ;;  %v9331_v56 = vld [vmem:[#allocation22 + $0x140] ss:$12 sps:$4 sm:$0xff]  }
 0x72c   :  { %5164 = vmatpush1.bf16.msra.mxu1 %v9267_v57  ;;  %v9332_v57 = vld [vmem:[#allocation22 + $0x80] ss:$12 sps:$4 sm:$0xff]  }
 0x72d   :  { %5165 = vmatprep.subr.bf16.mxu1 %v9272_v59  ;;  %v9335_v59 = vld [vmem:[#allocation22 + $0x154] ss:$12 sps:$4 sm:$0xff]  }
 0x72e   :  { %5549 = vmatprep.subr.bf16.mxu0 %v9335_v59 }
 0x730   :  { %5166 = vmatpush1.bf16.msra.mxu1 %v9270_v60  ;;  %v9336_v60 = vld [vmem:[#allocation22 + $0x158] ss:$12 sps:$4 sm:$0xff]  }
 0x731   :  { %5167 = vmatprep.subr.bf16.mxu1 %v9275_v62  ;;  %v9333_v62 = vld [vmem:[#allocation22 + $0x150] ss:$12 sps:$4 sm:$0xff]  }
 0x732   :  { %5550 = vmatpush1.bf16.msra.mxu0 %v9333_v62 }
 0x734   :  { %5168 = vmatpush1.bf16.msra.mxu1 %v9273_v63  ;;  %v9337_v63 = vld [vmem:[#allocation22 + $0x98] ss:$12 sps:$4 sm:$0xff]  }
 0x735   :  { %5169 = vmatprep.subr.bf16.mxu1 %v9278_v0  ;;  %v9340_v0 = vld [vmem:[#allocation22 + $0x16c] ss:$12 sps:$4 sm:$0xff]  }
 0x736   :  { %5551 = vmatprep.subr.bf16.mxu0 %v9340_v0 }
 0x737   :  { %5552 = vmatpush1.bf16.msra.mxu0 %v9338_v3 }
 0x738   :  { %5170 = vmatpush1.bf16.msra.mxu1 %v9276_v2  ;;  %v9341_v2 = vld [vmem:[#allocation22 + $0x170] ss:$12 sps:$4 sm:$0xff]   ;;  %8021 = vmatprep.subr.bf16.mxu0 %v9343_v5 }
 0x739   :  { %7999 = vmatprep.subr.bf16.mxu1 %v9306_v17  ;;  %v4976_v17 = vrot.slane %v4967_v6, %v10612_v58  ;;  %v9367_v6 = vld [vmem:[#allocation28] ss:$12 sps:$4 sm:$0xff]  }
 0x7ce   :  { %v4926_v35 = vpop.f32.mrb[20].mxu1 }
 0x7cf   :  { %v4927_v36 = vadd.f32 %v4926_v35, %v4725_v33  ;;  %v4928_v37 = vpop.f32.mrb[21].mxu1  ;;  %v9358_v33 = vld [vmem:[#allocation25 + $0x68] sm:$0xff]  }
 0x7d0   :  { %v4929_v38 = vadd.f32 %v4928_v37, %v4729_v34  ;;  %v4930_v40 = vpop.f32.mrb[22].mxu1  ;;  %v9359_v34 = vld [vmem:[#allocation25 + $0x28] sm:$0xff]   ;;  %v9362_v37 = vld [vmem:[#allocation25 + $0x30] sm:$0xff]  }
 0x7d1   :  { %v4931_v41 = vpop.f32.mrb[23].mxu1  ;;  %v4933_v44 = vpack.c.bf16 %v4927_v36, %v4927_v36  ;;  %v9360_v35 = vld [vmem:[#allocation25 + $0xa8] sm:$0xff]   ;;  %v9361_v36 = vld [vmem:[#allocation25 + $0x70] sm:$0xff]   ;;  %v9364_v40 = vld [vmem:[#allocation25 + $0x78] sm:$0xff]  }
 0x7d2   :  { %v4934_v42 = vpack.c.bf16 %v4929_v38, %v4929_v38  ;;  %v9363_v38 = vld [vmem:[#allocation25 + $0xb0] sm:$0xff]   ;;  %v9365_v41 = vld [vmem:[#allocation25 + $0x38] sm:$0xff]  }
 0x7d4   :  { %5171 = vmatprep.mubr.bf16.mxu1 %v4934_v42  ;;  %v9366_v42 = vld [vmem:[#allocation25 + $0xb8] sm:$0xff]  }
 0x7d5   :  { %5172 = vmatmul.mubr.bf16.vlgmr.msra.gmra.mrb[24].mxu1 %v4933_v44  ;;  %v5248_v44 = vld [vmem:[#allocation23] sm:$0x7] }
 0x7d6   :  { %8000 = vmatpush3.bf16.msra.mxu1 %v9307_v43  ;;  %v9369_v43 = vld [vmem:[#allocation28 + $0x4] ss:$12 sps:$4 sm:$0xff]  }
 0x7d7   :  { %8001 = vmatprep.subr.bf16.mxu1 %v9311_v12  ;;  %v5253_v12 = vrot.slane %v5248_v44, %v10594_v16 }
 0x7da   :  { %8002 = vmatpush3.bf16.msra.mxu1 %v9312_v46  ;;  %v5257_v46 = vrot.slane %v5248_v44, %v10612_v58 }
 0x7db   :  { %8003 = vmatprep.subr.bf16.mxu1 %v9316_v47 }
 0x7de   :  { %8004 = vmatpush3.bf16.msra.mxu1 %v9317_v48 }
 0x7df   :  { %8005 = vmatprep.subr.bf16.mxu1 %v9321_v51  ;;  %v5261_v51 = vrot.slane %v5248_v44, %v10615_v50 }
 0x7e2   :  { %8006 = vmatpush3.bf16.msra.mxu1 %v9322_v53 }
 0x7e3   :  { %8007 = vmatprep.subr.bf16.mxu1 %v9326_v54 }
 0x7e6   :  { %8008 = vmatpush3.bf16.msra.mxu1 %v9327_v55 }
 0x7e7   :  { %8009 = vmatprep.subr.bf16.mxu1 %v9331_v56 }
 0x7ea   :  { %8010 = vmatpush3.bf16.msra.mxu1 %v9332_v57 }
 0x7eb   :  { %8011 = vmatprep.subr.bf16.mxu1 %v9336_v60 }
 0x7ee   :  { %8012 = vmatpush3.bf16.msra.mxu1 %v9337_v63 }
 0x7ef   :  { %8013 = vmatprep.subr.bf16.mxu1 %v9341_v2 }
 0x7f2   :  { %8014 = vmatpush3.bf16.msra.mxu1 %v9342_v4 }
 0x7f3   :  { %8151 = vmatprep.subr.bf16.mxu1 %v10110_v39 }
 0x8a8   :  { %v5173_v8 = vpop.f32.mrb[24].mxu1 }
 0x8a9   :  { %v5174_v9 = vadd.f32 %v5173_v8, %v4972_v7  ;;  %v5175_v10 = vpop.f32.mrb[25].mxu1  ;;  %v9373_v8 = vld [vmem:[#allocation28 + $0x1c] ss:$12 sps:$4 sm:$0xff]  }
 0x8aa   :  { %v5176_v13 = vadd.f32 %v5175_v10, %v4976_v17  ;;  %v5177_v14 = vpop.f32.mrb[26].mxu1  ;;  %v9370_v17 = vld [vmem:[#allocation28 + $0x8] ss:$12 sps:$4 sm:$0xff]   ;;  %v9371_v10 = vld [vmem:[#allocation28 + $0x18] ss:$12 sps:$4 sm:$0xff]  }
 0x8ab   :  { %v5180_v49 = vmax.f32 %v5174_v9, 0.0  ;;  %v5178_v1 = vpop.f32.mrb[27].mxu1  ;;  %v9377_v14 = vld [vmem:[#allocation28 + $0x34] ss:$12 sps:$4 sm:$0xff]  }
 0x8ac   :  { %v5181_v61 = vmax.f32 %v5176_v13, 0.0  ;;  %v9374_v13 = vld [vmem:[#allocation28 + $0x20] ss:$12 sps:$4 sm:$0xff]   ;;  %v9378_v1 = vld [vmem:[#allocation28 + $0x38] ss:$12 sps:$4 sm:$0xff]  }
 0x8ad   :  { %v5182_v20 = vpack.c.bf16 %v5180_v49, %v5180_v49  ;;  %v9375_v49 = vld [vmem:[#allocation28 + $0x30] ss:$12 sps:$4 sm:$0xff]  }
 0x8ae   :  { %v5183_v15 = vpack.c.bf16 %v5181_v61, %v5181_v61  ;;  %v9381_v61 = vld [vmem:[#allocation28 + $0x4c] ss:$12 sps:$4 sm:$0xff]  }
 0x8b0   :  { %5553 = vmatprep.mubr.bf16.mxu0 %v5183_v15  ;;  %5594 = vmatprep.mubr.bf16.mxu1 %v5183_v15  ;;  %v9379_v15 = vld [vmem:[#allocation28 + $0x48] ss:$12 sps:$4 sm:$0xff]  }
 0x8b1   :  { %5554 = vmatmul.mubr.bf16.vlgmr.msra.gmra.mrb[24].mxu0 %v5182_v20  ;;  %5595 = vmatmul.mubr.bf16.vlgmr.msra.gmra.mrb[28].mxu1 %v5182_v20  ;;  %v9383_v20 = vld [vmem:[#allocation28 + $0x60] ss:$12 sps:$4 sm:$0xff]  }
 0x8b2   :  { %8022 = vmatpush3.bf16.msra.mxu0 %v9344_v18  ;;  %8152 = vmatpush3.bf16.msra.mxu1 %v9345_v19  ;;  %v9382_v18 = vld [vmem:[#allocation28 + $0x50] ss:$12 sps:$4 sm:$0xff]  }
 0x8b3   :  { %8023 = vmatprep.subr.bf16.mxu0 %v9346_v21  ;;  %8153 = vmatprep.subr.bf16.mxu1 %v10110_v39  ;;  %v9385_v19 = vld [vmem:[#allocation28 + $0x64] ss:$12 sps:$4 sm:$0xff]   ;;  %v9386_v21 = vld [vmem:[#allocation28 + $0x68] ss:$12 sps:$4 sm:$0xff]  }
 0x8b4   :  { %8167 = vmatprep.mubr.msk.bf16.mxu1 %vm10111_vm0, %v10110_v39 }
 0x8b6   :  { %8024 = vmatpush3.bf16.msra.mxu0 %v9347_v22  ;;  %8154 = vmatpush3.bf16.msra.mxu1 %v9348_v23  ;;  %v9389_v22 = vld [vmem:[#allocation28 + $0x7c] ss:$12 sps:$4 sm:$0xff]   ;;  %v9387_v23 = vld [vmem:[#allocation28 + $0x78] ss:$12 sps:$4 sm:$0xff]  }
 0x8b7   :  { %8025 = vmatprep.subr.bf16.mxu0 %v9349_v24  ;;  %8155 = vmatprep.subr.bf16.mxu1 %v10110_v39  ;;  %v9390_v24 = vld [vmem:[#allocation28 + $0x80] ss:$12 sps:$4 sm:$0xff]  }
 0x8ba   :  { %8026 = vmatpush3.bf16.msra.mxu0 %v9350_v25  ;;  %8156 = vmatpush3.bf16.msra.mxu1 %v9351_v26  ;;  %v9393_v25 = vld [vmem:[#allocation28 + $0x94] ss:$12 sps:$4 sm:$0xff]   ;;  %v9391_v26 = vld [vmem:[#allocation28 + $0x90] ss:$12 sps:$4 sm:$0xff]  }
 0x8bb   :  { %8027 = vmatprep.subr.bf16.mxu0 %v9352_v27  ;;  %8157 = vmatprep.subr.bf16.mxu1 %v10110_v39  ;;  %v9394_v27 = vld [vmem:[#allocation28 + $0x98] ss:$12 sps:$4 sm:$0xff]  }
 0x8be   :  { %8028 = vmatpush3.bf16.msra.mxu0 %v9353_v28  ;;  %8158 = vmatpush3.bf16.msra.mxu1 %v9354_v29  ;;  %v9397_v28 = vld [vmem:[#allocation28 + $0xac] ss:$12 sps:$4 sm:$0xff]   ;;  %v9395_v29 = vld [vmem:[#allocation28 + $0xa8] ss:$12 sps:$4 sm:$0xff]  }
 0x8bf   :  { %8029 = vmatprep.subr.bf16.mxu0 %v9355_v30  ;;  %8159 = vmatprep.subr.bf16.mxu1 %v10110_v39  ;;  %v9398_v30 = vld [vmem:[#allocation28 + $0xb0] ss:$12 sps:$4 sm:$0xff]  }
 0x8c2   :  { %8030 = vmatpush3.bf16.msra.mxu0 %v9356_v31  ;;  %8160 = vmatpush3.bf16.msra.mxu1 %v9357_v32  ;;  %v9401_v31 = vld [vmem:[#allocation31 + $0x4] ss:$16 sps:$4 sm:$0xff]   ;;  %v9404_v32 = vld [vmem:[#allocation31 + $0xc] ss:$16 sps:$4 sm:$0xff]  }
 0x8c3   :  { %8031 = vmatprep.subr.bf16.mxu0 %v9358_v33  ;;  %8161 = vmatprep.subr.bf16.mxu1 %v10110_v39 }
 0x8c6   :  { %8032 = vmatpush3.bf16.msra.mxu0 %v9359_v34  ;;  %8162 = vmatpush3.bf16.msra.mxu1 %v9360_v35  ;;  %v7844_v35 = vld [vmem:[#allocation26] ss:$0 sm:$0xff] }
 0x8c7   :  { %8163 = vmatprep.subr.bf16.mxu1 %v10110_v39  ;;  %8033 = vmatprep.subr.bf16.mxu0 %v9361_v36 }
 0x8ca   :  { %8034 = vmatpush3.bf16.msra.mxu0 %v9362_v37  ;;  %8164 = vmatpush3.bf16.msra.mxu1 %v9363_v38 }
 0x8cb   :  { %8165 = vmatprep.subr.bf16.mxu1 %v10110_v39  ;;  %8035 = vmatprep.subr.bf16.mxu0 %v9364_v40 }
 0x8ce   :  { %8036 = vmatpush3.bf16.msra.mxu0 %v9365_v41  ;;  %8166 = vmatpush3.bf16.msra.mxu1 %v9366_v42 }
 0x8cf   :  { %8171 = vmatprep.subr.bf16.mxu1 %v10110_v39  ;;  %6065 = vmatprep.subr.bf16.mxu0 %v9369_v43 }
 0x984   :  { %v5555_v47 = vpop.f32.mrb[24].mxu0  ;;  %v8015_v48 = vpop.f32.mrb[28].mxu1 }
 0x985   :  { %v5556_v53 = vadd.f32 %v5555_v47, %v5253_v12  ;;  %v5557_v54 = vpop.f32.mrb[25].mxu0  ;;  %v8016_v55 = vpop.f32.mrb[29].mxu1  ;;  %v9399_v12 = vld [vmem:[#allocation31] ss:$16 sps:$4 sm:$0xff]  }
 0x986   :  { %v5558_v56 = vadd.f32 %v5557_v54, %v5257_v46  ;;  %v8017_v57 = vadd.f32 %v8016_v55, %v8015_v48  ;;  %v5559_v59 = vpop.f32.mrb[26].mxu0  ;;  %v8018_v60 = vpop.f32.mrb[30].mxu1  ;;  %v9402_v46 = vld [vmem:[#allocation31 + $0x8] ss:$16 sps:$4 sm:$0xff]   ;;  %v9407_v48 = vld [vmem:[#allocation31 + $0x24] ss:$16 sps:$4 sm:$0xff]  }
 0x987   :  { %v5602_v62 = vmax.f32 %v5556_v53, 0.0  ;;  %v5560_v63 = vpop.f32.mrb[27].mxu0  ;;  %v8019_v0 = vpop.f32.mrb[31].mxu1  ;;  %v9405_v53 = vld [vmem:[#allocation31 + $0x20] ss:$16 sps:$4 sm:$0xff]  }
 0x988   :  { %v5603_v2 = vmax.f32 %v5558_v56, 0.0  ;;  %v5597_v3 = vadd.f32 %v8017_v57, %v5261_v51  ;;  %v9410_v51 = vld [vmem:[#allocation31 + $0x2c] ss:$16 sps:$4 sm:$0xff]   ;;  %v9408_v54 = vld [vmem:[#allocation31 + $0x28] ss:$16 sps:$4 sm:$0xff]  }
 0x989   :  { %v5605_v7 = vpack.c.bf16 %v5602_v62, %v5602_v62  ;;  %v9413_v55 = vld [vmem:[#allocation31 + $0x44] ss:$16 sps:$4 sm:$0xff]   ;;  %v9416_v56 = vld [vmem:[#allocation31 + $0x4c] ss:$16 sps:$4 sm:$0xff]   ;;  %v9411_v57 = vld [vmem:[#allocation31 + $0x40] ss:$16 sps:$4 sm:$0xff]  }
 0x98a   :  { %v5606_v4 = vpack.c.bf16 %v5603_v2, %v5603_v2  ;;  %v5604_v5 = vmax.f32 %v5597_v3, 0.0  ;;  %v9414_v59 = vld [vmem:[#allocation31 + $0x48] ss:$16 sps:$4 sm:$0xff]   ;;  %v9419_v60 = vld [vmem:[#allocation31 + $0x64] ss:$16 sps:$4 sm:$0xff]  }
 0x98b   :  { %v9422_v62 = vld [vmem:[#allocation31 + $0x6c] ss:$16 sps:$4 sm:$0xff]   ;;  %v9417_v63 = vld [vmem:[#allocation31 + $0x60] ss:$16 sps:$4 sm:$0xff]   ;;  %v9420_v0 = vld [vmem:[#allocation31 + $0x68] ss:$16 sps:$4 sm:$0xff]  }
 0x98c   :  { %v5607_v9 = vpack.c.bf16 %v5604_v5, %v5604_v5  ;;  %5839 = vmatprep.mubr.bf16.mxu0 %v5606_v4  ;;  %v9425_v2 = vld [vmem:[#allocation31 + $0x84] ss:$16 sps:$4 sm:$0xff]   ;;  %v9428_v3 = vld [vmem:[#allocation31 + $0x8c] ss:$16 sps:$4 sm:$0xff]   ;;  %v9423_v4 = vld [vmem:[#allocation31 + $0x80] ss:$16 sps:$4 sm:$0xff]  }
 0x98d   :  { %5840 = vmatmul.mubr.bf16.vlgmr.msra.gmra.mrb[28].mxu0 %v5605_v7  ;;  %v9426_v5 = vld [vmem:[#allocation31 + $0x88] ss:$16 sps:$4 sm:$0xff]   ;;  %v9434_v7 = vld [vmem:[#allocation31 + $0xac] ss:$16 sps:$4 sm:$0xff]  }
 0x98e   :  { %8168 = vmatmul.mubr.bf16.vlgmr.msra.gmra.mrb[32].mxu1 %v5607_v9  ;;  %6066 = vmatpush1.bf16.msra.mxu0 %v9367_v6  ;;  %v9431_v6 = vld [vmem:[#allocation31 + $0xa4] ss:$16 sps:$4 sm:$0xff]  }
 0x98f   :  { %8172 = vmatpush3.bf16.msra.mxu1 %v9370_v17  ;;  %6067 = vmatprep.subr.bf16.mxu0 %v9373_v8  ;;  %v9429_v17 = vld [vmem:[#allocation31 + $0xa0] ss:$16 sps:$4 sm:$0xff]   ;;  %v9432_v8 = vld [vmem:[#allocation31 + $0xa8] ss:$16 sps:$4 sm:$0xff]   ;;  %v9437_v9 = vld [vmem:[#allocation31 + $0xc4] ss:$16 sps:$4 sm:$0xff]  }
 0x990   :  { %8173 = vmatprep.subr.bf16.mxu1 %v10110_v39  ;;  %6097 = vmatprep.mubr.bf16.mxu0 %v10109_v11 }
 0x991   :  { %8187 = vmatprep.mubr.msk.bf16.mxu1 %vm10111_vm0, %v10110_v39 }
 0x992   :  { %6068 = vmatpush1.bf16.msra.mxu0 %v9371_v10  ;;  %v9440_v10 = vld [vmem:[#allocation31 + $0xcc] ss:$16 sps:$4 sm:$0xff]  }
 0x993   :  { %8174 = vmatpush3.bf16.msra.mxu1 %v9374_v13  ;;  %6069 = vmatprep.subr.bf16.mxu0 %v9377_v14  ;;  %v9435_v13 = vld [vmem:[#allocation31 + $0xc0] ss:$16 sps:$4 sm:$0xff]   ;;  %v9438_v14 = vld [vmem:[#allocation31 + $0xc8] ss:$16 sps:$4 sm:$0xff]  }
 0x994   :  { %8175 = vmatprep.subr.bf16.mxu1 %v10110_v39 }
 0x996   :  { %6070 = vmatpush1.bf16.msra.mxu0 %v9375_v49  ;;  %v9443_v49 = vld [vmem:[#allocation31 + $0xe4] ss:$16 sps:$4 sm:$0xff]  }
 0x997   :  { %8176 = vmatpush3.bf16.msra.mxu1 %v9378_v1  ;;  %6071 = vmatprep.subr.bf16.mxu0 %v9381_v61  ;;  %v9446_v1 = vld [vmem:[#allocation31 + $0xec] ss:$16 sps:$4 sm:$0xff]   ;;  %v9441_v61 = vld [vmem:[#allocation31 + $0xe0] ss:$16 sps:$4 sm:$0xff]  }
 0x998   :  { %8177 = vmatprep.subr.bf16.mxu1 %v10110_v39 }
 0x99a   :  { %6072 = vmatpush1.bf16.msra.mxu0 %v9379_v15  ;;  %v9444_v15 = vld [vmem:[#allocation31 + $0xe8] ss:$16 sps:$4 sm:$0xff]  }
 0x99b   :  { %8178 = vmatpush3.bf16.msra.mxu1 %v9382_v18  ;;  %6073 = vmatprep.subr.bf16.mxu0 %v9385_v19  ;;  %v9449_v18 = vld [vmem:[#allocation31 + $0x104] ss:$16 sps:$4 sm:$0xff]   ;;  %v9452_v19 = vld [vmem:[#allocation31 + $0x10c] ss:$16 sps:$4 sm:$0xff]  }
 0x99c   :  { %8179 = vmatprep.subr.bf16.mxu1 %v10110_v39 }
 0x99e   :  { %6074 = vmatpush1.bf16.msra.mxu0 %v9383_v20  ;;  %v9447_v20 = vld [vmem:[#allocation31 + $0x100] ss:$16 sps:$4 sm:$0xff]  }
 0x99f   :  { %8180 = vmatpush3.bf16.msra.mxu1 %v9386_v21  ;;  %6075 = vmatprep.subr.bf16.mxu0 %v9389_v22  ;;  %v9450_v21 = vld [vmem:[#allocation31 + $0x108] ss:$16 sps:$4 sm:$0xff]   ;;  %v9455_v22 = vld [vmem:[#allocation31 + $0x124] ss:$16 sps:$4 sm:$0xff]  }
 0x9a0   :  { %8181 = vmatprep.subr.bf16.mxu1 %v10110_v39 }
 0x9a2   :  { %6076 = vmatpush1.bf16.msra.mxu0 %v9387_v23  ;;  %v9458_v23 = vld [vmem:[#allocation31 + $0x12c] ss:$16 sps:$4 sm:$0xff]  }
 0x9a3   :  { %8182 = vmatpush3.bf16.msra.mxu1 %v9390_v24  ;;  %6077 = vmatprep.subr.bf16.mxu0 %v9393_v25  ;;  %v9453_v24 = vld [vmem:[#allocation31 + $0x120] ss:$16 sps:$4 sm:$0xff]   ;;  %v9456_v25 = vld [vmem:[#allocation31 + $0x128] ss:$16 sps:$4 sm:$0xff]  }
 0x9a4   :  { %8183 = vmatprep.subr.bf16.mxu1 %v10110_v39 }
 0x9a6   :  { %6078 = vmatpush1.bf16.msra.mxu0 %v9391_v26  ;;  %v9461_v26 = vld [vmem:[#allocation31 + $0x144] ss:$16 sps:$4 sm:$0xff]  }
 0x9a7   :  { %8184 = vmatpush3.bf16.msra.mxu1 %v9394_v27  ;;  %6079 = vmatprep.subr.bf16.mxu0 %v9397_v28  ;;  %v9464_v27 = vld [vmem:[#allocation31 + $0x14c] ss:$16 sps:$4 sm:$0xff]   ;;  %v9459_v28 = vld [vmem:[#allocation31 + $0x140] ss:$16 sps:$4 sm:$0xff]  }
 0x9a8   :  { %8185 = vmatprep.subr.bf16.mxu1 %v10110_v39 }
 0x9aa   :  { %6080 = vmatpush1.bf16.msra.mxu0 %v9395_v29  ;;  %v9462_v29 = vld [vmem:[#allocation31 + $0x148] ss:$16 sps:$4 sm:$0xff]  }
 0x9ab   :  { %8186 = vmatpush3.bf16.msra.mxu1 %v9398_v30  ;;  %6750 = vmatprep.subr.bf16.mxu0 %v9401_v31  ;;  %v9467_v30 = vld [vmem:[#allocation31 + $0x164] ss:$16 sps:$4 sm:$0xff]   ;;  %v9470_v31 = vld [vmem:[#allocation31 + $0x16c] ss:$16 sps:$4 sm:$0xff]  }
 0x9ac   :  { %6832 = vmatprep.subr.bf16.mxu1 %v9404_v32  ;;  %v9465_v32 = vld [vmem:[#allocation31 + $0x160] ss:$16 sps:$4 sm:$0xff]  }
 0xa60   :  { %v8037_v33 = vpop.f32.mrb[28].mxu0 }
 0xa61   :  { %v8038_v34 = vpop.f32.mrb[29].mxu0  ;;  %v5881_v36 = vpop.f32.mrb[32].mxu1 }
 0xa62   :  { %v8039_v37 = vadd.f32 %v8038_v34, %v8037_v33  ;;  %v8040_v38 = vpop.f32.mrb[30].mxu0  ;;  %v8169_v40 = vpop.f32.mrb[33].mxu1  ;;  %v9468_v33 = vld [vmem:[#allocation31 + $0x168] ss:$16 sps:$4 sm:$0xff]   ;;  %v9473_v34 = vld [vmem:[#allocation31 + $0x184] ss:$16 sps:$4 sm:$0xff]  }
 0xa63   :  { %v8041_v41 = vpop.f32.mrb[31].mxu0  ;;  %v5884_v42 = vpop.f32.mrb[34].mxu1  ;;  %v9479_v38 = vld [vmem:[#allocation31 + $0x1a4] ss:$16 sps:$4 sm:$0xff]   ;;  %v9482_v40 = vld [vmem:[#allocation31 + $0x1ac] ss:$16 sps:$4 sm:$0xff]  }
 0xa64   :  { %v5842_v43 = vadd.f32 %v8039_v37, %v7844_v35  ;;  %v8170_v39 = vpop.f32.mrb[35].mxu1  ;;  %v9476_v35 = vld [vmem:[#allocation31 + $0x18c] ss:$16 sps:$4 sm:$0xff]   ;;  %v9474_v37 = vld [vmem:[#allocation31 + $0x188] ss:$16 sps:$4 sm:$0xff]  }
 0xa65   :  { %v9477_v41 = vld [vmem:[#allocation31 + $0x1a0] ss:$16 sps:$4 sm:$0xff]   ;;  %v9480_v42 = vld [vmem:[#allocation31 + $0x1a8] ss:$16 sps:$4 sm:$0xff]   ;;  %v9488_v39 = vld [vmem:[#allocation31 + $0x1cc] ss:$16 sps:$4 sm:$0xff]  }
 0xa66   :  { %v5882_v44 = vadd.f32 %v5881_v36, %v5842_v43  ;;  %v9471_v36 = vld [vmem:[#allocation31 + $0x180] ss:$16 sps:$4 sm:$0xff]   ;;  %v9485_v43 = vld [vmem:[#allocation31 + $0x1c4] ss:$16 sps:$4 sm:$0xff]  }
 0xa68   :  { %v5887_v47 = vpack.c.bf16 %v5882_v44, %v5882_v44  ;;  %v9483_v44 = vld [vmem:[#allocation31 + $0x1c0] ss:$16 sps:$4 sm:$0xff]  }
 0xa6a   :  { %6098 = vmatmul.mubr.bf16.vlgmr.msra.gmra.mrb[32].mxu0 %v5887_v47  ;;  %8188 = vmatmul.mubr.bf16.vlgmr.msra.gmra.mrb[36].mxu1 %v5887_v47  ;;  %v9494_v47 = vld [vmem:[#allocation31 + $0x1ec] ss:$16 sps:$4 sm:$0xff]  }
 0xa6b   :  { %6751 = vmatpush1.bf16.msra.mxu0 %v9399_v12  ;;  %6833 = vmatpush1.bf16.msra.mxu1 %v9402_v46  ;;  %v9486_v12 = vld [vmem:[#allocation31 + $0x1c8] ss:$16 sps:$4 sm:$0xff]   ;;  %v9491_v46 = vld [vmem:[#allocation31 + $0x1e4] ss:$16 sps:$4 sm:$0xff]  }
 0xa6c   :  { %6752 = vmatprep.subr.bf16.mxu0 %v9407_v48  ;;  %6834 = vmatprep.subr.bf16.mxu1 %v9410_v51  ;;  %v9489_v48 = vld [vmem:[#allocation31 + $0x1e0] ss:$16 sps:$4 sm:$0xff]   ;;  %v9492_v51 = vld [vmem:[#allocation31 + $0x1e8] ss:$16 sps:$4 sm:$0xff]  }
 0xa6f   :  { %6753 = vmatpush1.bf16.msra.mxu0 %v9405_v53  ;;  %6835 = vmatpush1.bf16.msra.mxu1 %v9408_v54  ;;  %v9497_v53 = vld [vmem:[#allocation31 + $0x204] ss:$16 sps:$4 sm:$0xff]   ;;  %v9500_v54 = vld [vmem:[#allocation31 + $0x20c] ss:$16 sps:$4 sm:$0xff]  }
 0xa70   :  { %6754 = vmatprep.subr.bf16.mxu0 %v9413_v55  ;;  %6836 = vmatprep.subr.bf16.mxu1 %v9416_v56  ;;  %v10689_v55 = vld [vmem:[#allocation29] sm:$0x7] }
 0xa71   :  { %v5925_v56 = vrot.slane %v10689_v55, %v10594_v16 }
 0xa73   :  { %6755 = vmatpush1.bf16.msra.mxu0 %v9411_v57  ;;  %6837 = vmatpush1.bf16.msra.mxu1 %v9414_v59  ;;  %v5929_v57 = vrot.slane %v10689_v55, %v10612_v58 }
 0xa74   :  { %6756 = vmatprep.subr.bf16.mxu0 %v9419_v60  ;;  %6838 = vmatprep.subr.bf16.mxu1 %v9422_v62 }
 0xa77   :  { %6757 = vmatpush1.bf16.msra.mxu0 %v9417_v63  ;;  %6839 = vmatpush1.bf16.msra.mxu1 %v9420_v0 }
 0xa78   :  { %6758 = vmatprep.subr.bf16.mxu0 %v9425_v2  ;;  %6840 = vmatprep.subr.bf16.mxu1 %v9428_v3 }
 0xa7b   :  { %6759 = vmatpush1.bf16.msra.mxu0 %v9423_v4  ;;  %6841 = vmatpush1.bf16.msra.mxu1 %v9426_v5 }
 0xa7c   :  { %6760 = vmatprep.subr.bf16.mxu0 %v9431_v6  ;;  %6842 = vmatprep.subr.bf16.mxu1 %v9434_v7 }
 0xa7f   :  { %6761 = vmatpush1.bf16.msra.mxu0 %v9429_v17  ;;  %6843 = vmatpush1.bf16.msra.mxu1 %v9432_v8 }
 0xa80   :  { %6762 = vmatprep.subr.bf16.mxu0 %v9437_v9  ;;  %6844 = vmatprep.subr.bf16.mxu1 %v9440_v10  ;;  %v9495_v9 = vld [vmem:[#allocation31 + $0x200] ss:$16 sps:$4 sm:$0xff]   ;;  %v9498_v10 = vld [vmem:[#allocation31 + $0x208] ss:$16 sps:$4 sm:$0xff]  }
 0xa83   :  { %6763 = vmatpush1.bf16.msra.mxu0 %v9435_v13  ;;  %6845 = vmatpush1.bf16.msra.mxu1 %v9438_v14  ;;  %v9503_v14 = vld [vmem:[#allocation31 + $0x224] ss:$16 sps:$4 sm:$0xff]  }
 0xa84   :  { %6764 = vmatprep.subr.bf16.mxu0 %v9443_v49  ;;  %6846 = vmatprep.subr.bf16.mxu1 %v9446_v1  ;;  %v9506_v49 = vld [vmem:[#allocation31 + $0x22c] ss:$16 sps:$4 sm:$0xff]   ;;  %v9501_v1 = vld [vmem:[#allocation31 + $0x220] ss:$16 sps:$4 sm:$0xff]  }
 0xa87   :  { %6765 = vmatpush1.bf16.msra.mxu0 %v9441_v61  ;;  %6847 = vmatpush1.bf16.msra.mxu1 %v9444_v15  ;;  %v9504_v61 = vld [vmem:[#allocation31 + $0x228] ss:$16 sps:$4 sm:$0xff]   ;;  %v9509_v15 = vld [vmem:[#allocation31 + $0x244] ss:$16 sps:$4 sm:$0xff]  }
 0xa88   :  { %6766 = vmatprep.subr.bf16.mxu0 %v9449_v18  ;;  %6848 = vmatprep.subr.bf16.mxu1 %v9452_v19  ;;  %v9512_v18 = vld [vmem:[#allocation31 + $0x24c] ss:$16 sps:$4 sm:$0xff]   ;;  %v9507_v19 = vld [vmem:[#allocation31 + $0x240] ss:$16 sps:$4 sm:$0xff]  }
 0xa8b   :  { %6767 = vmatpush1.bf16.msra.mxu0 %v9447_v20  ;;  %6849 = vmatpush1.bf16.msra.mxu1 %v9450_v21  ;;  %v9510_v20 = vld [vmem:[#allocation31 + $0x248] ss:$16 sps:$4 sm:$0xff]   ;;  %v9515_v21 = vld [vmem:[#allocation31 + $0x264] ss:$16 sps:$4 sm:$0xff]  }
 0xa8c   :  { %6768 = vmatprep.subr.bf16.mxu0 %v9455_v22  ;;  %6850 = vmatprep.subr.bf16.mxu1 %v9458_v23  ;;  %v9518_v22 = vld [vmem:[#allocation31 + $0x26c] ss:$16 sps:$4 sm:$0xff]   ;;  %v9513_v23 = vld [vmem:[#allocation31 + $0x260] ss:$16 sps:$4 sm:$0xff]  }
 0xa8f   :  { %6769 = vmatpush1.bf16.msra.mxu0 %v9453_v24  ;;  %6851 = vmatpush1.bf16.msra.mxu1 %v9456_v25  ;;  %v9516_v24 = vld [vmem:[#allocation31 + $0x268] ss:$16 sps:$4 sm:$0xff]   ;;  %v9521_v25 = vld [vmem:[#allocation31 + $0x284] ss:$16 sps:$4 sm:$0xff]  }
 0xa90   :  { %6770 = vmatprep.subr.bf16.mxu0 %v9461_v26  ;;  %6852 = vmatprep.subr.bf16.mxu1 %v9464_v27  ;;  %v9524_v26 = vld [vmem:[#allocation31 + $0x28c] ss:$16 sps:$4 sm:$0xff]   ;;  %v9519_v27 = vld [vmem:[#allocation31 + $0x280] ss:$16 sps:$4 sm:$0xff]  }
 0xa93   :  { %6771 = vmatpush1.bf16.msra.mxu0 %v9459_v28  ;;  %6853 = vmatpush1.bf16.msra.mxu1 %v9462_v29  ;;  %v9527_v28 = vld [vmem:[#allocation31 + $0x2a4] ss:$16 sps:$4 sm:$0xff]   ;;  %v9530_v29 = vld [vmem:[#allocation31 + $0x2ac] ss:$16 sps:$4 sm:$0xff]  }
 0xa94   :  { %6772 = vmatprep.subr.bf16.mxu0 %v9467_v30  ;;  %6854 = vmatprep.subr.bf16.mxu1 %v9470_v31  ;;  %v9525_v30 = vld [vmem:[#allocation31 + $0x2a0] ss:$16 sps:$4 sm:$0xff]   ;;  %v9528_v31 = vld [vmem:[#allocation31 + $0x2a8] ss:$16 sps:$4 sm:$0xff]  }
 0xa97   :  { %6773 = vmatpush1.bf16.msra.mxu0 %v9465_v32  ;;  %6855 = vmatpush1.bf16.msra.mxu1 %v9468_v33  ;;  %v5933_v32 = vrot.slane %v10689_v55, %v10615_v50  ;;  %v9533_v33 = vld [vmem:[#allocation31 + $0x2c4] ss:$16 sps:$4 sm:$0xff]   ;;  %v6970_v55 = vld [vmem:[#allocation34 + $0x108] sm:$0xff] }
 0xa98   :  { %6774 = vmatprep.subr.bf16.mxu0 %v9473_v34  ;;  %6856 = vmatprep.subr.bf16.mxu1 %v9476_v35  ;;  %v9536_v34 = vld [vmem:[#allocation31 + $0x2cc] ss:$16 sps:$4 sm:$0xff]   ;;  %v9531_v35 = vld [vmem:[#allocation31 + $0x2c0] ss:$16 sps:$4 sm:$0xff]  }
 0xa9b   :  { %6775 = vmatpush1.bf16.msra.mxu0 %v9471_v36  ;;  %6857 = vmatpush1.bf16.msra.mxu1 %v9474_v37  ;;  %v9534_v36 = vld [vmem:[#allocation31 + $0x2c8] ss:$16 sps:$4 sm:$0xff]  }
 0xa9c   :  { %6776 = vmatprep.subr.bf16.mxu0 %v9479_v38  ;;  %6858 = vmatprep.subr.bf16.mxu1 %v9482_v40  ;;  %v9539_v38 = vld [vmem:[#allocation31 + $0x2e4] ss:$16 sps:$4 sm:$0xff]   ;;  %v9542_v40 = vld [vmem:[#allocation31 + $0x2ec] ss:$16 sps:$4 sm:$0xff]  }
 0xa9f   :  { %6777 = vmatpush1.bf16.msra.mxu0 %v9477_v41  ;;  %6859 = vmatpush1.bf16.msra.mxu1 %v9480_v42  ;;  %v6953_v41 = vld [vmem:[#allocation34 + $0x80] sm:$0xff]  ;;  %v6954_v42 = vld [vmem:[#allocation34 + $0x88] sm:$0xff] }
 0xaa0   :  { %6778 = vmatprep.subr.bf16.mxu0 %v9485_v43  ;;  %6860 = vmatprep.subr.bf16.mxu1 %v9488_v39  ;;  %v6985_v43 = vld [vmem:[#allocation34 + $0x180] sm:$0xff]  ;;  %v6986_v39 = vld [vmem:[#allocation34 + $0x188] sm:$0xff] }
 0xaa3   :  { %6779 = vmatpush1.bf16.msra.mxu0 %v9483_v44  ;;  %6861 = vmatpush1.bf16.msra.mxu1 %v9486_v12  ;;  %v9537_v44 = vld [vmem:[#allocation31 + $0x2e0] ss:$16 sps:$4 sm:$0xff]   ;;  %v9540_v12 = vld [vmem:[#allocation31 + $0x2e8] ss:$16 sps:$4 sm:$0xff]  }
 0xaa4   :  { %6780 = vmatprep.subr.bf16.mxu0 %v9491_v46  ;;  %6862 = vmatprep.subr.bf16.mxu1 %v9494_v47  ;;  %v6937_v46 = vld [vmem:[#allocation34] sm:$0xff]  ;;  %v6938_v47 = vld [vmem:[#allocation34 + $0x8] sm:$0xff] }
 0xaa7   :  { %6781 = vmatpush1.bf16.msra.mxu0 %v9489_v48  ;;  %6863 = vmatpush1.bf16.msra.mxu1 %v9492_v51  ;;  %v8191_v51 = vpack.c.bf16 %v6954_v42, %v6953_v41  ;;  %v6977_v42 = vld [vmem:[#allocation34 + $0x140] sm:$0xff] }
 0xaa8   :  { %6791 = vmatprep.subr.bf16.mxu0 %v9497_v53  ;;  %6873 = vmatprep.subr.bf16.mxu1 %v9500_v54  ;;  %v8223_v53 = vpack.c.bf16 %v6986_v39, %v6985_v43  ;;  %v6969_v54 = vld [vmem:[#allocation34 + $0x100] sm:$0xff]  ;;  %v6978_v43 = vld [vmem:[#allocation34 + $0x148] sm:$0xff]  ;;  %v6963_v39 = vld [vmem:[#allocation34 + $0xd0] sm:$0xff] }
 0xb3d   :  { %v6099_v59 = vpop.f32.mrb[32].mxu0  ;;  %v10695_v60 = vpop.f32.mrb[36].mxu1 }
 0xb3e   :  { %v6100_v62 = vadd.f32 %v6099_v59, %v5925_v56  ;;  %v6101_v63 = vpop.f32.mrb[33].mxu0  ;;  %v8189_v0 = vpop.f32.mrb[37].mxu1  ;;  %v6141_v37 = vadd.f32 %v10695_v60, %v5933_v32  ;;  %v6955_v56 = vld [vmem:[#allocation34 + $0x90] sm:$0xff]  ;;  %v6988_v60 = vld [vmem:[#allocation34 + $0x198] sm:$0xff]  ;;  %v6962_v32 = vld [vmem:[#allocation34 + $0xc8] sm:$0xff] }
 0xb3f   :  { %v6102_v2 = vadd.f32 %v6101_v63, %v5929_v57  ;;  %v6103_v3 = vpop.f32.mrb[34].mxu0  ;;  %v6143_v4 = vpop.f32.mrb[38].mxu1  ;;  %v6956_v57 = vld [vmem:[#allocation34 + $0x98] sm:$0xff]  ;;  %v6987_v59 = vld [vmem:[#allocation34 + $0x190] sm:$0xff]  ;;  %v8225_v63 = vpack.c.bf16 %v6970_v55, %v6969_v54 }
 0xb40   :  { %v6146_v5 = vmax.f32 %v6100_v62, 0.0  ;;  %v6104_v6 = vpop.f32.mrb[35].mxu0  ;;  %v8190_v7 = vpop.f32.mrb[39].mxu1  ;;  %v6148_v48 = vmax.f32 %v6141_v37, 0.0  ;;  %v8193_v62 = vpack.c.bf16 %v6938_v47, %v6937_v46  ;;  %v6939_v0 = vld [vmem:[#allocation34 + $0x10] sm:$0xff]  ;;  %v8195_v4 = vpack.c.bf16 %v6956_v57, %v6955_v56  ;;  %v6945_v37 = vld [vmem:[#allocation34 + $0x40] sm:$0xff] }
 0xb41   :  { %v6147_v17 = vmax.f32 %v6102_v2, 0.0  ;;  %v6940_v2 = vld [vmem:[#allocation34 + $0x18] sm:$0xff]  ;;  %v6971_v6 = vld [vmem:[#allocation34 + $0x110] sm:$0xff] }
 0xb42   :  { %v6149_v13 = vpack.c.bf16 %v6146_v5, %v6146_v5  ;;  %v6151_v3 = vpack.c.bf16 %v6148_v48, %v6148_v48  ;;  %v8227_v5 = vpack.c.bf16 %v6988_v60, %v6987_v59  ;;  %v6972_v7 = vld [vmem:[#allocation34 + $0x118] sm:$0xff]  ;;  %v8241_v48 = vpack.c.bf16 %v6978_v43, %v6977_v42  ;;  %v6979_v56 = vld [vmem:[#allocation34 + $0x150] sm:$0xff]  ;;  %v6965_v59 = vld [vmem:[#allocation34 + $0xe0] sm:$0xff] }
 0xb43   :  { %v6150_v8 = vpack.c.bf16 %v6147_v17, %v6147_v17  ;;  %v6957_v17 = vld [vmem:[#allocation34 + $0xa0] sm:$0xff]  ;;  %v6996_v46 = vld [vmem:[#allocation34 + $0x1d8] sm:$0xff]  ;;  %v6966_v60 = vld [vmem:[#allocation34 + $0xe8] sm:$0xff] }
 0xb44   :  { %v6980_v57 = vld [vmem:[#allocation34 + $0x158] sm:$0xff] }
 0xb45   :  { %6782 = vmatprep.mubr.bf16.mxu0 %v6150_v8  ;;  %6864 = vmatprep.mubr.bf16.mxu1 %v6150_v8  ;;  %v6958_v8 = vld [vmem:[#allocation34 + $0xa8] sm:$0xff] }
 0xb46   :  { %6783 = vmatmul.mubr.bf16.vlgmr.msra.gmra.mrb[36].mxu0 %v6149_v13  ;;  %6865 = vmatmul.mubr.bf16.vlgmr.msra.gmra.mrb[40].mxu1 %v6149_v13  ;;  %v8197_v13 = vpack.c.bf16 %v6940_v2, %v6939_v0  ;;  %v8245_v2 = vpack.c.bf16 %v6980_v57, %v6979_v56 }
 0xb47   :  { %6792 = vmatpush1.bf16.msra.mxu0 %v9495_v9  ;;  %6874 = vmatpush1.bf16.msra.mxu1 %v9498_v10  ;;  %v6989_v9 = vld [vmem:[#allocation34 + $0x1a0] sm:$0xff]  ;;  %v6990_v10 = vld [vmem:[#allocation34 + $0x1a8] sm:$0xff] }
 0xb48   :  { %6793 = vmatprep.subr.bf16.mxu0 %v9503_v14  ;;  %6875 = vmatprep.subr.bf16.mxu1 %v9506_v49  ;;  %v8229_v14 = vpack.c.bf16 %v6972_v7, %v6971_v6  ;;  %v6941_v49 = vld [vmem:[#allocation34 + $0x20] sm:$0xff]  ;;  %v6950_v6 = vld [vmem:[#allocation34 + $0x68] sm:$0xff] }
 0xb49   :  { %6823 = vmatprep.mubr.bf16.mxu0 %v10109_v11  ;;  %6905 = vmatprep.mubr.bf16.mxu1 %v10109_v11  ;;  %v9522_v11 = vld [vmem:[#allocation31 + $0x288] ss:$16 sps:$4 sm:$0xff]  }
 0xb4a   :  { %v6981_v7 = vld [vmem:[#allocation34 + $0x160] sm:$0xff] }
 0xb4b   :  { %6794 = vmatpush1.bf16.msra.mxu0 %v9501_v1  ;;  %6876 = vmatpush1.bf16.msra.mxu1 %v9504_v61  ;;  %v6942_v1 = vld [vmem:[#allocation34 + $0x28] sm:$0xff]  ;;  %v8199_v61 = vpack.c.bf16 %v6958_v8, %v6957_v17 }
 0xb4c   :  { %6795 = vmatprep.subr.bf16.mxu0 %v9509_v15  ;;  %6877 = vmatprep.subr.bf16.mxu1 %v9512_v18  ;;  %v8231_v15 = vpack.c.bf16 %v6990_v10, %v6989_v9  ;;  %v6973_v18 = vld [vmem:[#allocation34 + $0x120] sm:$0xff]  ;;  %v6982_v17 = vld [vmem:[#allocation34 + $0x168] sm:$0xff]  ;;  %v6967_v10 = vld [vmem:[#allocation34 + $0xf0] sm:$0xff] }
 0xb4d   :  { %v8249_v9 = vpack.c.bf16 %v6982_v17, %v6981_v7 }
 0xb4f   :  { %6796 = vmatpush1.bf16.msra.mxu0 %v9507_v19  ;;  %6878 = vmatpush1.bf16.msra.mxu1 %v9510_v20  ;;  %v6974_v19 = vld [vmem:[#allocation34 + $0x128] sm:$0xff]  ;;  %v6959_v20 = vld [vmem:[#allocation34 + $0xb0] sm:$0xff] }
 0xb50   :  { %6797 = vmatprep.subr.bf16.mxu0 %v9515_v21  ;;  %6879 = vmatprep.subr.bf16.mxu1 %v9518_v22  ;;  %v6960_v21 = vld [vmem:[#allocation34 + $0xb8] sm:$0xff]  ;;  %v6991_v22 = vld [vmem:[#allocation34 + $0x1b0] sm:$0xff] }
 0xb53   :  { %6798 = vmatpush1.bf16.msra.mxu0 %v9513_v23  ;;  %6880 = vmatpush1.bf16.msra.mxu1 %v9516_v24  ;;  %v6992_v23 = vld [vmem:[#allocation34 + $0x1b8] sm:$0xff]  ;;  %v8201_v24 = vpack.c.bf16 %v6942_v1, %v6941_v49 }
 0xb54   :  { %6799 = vmatprep.subr.bf16.mxu0 %v9521_v25  ;;  %6881 = vmatprep.subr.bf16.mxu1 %v9524_v26  ;;  %v8233_v25 = vpack.c.bf16 %v6974_v19, %v6973_v18  ;;  %v6943_v26 = vld [vmem:[#allocation34 + $0x30] sm:$0xff]  ;;  %v7000_v1 = vld [vmem:[#allocation34 + $0x1f8] sm:$0xff] }
 0xb55   :  { %v6983_v19 = vld [vmem:[#allocation34 + $0x170] sm:$0xff] }
 0xb57   :  { %6800 = vmatpush1.bf16.msra.mxu0 %v9519_v27  ;;  %6882 = vmatpush1.bf16.msra.mxu1 %v9522_v11  ;;  %v6944_v27 = vld [vmem:[#allocation34 + $0x38] sm:$0xff]  ;;  %v8203_v11 = vpack.c.bf16 %v6960_v21, %v6959_v20 }
 0xb58   :  { %6801 = vmatprep.subr.bf16.mxu0 %v9527_v28  ;;  %6883 = vmatprep.subr.bf16.mxu1 %v9530_v29  ;;  %v8235_v28 = vpack.c.bf16 %v6992_v23, %v6991_v22  ;;  %v6975_v29 = vld [vmem:[#allocation34 + $0x130] sm:$0xff]  ;;  %v6984_v20 = vld [vmem:[#allocation34 + $0x178] sm:$0xff] }
 0xb59   :  { %v8253_v22 = vpack.c.bf16 %v6984_v20, %v6983_v19  ;;  %v6248_v23 = vld [vmem:[#allocation32] sm:$0xf] }
 0xb5b   :  { %6802 = vmatpush1.bf16.msra.mxu0 %v9525_v30  ;;  %6884 = vmatpush1.bf16.msra.mxu1 %v9528_v31  ;;  %v6976_v30 = vld [vmem:[#allocation34 + $0x138] sm:$0xff]  ;;  %v6961_v31 = vld [vmem:[#allocation34 + $0xc0] sm:$0xff] }
 0xb5c   :  { %6803 = vmatprep.subr.bf16.mxu0 %v9533_v33  ;;  %6885 = vmatprep.subr.bf16.mxu1 %v9536_v34  ;;  %v6993_v33 = vld [vmem:[#allocation34 + $0x1c0] sm:$0xff]  ;;  %v6994_v34 = vld [vmem:[#allocation34 + $0x1c8] sm:$0xff] }
 0xb5d   :  { %v8239_v41 = vpack.c.bf16 %v6994_v34, %v6993_v33 }
 0xb5f   :  { %6804 = vmatpush1.bf16.msra.mxu0 %v9531_v35  ;;  %6886 = vmatpush1.bf16.msra.mxu1 %v9534_v36  ;;  %v8205_v35 = vpack.c.bf16 %v6944_v27, %v6943_v26  ;;  %v8237_v36 = vpack.c.bf16 %v6976_v30, %v6975_v29  ;;  %v6253_v26 = vrot.slane %v6248_v23, %v10594_v16 }
 0xb60   :  { %6805 = vmatprep.subr.bf16.mxu0 %v9539_v38  ;;  %6887 = vmatprep.subr.bf16.mxu1 %v9542_v40  ;;  %v6946_v38 = vld [vmem:[#allocation34 + $0x48] sm:$0xff]  ;;  %v8207_v40 = vpack.c.bf16 %v6962_v32, %v6961_v31  ;;  %v6261_v27 = vrot.slane %v6248_v23, %v10615_v50  ;;  %v6265_v29 = vrot.slane %v6248_v23, %v10597_v52 }
 0xb61   :  { %v8209_v47 = vpack.c.bf16 %v6946_v38, %v6945_v37 }
 0xb63   :  { %6806 = vmatpush1.bf16.msra.mxu0 %v9537_v44  ;;  %6888 = vmatpush1.bf16.msra.mxu1 %v9540_v12  ;;  %v6964_v44 = vld [vmem:[#allocation34 + $0xd8] sm:$0xff]  ;;  %v6995_v12 = vld [vmem:[#allocation34 + $0x1d0] sm:$0xff] }
 0xb64   :  { %8192 = vmatprep.subr.bf16.mxu0 %v8191_v51  ;;  %8224 = vmatprep.subr.bf16.mxu1 %v8223_v53  ;;  %v6947_v51 = vld [vmem:[#allocation34 + $0x50] sm:$0xff]  ;;  %v6948_v53 = vld [vmem:[#allocation34 + $0x58] sm:$0xff]  ;;  %v8211_v54 = vpack.c.bf16 %v6964_v44, %v6963_v39  ;;  %v8243_v55 = vpack.c.bf16 %v6996_v46, %v6995_v12  ;;  %v7989_v12 = vld [vmem:[#allocation35] ss:$0 sm:$0xff] }
 0xb65   :  { %v8213_v0 = vpack.c.bf16 %v6948_v53, %v6947_v51 }
 0xb66   :  { %6824 = vmatmul.mubr.bf16.vlgmr.msra.gmra.mrb[36].mxu0 %v6151_v3  ;;  %6906 = vmatmul.mubr.bf16.vlgmr.msra.gmra.mrb[40].mxu1 %v6151_v3  ;;  %v6949_v3 = vld [vmem:[#allocation34 + $0x60] sm:$0xff] }
 0xb67   :  { %8194 = vmatpush3.bf16.msra.mxu0 %v8193_v62  ;;  %8226 = vmatpush3.bf16.msra.mxu1 %v8225_v63  ;;  %v6997_v62 = vld [vmem:[#allocation34 + $0x1e0] sm:$0xff]  ;;  %v6998_v63 = vld [vmem:[#allocation34 + $0x1e8] sm:$0xff]  ;;  %v8217_v8 = vpack.c.bf16 %v6950_v6, %v6949_v3 }
 0xb68   :  { %8196 = vmatprep.subr.bf16.mxu0 %v8195_v4  ;;  %8228 = vmatprep.subr.bf16.mxu1 %v8227_v5  ;;  %v8215_v4 = vpack.c.bf16 %v6966_v60, %v6965_v59  ;;  %v8247_v5 = vpack.c.bf16 %v6998_v63, %v6997_v62 }
 0xb6b   :  { %8198 = vmatpush3.bf16.msra.mxu0 %v8197_v13  ;;  %8230 = vmatpush3.bf16.msra.mxu1 %v8229_v14  ;;  %v6968_v13 = vld [vmem:[#allocation34 + $0xf8] sm:$0xff]  ;;  %v6999_v14 = vld [vmem:[#allocation34 + $0x1f0] sm:$0xff] }
 0xb6c   :  { %8200 = vmatprep.subr.bf16.mxu0 %v8199_v61  ;;  %8232 = vmatprep.subr.bf16.mxu1 %v8231_v15  ;;  %v8219_v49 = vpack.c.bf16 %v6968_v13, %v6967_v10  ;;  %v6951_v61 = vld [vmem:[#allocation34 + $0x70] sm:$0xff]  ;;  %v6952_v15 = vld [vmem:[#allocation34 + $0x78] sm:$0xff]  ;;  %v8251_v18 = vpack.c.bf16 %v7000_v1, %v6999_v14 }
 0xb6d   :  { %v8221_v21 = vpack.c.bf16 %v6952_v15, %v6951_v61 }
 0xb6f   :  { %8202 = vmatpush3.bf16.msra.mxu0 %v8201_v24  ;;  %8234 = vmatpush3.bf16.msra.mxu1 %v8233_v25  ;;  %v10112_v24 = vmov 1983009808  }
 0xb70   :  { %8204 = vmatprep.subr.bf16.mxu0 %v8203_v11  ;;  %8236 = vmatprep.subr.bf16.mxu1 %v8235_v28  ;;  %v6921_v25 = vunpack.c.l.s4 %v10112_v24  ;;  %v6257_v11 = vrot.slane %v6248_v23, %v10612_v58 }
 0xb72   :  { %v6922_v28 = vunpack.c.0.s8 %v6921_v25 }
 0xb73   :  { %8206 = vmatpush3.bf16.msra.mxu0 %v8205_v35  ;;  %8238 = vmatpush3.bf16.msra.mxu1 %v8237_v36 }
 0xb74   :  { %8208 = vmatprep.subr.bf16.mxu0 %v8207_v40  ;;  %8240 = vmatprep.subr.bf16.mxu1 %v8239_v41  ;;  %v6925_v37 = vsub.s32 %v6922_v28, %v10551_v45 }
 0xb77   :  { %8210 = vmatpush3.bf16.msra.mxu0 %v8209_v47  ;;  %8242 = vmatpush3.bf16.msra.mxu1 %v8241_v48 }
 0xb78   :  { %8212 = vmatprep.subr.bf16.mxu0 %v8211_v54  ;;  %8244 = vmatprep.subr.bf16.mxu1 %v8243_v55 }
 0xb7b   :  { %8214 = vmatpush3.bf16.msra.mxu0 %v8213_v0  ;;  %8246 = vmatpush3.bf16.msra.mxu1 %v8245_v2 }
 0xb7c   :  { %8216 = vmatprep.subr.bf16.mxu0 %v8215_v4  ;;  %8248 = vmatprep.subr.bf16.mxu1 %v8247_v5 }
 0xb7f   :  { %8218 = vmatpush3.bf16.msra.mxu0 %v8217_v8  ;;  %8250 = vmatpush3.bf16.msra.mxu1 %v8249_v9 }
 0xb80   :  { %8220 = vmatprep.subr.bf16.mxu0 %v8219_v49  ;;  %8252 = vmatprep.subr.bf16.mxu1 %v8251_v18 }
 0xb83   :  { %8222 = vmatpush3.bf16.msra.mxu0 %v8221_v21  ;;  %8254 = vmatpush3.bf16.msra.mxu1 %v8253_v22 }
 0xc39   :  { %v6825_v30 = vpop.f32.mrb[36].mxu0  ;;  %v6907_v31 = vpop.f32.mrb[40].mxu1 }
 0xc3a   :  { %v8273_v32 = vadd.f32 %v6825_v30, %v6253_v26  ;;  %v8275_v33 = vadd.f32 %v6907_v31, %v6261_v27  ;;  %v6827_v34 = vpop.f32.mrb[37].mxu0  ;;  %v6909_v35 = vpop.f32.mrb[41].mxu1 }
 0xc3b   :  { %v8274_v36 = vadd.f32 %v6827_v34, %v6257_v11  ;;  %v8276_v38 = vadd.f32 %v6909_v35, %v6265_v29  ;;  %v6829_v40 = vpop.f32.mrb[38].mxu0  ;;  %v6911_v41 = vpop.f32.mrb[42].mxu1 }
 0xc3c   :  { %v6830_v16 = vpop.f32.mrb[39].mxu0  ;;  %v6912_v42 = vpop.f32.mrb[43].mxu1 }
 0xc3d   :  { %v6918_v50 = vcombine.low %v8273_v32, %v8274_v36  ;;  %v6919_v43 = vcombine.low %v8275_v33, %v8276_v38  ;;  %7072 = vmatprep.mubr.f32.mxu0 %v8274_v36  ;;  %7142 = vmatprep.mubr.f32.mxu1 %v8276_v38 }
 0xc3e   :  { %7073 = vmatmul.mubr.f32.vlgmr.msra.gmra.mrb[40].mxu0 %v8273_v32  ;;  %7143 = vmatmul.mubr.f32.vlgmr.msra.gmra.mrb[44].mxu1 %v8275_v33 }
 0xc3f   :  { %v6926_v52 = vrot.slane %v6918_v50, %v6925_v37  ;;  %v6933_v58 = vrot.slane %v6919_v43, %v6925_v37 }
 0xc41   :  { %v6934_v39 = vcombine.low %v6926_v52, %v6933_v58 }
 0xc43   :  { %6936 = vst [vmem:[%s10745_s23] sm:$0xff] %v6934_v39 }
 0xd11   :  { %v8093_v44 = vpop.f32.mrb[40].mxu0  ;;  %v8128_v45 = vpop.f32.mrb[44].mxu1 }
 0xd12   :  { %v8094_v46 = vpop.f32.mrb[41].mxu0  ;;  %v8129_v47 = vpop.f32.mrb[45].mxu1 }
 0xd13   :  { %v8095_v48 = vadd.f32 %v8094_v46, %v8093_v44  ;;  %v8130_v51 = vadd.f32 %v8129_v47, %v8128_v45 }
 0xd15   :  { %v7075_v53 = vadd.f32 %v8095_v48, %v7989_v12 }
 0xd17   :  { %v7145_v54 = vadd.f32 %v8130_v51, %v7075_v53 }
 0xd19   :  { %7148 = vst [vmem:[#allocation37] sm:$0x3] %v7145_v54 }
 0xd1a   :  { %10039 = shalt.err (!%p10036_p12)
}
 0xd1b   :  { %s10775_s3 = sld [smem:[#allocation60_spill]] }
 0xd21   :  { %s10040_s25 = scalar_lea.hbm %s10775_s3, 32 }
 0xd22   :  { %p10041_p13 = scmp.ne.s32.totalorder %s10775_s3, %s10040_s25  ;;  %p10044_p0 = scmp.lt.u32.totalorder %s10040_s25, %s10775_s3 }
 0xd24   :  { %p10046_p1 = pnand %p10044_p0, %p10041_p13 }
 0xd26   :  { %10049 = shalt.err (!%p10046_p1)
}
 0xd27   :  { %7160 = dma.vmem_to_hbm [thread:$0]  %s7158_s1, 32, %s10775_s3, [#allocation4]  }
 0xd28   :  { %10074 = dma.done.wait [#allocation4], 32  }
 0xd29   :  { %10075 = vsyncadd [#allocation4], 4294967264 }
 0xd2a   :  { %7166 = vsyncpa [#allocation3], 1 }
 0xd2b   :  { %7167 = vsyncpa [#allocation6], 1 }
 0xd2c   :  { %7168 = vsyncpa [#allocation9], 1 }
 0xd2d   :  { %7169 = vsyncpa [#allocation12], 1 }
 0xd2e   :  { %7170 = vsyncpa [#allocation15], 1 }
 0xd2f   :  { %7171 = vsyncpa [#allocation18], 1 }
 0xd30   :  { %7172 = vsyncpa [#allocation21], 1 }
 0xd31   :  { %7173 = vsyncpa [#allocation24], 1 }
 0xd32   :  { %7174 = vsyncpa [#allocation27], 1 }
 0xd33   :  { %7175 = vsyncpa [#allocation30], 1 }
 0xd34   :  { %7176 = vsyncpa [#allocation33], 1 }
 0xd35   :  { %7177 = vsyncpa [#allocation36], 1 }
 0xd36   :  { %7178 = vsyncpa [#allocation4], 1 }

</bundles_post_ra>
